<compile_context>
chip_gen: v7x
topology: tpu7x:2x2x1
jax: 0.10.0
libtpu: 0.0.40
codegen_flags: <defaults>
</compile_context>

<pallas_src>
import jax
import jax.numpy as jnp
from jax import lax
from jax.experimental import pallas as pl
from jax.experimental.pallas import tpu as pltpu

EMBED_SIZE = 300
HIDDEN_SIZE = 128
NUM_CLASSES = 4
VOCAB_SIZE = 50
PAD_IDX = 1          # stands in for token2int['<eos>'] (padding_idx row zeroed)
CP = 128             # class dim padded to one full lane group (lane-dense stores)
TB = 8               # batch tile = one f32 sublane group


def _make_bigru_decision_kernel(T, tb, H):
    H2, H3 = 2 * H, 3 * H

    def kernel(emb_ref,   # (T*tb, E)   bf16  time-major embeddings, row = t*tb + b
               wih_ref,   # (E, 6H)     bf16  [W_ih_fwd | W_ih_bwd], gate order r,z,n
               whh_ref,   # (2H, 6H)    bf16  block-diagonal recurrent weight
               wdec_ref,  # (2H, CP)    bf16  decision weight, lane-padded
               out_ref,   # (T*tb, CP)  f32   padded logits (bias added in wrapper)
               gx_ref,    # scratch (T*tb, 6H) f32 : hoisted input projections
               h_ref):    # scratch (T*tb, 2H) f32 : packed [h_fwd | h_bwd] slab
        # ---- 1) Hoisted input projection: ONE big MXU matmul (M = T*tb) ----------
        gx_ref[...] = jnp.dot(emb_ref[...], wih_ref[...],
                              preferred_element_type=jnp.float32)

        # ---- 2) Bidirectional recurrence: statically unrolled, one fused dot/step -
        h = jnp.zeros((tb, H2), jnp.float32)          # [h_fwd | h_bwd]
        for t in range(T):                            # T small & static -> full unroll
            gh = jnp.dot(h.astype(jnp.bfloat16), whh_ref[...],
                         preferred_element_type=jnp.float32)          # (tb, 6H)
            gx_f = gx_ref[t * tb:(t + 1) * tb, :H3]                   # fwd: time t
            gx_b = gx_ref[(T - 1 - t) * tb:(T - t) * tb, H3:]         # bwd: time T-1-t

            # forward direction (gate math in f32; gate order r, z, n)
            r_f = jax.nn.sigmoid(gx_f[:, :H] + gh[:, :H])
            z_f = jax.nn.sigmoid(gx_f[:, H:2 * H] + gh[:, H:2 * H])
            n_f = jnp.tanh(gx_f[:, 2 * H:] + r_f * gh[:, 2 * H:H3])
            h_f = (1.0 - z_f) * n_f + z_f * h[:, :H]

            # backward direction
            r_b = jax.nn.sigmoid(gx_b[:, :H] + gh[:, H3:H3 + H])
            z_b = jax.nn.sigmoid(gx_b[:, H:2 * H] + gh[:, H3 + H:H3 + 2 * H])
            n_b = jnp.tanh(gx_b[:, 2 * H:] + r_b * gh[:, H3 + 2 * H:])
            h_b = (1.0 - z_b) * n_b + z_b * h[:, H:]

            # packed hidden slab: fwd output belongs to time t, bwd to time T-1-t
            h_ref[t * tb:(t + 1) * tb, :H] = h_f
            h_ref[(T - 1 - t) * tb:(T - t) * tb, H:] = h_b
            h = jnp.concatenate([h_f, h_b], axis=1)

        # ---- 3) Decision layer: single lane-dense matmul (T*tb, 2H) @ (2H, CP) ----
        # TODO(synk): Dropout(0.3) is identity in eval mode; training-mode RNG mask not implemented.
        out_ref[...] = jnp.dot(h_ref[...].astype(jnp.bfloat16), wdec_ref[...],
                               preferred_element_type=jnp.float32)

    return kernel


@jax.jit
def rnn_forward(x_ids, params):
    bf = jnp.bfloat16
    H, C, E = HIDDEN_SIZE, NUM_CLASSES, EMBED_SIZE
    B, T = x_ids.shape

    # Pad batch to a multiple of TB so all in-kernel sublane slices are 8-aligned.
    B_pad = ((B + TB - 1) // TB) * TB
    nB = B_pad // TB
    ids = x_ids
    if B_pad != B:
        ids = jnp.concatenate(
            [ids, jnp.full((B_pad - B, T), PAD_IDX, jnp.int32)], axis=0)

    # Re-tile the token ids (cheap int32 work) so the embedding gather directly
    # produces the kernel layout (nB, T*TB, E) with row = t*TB + b.
    ids_tiles = ids.reshape(nB, TB, T).transpose(0, 2, 1).reshape(nB, T * TB)
    emb = jnp.take(params["embed"].astype(bf), ids_tiles, axis=0)      # (nB, T*TB, E) bf16

    # Pack parameters for the kernel (all bf16).
    wih_comb = jnp.concatenate([params["wih_f"], params["wih_b"]], axis=1).astype(bf)  # (E, 6H)
    whh_bd = jnp.zeros((2 * H, 6 * H), jnp.float32)
    whh_bd = whh_bd.at[:H, :3 * H].set(params["whh_f"])
    whh_bd = whh_bd.at[H:, 3 * H:].set(params["whh_b"])
    whh_bd = whh_bd.astype(bf)                                                         # (2H, 6H)
    wdec_pad = jnp.zeros((2 * H, CP), jnp.float32).at[:, :C].set(params["wdec"]).astype(bf)

    out = pl.pallas_call(
        _make_bigru_decision_kernel(T, TB, H),
        out_shape=jax.ShapeDtypeStruct((nB, T * TB, CP), jnp.float32),
        grid=(nB,),
        in_specs=[
            pl.BlockSpec((None, T * TB, E), lambda i: (i, 0, 0)),
            pl.BlockSpec((E, 6 * H), lambda i: (0, 0)),
            pl.BlockSpec((2 * H, 6 * H), lambda i: (0, 0)),
            pl.BlockSpec((2 * H, CP), lambda i: (0, 0)),
        ],
        out_specs=pl.BlockSpec((None, T * TB, CP), lambda i: (i, 0, 0)),
        scratch_shapes=[pltpu.VMEM((T * TB, 6 * H), jnp.float32),
                        pltpu.VMEM((T * TB, 2 * H), jnp.float32)],
        compiler_params=pltpu.CompilerParams(
            dimension_semantics=("parallel",)),
    )(emb, wih_comb, whh_bd, wdec_pad)

    # (nB, T*TB, CP) -> (B, T, C): drop lane padding first, then cheap transpose.
    logits = out[:, :, :C].reshape(nB, T, TB, C).transpose(0, 2, 1, 3)
    logits = logits.reshape(B_pad, T, C)[:B] + params["bdec"][0]
    return logits                                                       # (B, T, C)


# ------------------------------ pure-JAX reference ------------------------------
def _gru_ref_dir(emb_tm_bf, wih_bf, whh_bf):
    """Single-direction GRU (bias-free), bf16 weights, f32 gate math."""
    H = whh_bf.shape[0]

    def step(h, x):
        gx = jnp.dot(x, wih_bf, preferred_element_type=jnp.float32)
        gh = jnp.dot(h.astype(whh_bf.dtype), whh_bf, preferred_element_type=jnp.float32)
        r = jax.nn.sigmoid(gx[:, :H] + gh[:, :H])
        z = jax.nn.sigmoid(gx[:, H:2 * H] + gh[:, H:2 * H])
        n = jnp.tanh(gx[:, 2 * H:] + r * gh[:, 2 * H:])
        h = (1.0 - z) * n + z * h
        return h, h

    B = emb_tm_bf.shape[1]
    _, hs = lax.scan(step, jnp.zeros((B, H), jnp.float32), emb_tm_bf)
    return hs                                                           # (T, B, H) f32


@jax.jit
def rnn_forward_ref(x_ids, params):
    bf = jnp.bfloat16
    emb = jnp.take(params["embed"].astype(bf), x_ids, axis=0)           # (B, T, E) bf16
    emb_tm = jnp.transpose(emb, (1, 0, 2))                              # (T, B, E)
    hf = _gru_ref_dir(emb_tm, params["wih_f"].astype(bf), params["whh_f"].astype(bf))
    hb = _gru_ref_dir(emb_tm[::-1], params["wih_b"].astype(bf), params["whh_b"].astype(bf))[::-1]
    hid = jnp.concatenate([hf, hb], axis=-1)                            # (T, B, 2H) f32
    logits = jnp.dot(hid.astype(bf), params["wdec"].astype(bf),
                     preferred_element_type=jnp.float32) + params["bdec"][0]
    return jnp.transpose(logits, (1, 0, 2))                             # (B, T, C)


def init_params(key):
    E, H, C, V = EMBED_SIZE, HIDDEN_SIZE, NUM_CLASSES, VOCAB_SIZE
    ks = jax.random.split(key, 8)
    s_gru = 1.0 / jnp.sqrt(H)
    s_dec = 1.0 / jnp.sqrt(2 * H)
    embed = jax.random.normal(ks[0], (V, E), jnp.float32) * 0.1
    embed = embed.at[PAD_IDX].set(0.0)                                  # padding_idx row zeroed
    return {
        "embed": embed,
        # Stored as W^T so the kernel can do x @ W^T directly; gate order r,z,n.
        "wih_f": jax.random.uniform(ks[1], (E, 3 * H), jnp.float32, -s_gru, s_gru),
        "whh_f": jax.random.uniform(ks[2], (H, 3 * H), jnp.float32, -s_gru, s_gru),
        "wih_b": jax.random.uniform(ks[3], (E, 3 * H), jnp.float32, -s_gru, s_gru),
        "whh_b": jax.random.uniform(ks[4], (H, 3 * H), jnp.float32, -s_gru, s_gru),
        "wdec": jax.random.uniform(ks[5], (2 * H, C), jnp.float32, -s_dec, s_dec),
        "bdec": jax.random.uniform(ks[6], (1, C), jnp.float32, -s_dec, s_dec),
    }


if __name__ == "__main__":
    key = jax.random.PRNGKey(0)
    kp, kx = jax.random.split(key)
    params = init_params(kp)

    B, T = 2, 8
    x_ids = jax.random.randint(kx, (B, T), 0, VOCAB_SIZE, dtype=jnp.int32)

    out = jax.block_until_ready(rnn_forward(x_ids, params))
    ref = jax.block_until_ready(rnn_forward_ref(x_ids, params))

    assert out.shape == (B, T, NUM_CLASSES), out.shape
    max_err = jnp.max(jnp.abs(out - ref))
    assert jnp.allclose(out, ref, atol=5e-3, rtol=5e-3), f"max abs err {max_err}"

    print("KERNEL_OK")
</pallas_src>

<mosaic_0001>
module attributes {stable_mosaic.version = 11 : i64} {
  func.func @kernel(%arg0: i32, %arg1: memref<1x64x300xbf16, #tpu.memory_space<vmem>>, %arg2: memref<300x768xbf16, #tpu.memory_space<vmem>>, %arg3: memref<256x768xbf16, #tpu.memory_space<vmem>>, %arg4: memref<256x128xbf16, #tpu.memory_space<vmem>>, %arg5: memref<1x64x128xf32, #tpu.memory_space<vmem>>, %arg6: memref<64x768xf32, #tpu.memory_space<vmem>>, %arg7: memref<64x256xf32, #tpu.memory_space<vmem>>) attributes {dimension_semantics = [#tpu.dimension_semantics<parallel>], iteration_bounds = array<i64: 1>, scalar_prefetch = 0 : i64, scratch_operands = 2 : i64, tpu.core_type = #tpu.core_type<tc>, window_params = [{transform_indices = @transform_0, window_bounds = array<i64: 1, 64, 300>}, {pipeline_mode = #tpu.pipeline_mode<synchronous>, transform_indices = @transform_1, window_bounds = array<i64: 300, 768>}, {pipeline_mode = #tpu.pipeline_mode<synchronous>, transform_indices = @transform_2, window_bounds = array<i64: 256, 768>}, {pipeline_mode = #tpu.pipeline_mode<synchronous>, transform_indices = @transform_3, window_bounds = array<i64: 256, 128>}, {transform_indices = @transform_4, window_bounds = array<i64: 1, 64, 128>}]} {
    %c0 = arith.constant 0 : index
    %c0_0 = arith.constant 0 : index
    %c0_1 = arith.constant 0 : index
    %0 = vector.load %arg1[%c0, %c0_0, %c0_1] : memref<1x64x300xbf16, #tpu.memory_space<vmem>>, vector<1x64x300xbf16>
    %1 = vector.shape_cast %0 : vector<1x64x300xbf16> to vector<64x300xbf16>
    %c0_2 = arith.constant 0 : index
    %c0_3 = arith.constant 0 : index
    %2 = vector.load %arg2[%c0_2, %c0_3] : memref<300x768xbf16, #tpu.memory_space<vmem>>, vector<300x768xbf16>
    %cst = arith.constant dense<0.000000e+00> : vector<64x768xf32>
    %3 = tpu.matmul %1, %2, %cst {dimension_numbers = #tpu.dot_dimension_numbers<[1], [0], [0], [1], [0, 0, 1, 1], [], []>} : vector<64x300xbf16>, vector<300x768xbf16>, vector<64x768xf32> -> vector<64x768xf32>
    %c0_4 = arith.constant 0 : index
    %c0_5 = arith.constant 0 : index
    %4 = vector.load %arg6[%c0_4, %c0_5] : memref<64x768xf32, #tpu.memory_space<vmem>>, vector<64x768xf32>
    tpu.vector_store %arg6[%c0_4, %c0_5], %3 {strides = array<i32>} : memref<64x768xf32, #tpu.memory_space<vmem>>, vector<64x768xf32>,
    %cst_6 = arith.constant 0.000000e+00 : f32
    %5 = vector.broadcast %cst_6 : f32 to vector<8x256xf32>
    %6 = arith.truncf %5 : vector<8x256xf32> to vector<8x256xbf16>
    %c0_7 = arith.constant 0 : index
    %c0_8 = arith.constant 0 : index
    %7 = vector.load %arg3[%c0_7, %c0_8] : memref<256x768xbf16, #tpu.memory_space<vmem>>, vector<256x768xbf16>
    %cst_9 = arith.constant dense<0.000000e+00> : vector<8x768xf32>
    %8 = tpu.matmul %6, %7, %cst_9 {dimension_numbers = #tpu.dot_dimension_numbers<[1], [0], [0], [1], [0, 0, 1, 1], [], []>} : vector<8x256xbf16>, vector<256x768xbf16>, vector<8x768xf32> -> vector<8x768xf32>
    %c0_10 = arith.constant 0 : index
    %c0_11 = arith.constant 0 : index
    %9 = vector.load %arg6[%c0_10, %c0_11] : memref<64x768xf32, #tpu.memory_space<vmem>>, vector<8x384xf32>
    %c56 = arith.constant 56 : index
    %c384 = arith.constant 384 : index
    %10 = vector.load %arg6[%c56, %c384] : memref<64x768xf32, #tpu.memory_space<vmem>>, vector<8x384xf32>
    %11 = vector.extract_strided_slice %9 {offsets = [0, 0], sizes = [8, 128], strides = [1, 1]} : vector<8x384xf32> to vector<8x128xf32>
    %12 = vector.extract_strided_slice %8 {offsets = [0, 0], sizes = [8, 128], strides = [1, 1]} : vector<8x768xf32> to vector<8x128xf32>
    %13 = arith.addf %11, %12 : vector<8x128xf32>
    %14 = arith.negf %13 : vector<8x128xf32>
    %15 = math.exp %14 : vector<8x128xf32>
    %cst_12 = arith.constant 1.000000e+00 : f32
    %16 = vector.broadcast %cst_12 : f32 to vector<8x128xf32>
    %17 = arith.addf %16, %15 : vector<8x128xf32>
    %18 = arith.divf %16, %17 : vector<8x128xf32>
    %19 = vector.extract_strided_slice %9 {offsets = [0, 128], sizes = [8, 128], strides = [1, 1]} : vector<8x384xf32> to vector<8x128xf32>
    %20 = vector.extract_strided_slice %8 {offsets = [0, 128], sizes = [8, 128], strides = [1, 1]} : vector<8x768xf32> to vector<8x128xf32>
    %21 = arith.addf %19, %20 : vector<8x128xf32>
    %22 = arith.negf %21 : vector<8x128xf32>
    %23 = math.exp %22 : vector<8x128xf32>
    %cst_13 = arith.constant 1.000000e+00 : f32
    %24 = vector.broadcast %cst_13 : f32 to vector<8x128xf32>
    %25 = arith.addf %24, %23 : vector<8x128xf32>
    %26 = arith.divf %24, %25 : vector<8x128xf32>
    %27 = vector.extract_strided_slice %9 {offsets = [0, 256], sizes = [8, 128], strides = [1, 1]} : vector<8x384xf32> to vector<8x128xf32>
    %28 = vector.extract_strided_slice %8 {offsets = [0, 256], sizes = [8, 128], strides = [1, 1]} : vector<8x768xf32> to vector<8x128xf32>
    %29 = arith.mulf %18, %28 : vector<8x128xf32>
    %30 = arith.addf %27, %29 : vector<8x128xf32>
    %31 = math.tanh %30 : vector<8x128xf32>
    %cst_14 = arith.constant 1.000000e+00 : f32
    %32 = vector.broadcast %cst_14 : f32 to vector<8x128xf32>
    %33 = arith.subf %32, %26 : vector<8x128xf32>
    %34 = arith.mulf %33, %31 : vector<8x128xf32>
    %35 = vector.extract_strided_slice %5 {offsets = [0, 0], sizes = [8, 128], strides = [1, 1]} : vector<8x256xf32> to vector<8x128xf32>
    %36 = arith.mulf %26, %35 : vector<8x128xf32>
    %37 = arith.addf %34, %36 : vector<8x128xf32>
    %38 = vector.extract_strided_slice %10 {offsets = [0, 0], sizes = [8, 128], strides = [1, 1]} : vector<8x384xf32> to vector<8x128xf32>
    %39 = vector.extract_strided_slice %8 {offsets = [0, 384], sizes = [8, 128], strides = [1, 1]} : vector<8x768xf32> to vector<8x128xf32>
    %40 = arith.addf %38, %39 : vector<8x128xf32>
    %41 = arith.negf %40 : vector<8x128xf32>
    %42 = math.exp %41 : vector<8x128xf32>
    %cst_15 = arith.constant 1.000000e+00 : f32
    %43 = vector.broadcast %cst_15 : f32 to vector<8x128xf32>
    %44 = arith.addf %43, %42 : vector<8x128xf32>
    %45 = arith.divf %43, %44 : vector<8x128xf32>
    %46 = vector.extract_strided_slice %10 {offsets = [0, 128], sizes = [8, 128], strides = [1, 1]} : vector<8x384xf32> to vector<8x128xf32>
    %47 = vector.extract_strided_slice %8 {offsets = [0, 512], sizes = [8, 128], strides = [1, 1]} : vector<8x768xf32> to vector<8x128xf32>
    %48 = arith.addf %46, %47 : vector<8x128xf32>
    %49 = arith.negf %48 : vector<8x128xf32>
    %50 = math.exp %49 : vector<8x128xf32>
    %cst_16 = arith.constant 1.000000e+00 : f32
    %51 = vector.broadcast %cst_16 : f32 to vector<8x128xf32>
    %52 = arith.addf %51, %50 : vector<8x128xf32>
    %53 = arith.divf %51, %52 : vector<8x128xf32>
    %54 = vector.extract_strided_slice %10 {offsets = [0, 256], sizes = [8, 128], strides = [1, 1]} : vector<8x384xf32> to vector<8x128xf32>
    %55 = vector.extract_strided_slice %8 {offsets = [0, 640], sizes = [8, 128], strides = [1, 1]} : vector<8x768xf32> to vector<8x128xf32>
    %56 = arith.mulf %45, %55 : vector<8x128xf32>
    %57 = arith.addf %54, %56 : vector<8x128xf32>
    %58 = math.tanh %57 : vector<8x128xf32>
    %cst_17 = arith.constant 1.000000e+00 : f32
    %59 = vector.broadcast %cst_17 : f32 to vector<8x128xf32>
    %60 = arith.subf %59, %53 : vector<8x128xf32>
    %61 = arith.mulf %60, %58 : vector<8x128xf32>
    %62 = vector.extract_strided_slice %5 {offsets = [0, 128], sizes = [8, 128], strides = [1, 1]} : vector<8x256xf32> to vector<8x128xf32>
    %63 = arith.mulf %53, %62 : vector<8x128xf32>
    %64 = arith.addf %61, %63 : vector<8x128xf32>
    %c0_18 = arith.constant 0 : index
    %c0_19 = arith.constant 0 : index
    %65 = vector.load %arg7[%c0_18, %c0_19] : memref<64x256xf32, #tpu.memory_space<vmem>>, vector<8x128xf32>
    tpu.vector_store %arg7[%c0_18, %c0_19], %37 {strides = array<i32>} : memref<64x256xf32, #tpu.memory_space<vmem>>, vector<8x128xf32>,
    %c56_20 = arith.constant 56 : index
    %c128 = arith.constant 128 : index
    %66 = vector.load %arg7[%c56_20, %c128] : memref<64x256xf32, #tpu.memory_space<vmem>>, vector<8x128xf32>
    tpu.vector_store %arg7[%c56_20, %c128], %64 {strides = array<i32>} : memref<64x256xf32, #tpu.memory_space<vmem>>, vector<8x128xf32>,
    %67 = tpu.concatenate %37, %64 in 1 : vector<8x128xf32>, vector<8x128xf32> -> vector<8x256xf32>
    %68 = arith.truncf %67 : vector<8x256xf32> to vector<8x256xbf16>
    %c0_21 = arith.constant 0 : index
    %c0_22 = arith.constant 0 : index
    %69 = vector.load %arg3[%c0_21, %c0_22] : memref<256x768xbf16, #tpu.memory_space<vmem>>, vector<256x768xbf16>
    %cst_23 = arith.constant dense<0.000000e+00> : vector<8x768xf32>
    %70 = tpu.matmul %68, %69, %cst_23 {dimension_numbers = #tpu.dot_dimension_numbers<[1], [0], [0], [1], [0, 0, 1, 1], [], []>} : vector<8x256xbf16>, vector<256x768xbf16>, vector<8x768xf32> -> vector<8x768xf32>
    %c8 = arith.constant 8 : index
    %c0_24 = arith.constant 0 : index
    %71 = vector.load %arg6[%c8, %c0_24] : memref<64x768xf32, #tpu.memory_space<vmem>>, vector<8x384xf32>
    %c48 = arith.constant 48 : index
    %c384_25 = arith.constant 384 : index
    %72 = vector.load %arg6[%c48, %c384_25] : memref<64x768xf32, #tpu.memory_space<vmem>>, vector<8x384xf32>
    %73 = vector.extract_strided_slice %71 {offsets = [0, 0], sizes = [8, 128], strides = [1, 1]} : vector<8x384xf32> to vector<8x128xf32>
    %74 = vector.extract_strided_slice %70 {offsets = [0, 0], sizes = [8, 128], strides = [1, 1]} : vector<8x768xf32> to vector<8x128xf32>
    %75 = arith.addf %73, %74 : vector<8x128xf32>
    %76 = arith.negf %75 : vector<8x128xf32>
    %77 = math.exp %76 : vector<8x128xf32>
    %cst_26 = arith.constant 1.000000e+00 : f32
    %78 = vector.broadcast %cst_26 : f32 to vector<8x128xf32>
    %79 = arith.addf %78, %77 : vector<8x128xf32>
    %80 = arith.divf %78, %79 : vector<8x128xf32>
    %81 = vector.extract_strided_slice %71 {offsets = [0, 128], sizes = [8, 128], strides = [1, 1]} : vector<8x384xf32> to vector<8x128xf32>
    %82 = vector.extract_strided_slice %70 {offsets = [0, 128], sizes = [8, 128], strides = [1, 1]} : vector<8x768xf32> to vector<8x128xf32>
    %83 = arith.addf %81, %82 : vector<8x128xf32>
    %84 = arith.negf %83 : vector<8x128xf32>
    %85 = math.exp %84 : vector<8x128xf32>
    %cst_27 = arith.constant 1.000000e+00 : f32
    %86 = vector.broadcast %cst_27 : f32 to vector<8x128xf32>
    %87 = arith.addf %86, %85 : vector<8x128xf32>
    %88 = arith.divf %86, %87 : vector<8x128xf32>
    %89 = vector.extract_strided_slice %71 {offsets = [0, 256], sizes = [8, 128], strides = [1, 1]} : vector<8x384xf32> to vector<8x128xf32>
    %90 = vector.extract_strided_slice %70 {offsets = [0, 256], sizes = [8, 128], strides = [1, 1]} : vector<8x768xf32> to vector<8x128xf32>
    %91 = arith.mulf %80, %90 : vector<8x128xf32>
    %92 = arith.addf %89, %91 : vector<8x128xf32>
    %93 = math.tanh %92 : vector<8x128xf32>
    %cst_28 = arith.constant 1.000000e+00 : f32
    %94 = vector.broadcast %cst_28 : f32 to vector<8x128xf32>
    %95 = arith.subf %94, %88 : vector<8x128xf32>
    %96 = arith.mulf %95, %93 : vector<8x128xf32>
    %97 = vector.extract_strided_slice %67 {offsets = [0, 0], sizes = [8, 128], strides = [1, 1]} : vector<8x256xf32> to vector<8x128xf32>
    %98 = arith.mulf %88, %97 : vector<8x128xf32>
    %99 = arith.addf %96, %98 : vector<8x128xf32>
    %100 = vector.extract_strided_slice %72 {offsets = [0, 0], sizes = [8, 128], strides = [1, 1]} : vector<8x384xf32> to vector<8x128xf32>
    %101 = vector.extract_strided_slice %70 {offsets = [0, 384], sizes = [8, 128], strides = [1, 1]} : vector<8x768xf32> to vector<8x128xf32>
    %102 = arith.addf %100, %101 : vector<8x128xf32>
    %103 = arith.negf %102 : vector<8x128xf32>
    %104 = math.exp %103 : vector<8x128xf32>
    %cst_29 = arith.constant 1.000000e+00 : f32
    %105 = vector.broadcast %cst_29 : f32 to vector<8x128xf32>
    %106 = arith.addf %105, %104 : vector<8x128xf32>
    %107 = arith.divf %105, %106 : vector<8x128xf32>
    %108 = vector.extract_strided_slice %72 {offsets = [0, 128], sizes = [8, 128], strides = [1, 1]} : vector<8x384xf32> to vector<8x128xf32>
    %109 = vector.extract_strided_slice %70 {offsets = [0, 512], sizes = [8, 128], strides = [1, 1]} : vector<8x768xf32> to vector<8x128xf32>
    %110 = arith.addf %108, %109 : vector<8x128xf32>
    %111 = arith.negf %110 : vector<8x128xf32>
    %112 = math.exp %111 : vector<8x128xf32>
    %cst_30 = arith.constant 1.000000e+00 : f32
    %113 = vector.broadcast %cst_30 : f32 to vector<8x128xf32>
    %114 = arith.addf %113, %112 : vector<8x128xf32>
    %115 = arith.divf %113, %114 : vector<8x128xf32>
    %116 = vector.extract_strided_slice %72 {offsets = [0, 256], sizes = [8, 128], strides = [1, 1]} : vector<8x384xf32> to vector<8x128xf32>
    %117 = vector.extract_strided_slice %70 {offsets = [0, 640], sizes = [8, 128], strides = [1, 1]} : vector<8x768xf32> to vector<8x128xf32>
    %118 = arith.mulf %107, %117 : vector<8x128xf32>
    %119 = arith.addf %116, %118 : vector<8x128xf32>
    %120 = math.tanh %119 : vector<8x128xf32>
    %cst_31 = arith.constant 1.000000e+00 : f32
    %121 = vector.broadcast %cst_31 : f32 to vector<8x128xf32>
    %122 = arith.subf %121, %115 : vector<8x128xf32>
    %123 = arith.mulf %122, %120 : vector<8x128xf32>
    %124 = vector.extract_strided_slice %67 {offsets = [0, 128], sizes = [8, 128], strides = [1, 1]} : vector<8x256xf32> to vector<8x128xf32>
    %125 = arith.mulf %115, %124 : vector<8x128xf32>
    %126 = arith.addf %123, %125 : vector<8x128xf32>
    %c8_32 = arith.constant 8 : index
    %c0_33 = arith.constant 0 : index
    %127 = vector.load %arg7[%c8_32, %c0_33] : memref<64x256xf32, #tpu.memory_space<vmem>>, vector<8x128xf32>
    tpu.vector_store %arg7[%c8_32, %c0_33], %99 {strides = array<i32>} : memref<64x256xf32, #tpu.memory_space<vmem>>, vector<8x128xf32>,
    %c48_34 = arith.constant 48 : index
    %c128_35 = arith.constant 128 : index
    %128 = vector.load %arg7[%c48_34, %c128_35] : memref<64x256xf32, #tpu.memory_space<vmem>>, vector<8x128xf32>
    tpu.vector_store %arg7[%c48_34, %c128_35], %126 {strides = array<i32>} : memref<64x256xf32, #tpu.memory_space<vmem>>, vector<8x128xf32>,
    %129 = tpu.concatenate %99, %126 in 1 : vector<8x128xf32>, vector<8x128xf32> -> vector<8x256xf32>
    %130 = arith.truncf %129 : vector<8x256xf32> to vector<8x256xbf16>
    %c0_36 = arith.constant 0 : index
    %c0_37 = arith.constant 0 : index
    %131 = vector.load %arg3[%c0_36, %c0_37] : memref<256x768xbf16, #tpu.memory_space<vmem>>, vector<256x768xbf16>
    %cst_38 = arith.constant dense<0.000000e+00> : vector<8x768xf32>
    %132 = tpu.matmul %130, %131, %cst_38 {dimension_numbers = #tpu.dot_dimension_numbers<[1], [0], [0], [1], [0, 0, 1, 1], [], []>} : vector<8x256xbf16>, vector<256x768xbf16>, vector<8x768xf32> -> vector<8x768xf32>
    %c16 = arith.constant 16 : index
    %c0_39 = arith.constant 0 : index
    %133 = vector.load %arg6[%c16, %c0_39] : memref<64x768xf32, #tpu.memory_space<vmem>>, vector<8x384xf32>
    %c40 = arith.constant 40 : index
    %c384_40 = arith.constant 384 : index
    %134 = vector.load %arg6[%c40, %c384_40] : memref<64x768xf32, #tpu.memory_space<vmem>>, vector<8x384xf32>
    %135 = vector.extract_strided_slice %133 {offsets = [0, 0], sizes = [8, 128], strides = [1, 1]} : vector<8x384xf32> to vector<8x128xf32>
    %136 = vector.extract_strided_slice %132 {offsets = [0, 0], sizes = [8, 128], strides = [1, 1]} : vector<8x768xf32> to vector<8x128xf32>
    %137 = arith.addf %135, %136 : vector<8x128xf32>
    %138 = arith.negf %137 : vector<8x128xf32>
    %139 = math.exp %138 : vector<8x128xf32>
    %cst_41 = arith.constant 1.000000e+00 : f32
    %140 = vector.broadcast %cst_41 : f32 to vector<8x128xf32>
    %141 = arith.addf %140, %139 : vector<8x128xf32>
    %142 = arith.divf %140, %141 : vector<8x128xf32>
    %143 = vector.extract_strided_slice %133 {offsets = [0, 128], sizes = [8, 128], strides = [1, 1]} : vector<8x384xf32> to vector<8x128xf32>
    %144 = vector.extract_strided_slice %132 {offsets = [0, 128], sizes = [8, 128], strides = [1, 1]} : vector<8x768xf32> to vector<8x128xf32>
    %145 = arith.addf %143, %144 : vector<8x128xf32>
    %146 = arith.negf %145 : vector<8x128xf32>
    %147 = math.exp %146 : vector<8x128xf32>
    %cst_42 = arith.constant 1.000000e+00 : f32
    %148 = vector.broadcast %cst_42 : f32 to vector<8x128xf32>
    %149 = arith.addf %148, %147 : vector<8x128xf32>
    %150 = arith.divf %148, %149 : vector<8x128xf32>
    %151 = vector.extract_strided_slice %133 {offsets = [0, 256], sizes = [8, 128], strides = [1, 1]} : vector<8x384xf32> to vector<8x128xf32>
    %152 = vector.extract_strided_slice %132 {offsets = [0, 256], sizes = [8, 128], strides = [1, 1]} : vector<8x768xf32> to vector<8x128xf32>
    %153 = arith.mulf %142, %152 : vector<8x128xf32>
    %154 = arith.addf %151, %153 : vector<8x128xf32>
    %155 = math.tanh %154 : vector<8x128xf32>
    %cst_43 = arith.constant 1.000000e+00 : f32
    %156 = vector.broadcast %cst_43 : f32 to vector<8x128xf32>
    %157 = arith.subf %156, %150 : vector<8x128xf32>
    %158 = arith.mulf %157, %155 : vector<8x128xf32>
    %159 = vector.extract_strided_slice %129 {offsets = [0, 0], sizes = [8, 128], strides = [1, 1]} : vector<8x256xf32> to vector<8x128xf32>
    %160 = arith.mulf %150, %159 : vector<8x128xf32>
    %161 = arith.addf %158, %160 : vector<8x128xf32>
    %162 = vector.extract_strided_slice %134 {offsets = [0, 0], sizes = [8, 128], strides = [1, 1]} : vector<8x384xf32> to vector<8x128xf32>
    %163 = vector.extract_strided_slice %132 {offsets = [0, 384], sizes = [8, 128], strides = [1, 1]} : vector<8x768xf32> to vector<8x128xf32>
    %164 = arith.addf %162, %163 : vector<8x128xf32>
    %165 = arith.negf %164 : vector<8x128xf32>
    %166 = math.exp %165 : vector<8x128xf32>
    %cst_44 = arith.constant 1.000000e+00 : f32
    %167 = vector.broadcast %cst_44 : f32 to vector<8x128xf32>
    %168 = arith.addf %167, %166 : vector<8x128xf32>
    %169 = arith.divf %167, %168 : vector<8x128xf32>
    %170 = vector.extract_strided_slice %134 {offsets = [0, 128], sizes = [8, 128], strides = [1, 1]} : vector<8x384xf32> to vector<8x128xf32>
    %171 = vector.extract_strided_slice %132 {offsets = [0, 512], sizes = [8, 128], strides = [1, 1]} : vector<8x768xf32> to vector<8x128xf32>
    %172 = arith.addf %170, %171 : vector<8x128xf32>
    %173 = arith.negf %172 : vector<8x128xf32>
    %174 = math.exp %173 : vector<8x128xf32>
    %cst_45 = arith.constant 1.000000e+00 : f32
    %175 = vector.broadcast %cst_45 : f32 to vector<8x128xf32>
    %176 = arith.addf %175, %174 : vector<8x128xf32>
    %177 = arith.divf %175, %176 : vector<8x128xf32>
    %178 = vector.extract_strided_slice %134 {offsets = [0, 256], sizes = [8, 128], strides = [1, 1]} : vector<8x384xf32> to vector<8x128xf32>
    %179 = vector.extract_strided_slice %132 {offsets = [0, 640], sizes = [8, 128], strides = [1, 1]} : vector<8x768xf32> to vector<8x128xf32>
    %180 = arith.mulf %169, %179 : vector<8x128xf32>
    %181 = arith.addf %178, %180 : vector<8x128xf32>
    %182 = math.tanh %181 : vector<8x128xf32>
    %cst_46 = arith.constant 1.000000e+00 : f32
    %183 = vector.broadcast %cst_46 : f32 to vector<8x128xf32>
    %184 = arith.subf %183, %177 : vector<8x128xf32>
    %185 = arith.mulf %184, %182 : vector<8x128xf32>
    %186 = vector.extract_strided_slice %129 {offsets = [0, 128], sizes = [8, 128], strides = [1, 1]} : vector<8x256xf32> to vector<8x128xf32>
    %187 = arith.mulf %177, %186 : vector<8x128xf32>
    %188 = arith.addf %185, %187 : vector<8x128xf32>
    %c16_47 = arith.constant 16 : index
    %c0_48 = arith.constant 0 : index
    %189 = vector.load %arg7[%c16_47, %c0_48] : memref<64x256xf32, #tpu.memory_space<vmem>>, vector<8x128xf32>
    tpu.vector_store %arg7[%c16_47, %c0_48], %161 {strides = array<i32>} : memref<64x256xf32, #tpu.memory_space<vmem>>, vector<8x128xf32>,
    %c40_49 = arith.constant 40 : index
    %c128_50 = arith.constant 128 : index
    %190 = vector.load %arg7[%c40_49, %c128_50] : memref<64x256xf32, #tpu.memory_space<vmem>>, vector<8x128xf32>
    tpu.vector_store %arg7[%c40_49, %c128_50], %188 {strides = array<i32>} : memref<64x256xf32, #tpu.memory_space<vmem>>, vector<8x128xf32>,
    %191 = tpu.concatenate %161, %188 in 1 : vector<8x128xf32>, vector<8x128xf32> -> vector<8x256xf32>
    %192 = arith.truncf %191 : vector<8x256xf32> to vector<8x256xbf16>
    %c0_51 = arith.constant 0 : index
    %c0_52 = arith.constant 0 : index
    %193 = vector.load %arg3[%c0_51, %c0_52] : memref<256x768xbf16, #tpu.memory_space<vmem>>, vector<256x768xbf16>
    %cst_53 = arith.constant dense<0.000000e+00> : vector<8x768xf32>
    %194 = tpu.matmul %192, %193, %cst_53 {dimension_numbers = #tpu.dot_dimension_numbers<[1], [0], [0], [1], [0, 0, 1, 1], [], []>} : vector<8x256xbf16>, vector<256x768xbf16>, vector<8x768xf32> -> vector<8x768xf32>
    %c24 = arith.constant 24 : index
    %c0_54 = arith.constant 0 : index
    %195 = vector.load %arg6[%c24, %c0_54] : memref<64x768xf32, #tpu.memory_space<vmem>>, vector<8x384xf32>
    %c32 = arith.constant 32 : index
    %c384_55 = arith.constant 384 : index
    %196 = vector.load %arg6[%c32, %c384_55] : memref<64x768xf32, #tpu.memory_space<vmem>>, vector<8x384xf32>
    %197 = vector.extract_strided_slice %195 {offsets = [0, 0], sizes = [8, 128], strides = [1, 1]} : vector<8x384xf32> to vector<8x128xf32>
    %198 = vector.extract_strided_slice %194 {offsets = [0, 0], sizes = [8, 128], strides = [1, 1]} : vector<8x768xf32> to vector<8x128xf32>
    %199 = arith.addf %197, %198 : vector<8x128xf32>
    %200 = arith.negf %199 : vector<8x128xf32>
    %201 = math.exp %200 : vector<8x128xf32>
    %cst_56 = arith.constant 1.000000e+00 : f32
    %202 = vector.broadcast %cst_56 : f32 to vector<8x128xf32>
    %203 = arith.addf %202, %201 : vector<8x128xf32>
    %204 = arith.divf %202, %203 : vector<8x128xf32>
    %205 = vector.extract_strided_slice %195 {offsets = [0, 128], sizes = [8, 128], strides = [1, 1]} : vector<8x384xf32> to vector<8x128xf32>
    %206 = vector.extract_strided_slice %194 {offsets = [0, 128], sizes = [8, 128], strides = [1, 1]} : vector<8x768xf32> to vector<8x128xf32>
    %207 = arith.addf %205, %206 : vector<8x128xf32>
    %208 = arith.negf %207 : vector<8x128xf32>
    %209 = math.exp %208 : vector<8x128xf32>
    %cst_57 = arith.constant 1.000000e+00 : f32
    %210 = vector.broadcast %cst_57 : f32 to vector<8x128xf32>
    %211 = arith.addf %210, %209 : vector<8x128xf32>
    %212 = arith.divf %210, %211 : vector<8x128xf32>
    %213 = vector.extract_strided_slice %195 {offsets = [0, 256], sizes = [8, 128], strides = [1, 1]} : vector<8x384xf32> to vector<8x128xf32>
    %214 = vector.extract_strided_slice %194 {offsets = [0, 256], sizes = [8, 128], strides = [1, 1]} : vector<8x768xf32> to vector<8x128xf32>
    %215 = arith.mulf %204, %214 : vector<8x128xf32>
    %216 = arith.addf %213, %215 : vector<8x128xf32>
    %217 = math.tanh %216 : vector<8x128xf32>
    %cst_58 = arith.constant 1.000000e+00 : f32
    %218 = vector.broadcast %cst_58 : f32 to vector<8x128xf32>
    %219 = arith.subf %218, %212 : vector<8x128xf32>
    %220 = arith.mulf %219, %217 : vector<8x128xf32>
    %221 = vector.extract_strided_slice %191 {offsets = [0, 0], sizes = [8, 128], strides = [1, 1]} : vector<8x256xf32> to vector<8x128xf32>
    %222 = arith.mulf %212, %221 : vector<8x128xf32>
    %223 = arith.addf %220, %222 : vector<8x128xf32>
    %224 = vector.extract_strided_slice %196 {offsets = [0, 0], sizes = [8, 128], strides = [1, 1]} : vector<8x384xf32> to vector<8x128xf32>
    %225 = vector.extract_strided_slice %194 {offsets = [0, 384], sizes = [8, 128], strides = [1, 1]} : vector<8x768xf32> to vector<8x128xf32>
    %226 = arith.addf %224, %225 : vector<8x128xf32>
    %227 = arith.negf %226 : vector<8x128xf32>
    %228 = math.exp %227 : vector<8x128xf32>
    %cst_59 = arith.constant 1.000000e+00 : f32
    %229 = vector.broadcast %cst_59 : f32 to vector<8x128xf32>
    %230 = arith.addf %229, %228 : vector<8x128xf32>
    %231 = arith.divf %229, %230 : vector<8x128xf32>
    %232 = vector.extract_strided_slice %196 {offsets = [0, 128], sizes = [8, 128], strides = [1, 1]} : vector<8x384xf32> to vector<8x128xf32>
    %233 = vector.extract_strided_slice %194 {offsets = [0, 512], sizes = [8, 128], strides = [1, 1]} : vector<8x768xf32> to vector<8x128xf32>
    %234 = arith.addf %232, %233 : vector<8x128xf32>
    %235 = arith.negf %234 : vector<8x128xf32>
    %236 = math.exp %235 : vector<8x128xf32>
    %cst_60 = arith.constant 1.000000e+00 : f32
    %237 = vector.broadcast %cst_60 : f32 to vector<8x128xf32>
    %238 = arith.addf %237, %236 : vector<8x128xf32>
    %239 = arith.divf %237, %238 : vector<8x128xf32>
    %240 = vector.extract_strided_slice %196 {offsets = [0, 256], sizes = [8, 128], strides = [1, 1]} : vector<8x384xf32> to vector<8x128xf32>
    %241 = vector.extract_strided_slice %194 {offsets = [0, 640], sizes = [8, 128], strides = [1, 1]} : vector<8x768xf32> to vector<8x128xf32>
    %242 = arith.mulf %231, %241 : vector<8x128xf32>
    %243 = arith.addf %240, %242 : vector<8x128xf32>
    %244 = math.tanh %243 : vector<8x128xf32>
    %cst_61 = arith.constant 1.000000e+00 : f32
    %245 = vector.broadcast %cst_61 : f32 to vector<8x128xf32>
    %246 = arith.subf %245, %239 : vector<8x128xf32>
    %247 = arith.mulf %246, %244 : vector<8x128xf32>
    %248 = vector.extract_strided_slice %191 {offsets = [0, 128], sizes = [8, 128], strides = [1, 1]} : vector<8x256xf32> to vector<8x128xf32>
    %249 = arith.mulf %239, %248 : vector<8x128xf32>
    %250 = arith.addf %247, %249 : vector<8x128xf32>
    %c24_62 = arith.constant 24 : index
    %c0_63 = arith.constant 0 : index
    %251 = vector.load %arg7[%c24_62, %c0_63] : memref<64x256xf32, #tpu.memory_space<vmem>>, vector<8x128xf32>
    tpu.vector_store %arg7[%c24_62, %c0_63], %223 {strides = array<i32>} : memref<64x256xf32, #tpu.memory_space<vmem>>, vector<8x128xf32>,
    %c32_64 = arith.constant 32 : index
    %c128_65 = arith.constant 128 : index
    %252 = vector.load %arg7[%c32_64, %c128_65] : memref<64x256xf32, #tpu.memory_space<vmem>>, vector<8x128xf32>
    tpu.vector_store %arg7[%c32_64, %c128_65], %250 {strides = array<i32>} : memref<64x256xf32, #tpu.memory_space<vmem>>, vector<8x128xf32>,
    %253 = tpu.concatenate %223, %250 in 1 : vector<8x128xf32>, vector<8x128xf32> -> vector<8x256xf32>
    %254 = arith.truncf %253 : vector<8x256xf32> to vector<8x256xbf16>
    %c0_66 = arith.constant 0 : index
    %c0_67 = arith.constant 0 : index
    %255 = vector.load %arg3[%c0_66, %c0_67] : memref<256x768xbf16, #tpu.memory_space<vmem>>, vector<256x768xbf16>
    %cst_68 = arith.constant dense<0.000000e+00> : vector<8x768xf32>
    %256 = tpu.matmul %254, %255, %cst_68 {dimension_numbers = #tpu.dot_dimension_numbers<[1], [0], [0], [1], [0, 0, 1, 1], [], []>} : vector<8x256xbf16>, vector<256x768xbf16>, vector<8x768xf32> -> vector<8x768xf32>
    %c32_69 = arith.constant 32 : index
    %c0_70 = arith.constant 0 : index
    %257 = vector.load %arg6[%c32_69, %c0_70] : memref<64x768xf32, #tpu.memory_space<vmem>>, vector<8x384xf32>
    %c24_71 = arith.constant 24 : index
    %c384_72 = arith.constant 384 : index
    %258 = vector.load %arg6[%c24_71, %c384_72] : memref<64x768xf32, #tpu.memory_space<vmem>>, vector<8x384xf32>
    %259 = vector.extract_strided_slice %257 {offsets = [0, 0], sizes = [8, 128], strides = [1, 1]} : vector<8x384xf32> to vector<8x128xf32>
    %260 = vector.extract_strided_slice %256 {offsets = [0, 0], sizes = [8, 128], strides = [1, 1]} : vector<8x768xf32> to vector<8x128xf32>
    %261 = arith.addf %259, %260 : vector<8x128xf32>
    %262 = arith.negf %261 : vector<8x128xf32>
    %263 = math.exp %262 : vector<8x128xf32>
    %cst_73 = arith.constant 1.000000e+00 : f32
    %264 = vector.broadcast %cst_73 : f32 to vector<8x128xf32>
    %265 = arith.addf %264, %263 : vector<8x128xf32>
    %266 = arith.divf %264, %265 : vector<8x128xf32>
    %267 = vector.extract_strided_slice %257 {offsets = [0, 128], sizes = [8, 128], strides = [1, 1]} : vector<8x384xf32> to vector<8x128xf32>
    %268 = vector.extract_strided_slice %256 {offsets = [0, 128], sizes = [8, 128], strides = [1, 1]} : vector<8x768xf32> to vector<8x128xf32>
    %269 = arith.addf %267, %268 : vector<8x128xf32>
    %270 = arith.negf %269 : vector<8x128xf32>
    %271 = math.exp %270 : vector<8x128xf32>
    %cst_74 = arith.constant 1.000000e+00 : f32
    %272 = vector.broadcast %cst_74 : f32 to vector<8x128xf32>
    %273 = arith.addf %272, %271 : vector<8x128xf32>
    %274 = arith.divf %272, %273 : vector<8x128xf32>
    %275 = vector.extract_strided_slice %257 {offsets = [0, 256], sizes = [8, 128], strides = [1, 1]} : vector<8x384xf32> to vector<8x128xf32>
    %276 = vector.extract_strided_slice %256 {offsets = [0, 256], sizes = [8, 128], strides = [1, 1]} : vector<8x768xf32> to vector<8x128xf32>
    %277 = arith.mulf %266, %276 : vector<8x128xf32>
    %278 = arith.addf %275, %277 : vector<8x128xf32>
    %279 = math.tanh %278 : vector<8x128xf32>
    %cst_75 = arith.constant 1.000000e+00 : f32
    %280 = vector.broadcast %cst_75 : f32 to vector<8x128xf32>
    %281 = arith.subf %280, %274 : vector<8x128xf32>
    %282 = arith.mulf %281, %279 : vector<8x128xf32>
    %283 = vector.extract_strided_slice %253 {offsets = [0, 0], sizes = [8, 128], strides = [1, 1]} : vector<8x256xf32> to vector<8x128xf32>
    %284 = arith.mulf %274, %283 : vector<8x128xf32>
    %285 = arith.addf %282, %284 : vector<8x128xf32>
    %286 = vector.extract_strided_slice %258 {offsets = [0, 0], sizes = [8, 128], strides = [1, 1]} : vector<8x384xf32> to vector<8x128xf32>
    %287 = vector.extract_strided_slice %256 {offsets = [0, 384], sizes = [8, 128], strides = [1, 1]} : vector<8x768xf32> to vector<8x128xf32>
    %288 = arith.addf %286, %287 : vector<8x128xf32>
    %289 = arith.negf %288 : vector<8x128xf32>
    %290 = math.exp %289 : vector<8x128xf32>
    %cst_76 = arith.constant 1.000000e+00 : f32
    %291 = vector.broadcast %cst_76 : f32 to vector<8x128xf32>
    %292 = arith.addf %291, %290 : vector<8x128xf32>
    %293 = arith.divf %291, %292 : vector<8x128xf32>
    %294 = vector.extract_strided_slice %258 {offsets = [0, 128], sizes = [8, 128], strides = [1, 1]} : vector<8x384xf32> to vector<8x128xf32>
    %295 = vector.extract_strided_slice %256 {offsets = [0, 512], sizes = [8, 128], strides = [1, 1]} : vector<8x768xf32> to vector<8x128xf32>
    %296 = arith.addf %294, %295 : vector<8x128xf32>
    %297 = arith.negf %296 : vector<8x128xf32>
    %298 = math.exp %297 : vector<8x128xf32>
    %cst_77 = arith.constant 1.000000e+00 : f32
    %299 = vector.broadcast %cst_77 : f32 to vector<8x128xf32>
    %300 = arith.addf %299, %298 : vector<8x128xf32>
    %301 = arith.divf %299, %300 : vector<8x128xf32>
    %302 = vector.extract_strided_slice %258 {offsets = [0, 256], sizes = [8, 128], strides = [1, 1]} : vector<8x384xf32> to vector<8x128xf32>
    %303 = vector.extract_strided_slice %256 {offsets = [0, 640], sizes = [8, 128], strides = [1, 1]} : vector<8x768xf32> to vector<8x128xf32>
    %304 = arith.mulf %293, %303 : vector<8x128xf32>
    %305 = arith.addf %302, %304 : vector<8x128xf32>
    %306 = math.tanh %305 : vector<8x128xf32>
    %cst_78 = arith.constant 1.000000e+00 : f32
    %307 = vector.broadcast %cst_78 : f32 to vector<8x128xf32>
    %308 = arith.subf %307, %301 : vector<8x128xf32>
    %309 = arith.mulf %308, %306 : vector<8x128xf32>
    %310 = vector.extract_strided_slice %253 {offsets = [0, 128], sizes = [8, 128], strides = [1, 1]} : vector<8x256xf32> to vector<8x128xf32>
    %311 = arith.mulf %301, %310 : vector<8x128xf32>
    %312 = arith.addf %309, %311 : vector<8x128xf32>
    %c32_79 = arith.constant 32 : index
    %c0_80 = arith.constant 0 : index
    %313 = vector.load %arg7[%c32_79, %c0_80] : memref<64x256xf32, #tpu.memory_space<vmem>>, vector<8x128xf32>
    tpu.vector_store %arg7[%c32_79, %c0_80], %285 {strides = array<i32>} : memref<64x256xf32, #tpu.memory_space<vmem>>, vector<8x128xf32>,
    %c24_81 = arith.constant 24 : index
    %c128_82 = arith.constant 128 : index
    %314 = vector.load %arg7[%c24_81, %c128_82] : memref<64x256xf32, #tpu.memory_space<vmem>>, vector<8x128xf32>
    tpu.vector_store %arg7[%c24_81, %c128_82], %312 {strides = array<i32>} : memref<64x256xf32, #tpu.memory_space<vmem>>, vector<8x128xf32>,
    %315 = tpu.concatenate %285, %312 in 1 : vector<8x128xf32>, vector<8x128xf32> -> vector<8x256xf32>
    %316 = arith.truncf %315 : vector<8x256xf32> to vector<8x256xbf16>
    %c0_83 = arith.constant 0 : index
    %c0_84 = arith.constant 0 : index
    %317 = vector.load %arg3[%c0_83, %c0_84] : memref<256x768xbf16, #tpu.memory_space<vmem>>, vector<256x768xbf16>
    %cst_85 = arith.constant dense<0.000000e+00> : vector<8x768xf32>
    %318 = tpu.matmul %316, %317, %cst_85 {dimension_numbers = #tpu.dot_dimension_numbers<[1], [0], [0], [1], [0, 0, 1, 1], [], []>} : vector<8x256xbf16>, vector<256x768xbf16>, vector<8x768xf32> -> vector<8x768xf32>
    %c40_86 = arith.constant 40 : index
    %c0_87 = arith.constant 0 : index
    %319 = vector.load %arg6[%c40_86, %c0_87] : memref<64x768xf32, #tpu.memory_space<vmem>>, vector<8x384xf32>
    %c16_88 = arith.constant 16 : index
    %c384_89 = arith.constant 384 : index
    %320 = vector.load %arg6[%c16_88, %c384_89] : memref<64x768xf32, #tpu.memory_space<vmem>>, vector<8x384xf32>
    %321 = vector.extract_strided_slice %319 {offsets = [0, 0], sizes = [8, 128], strides = [1, 1]} : vector<8x384xf32> to vector<8x128xf32>
    %322 = vector.extract_strided_slice %318 {offsets = [0, 0], sizes = [8, 128], strides = [1, 1]} : vector<8x768xf32> to vector<8x128xf32>
    %323 = arith.addf %321, %322 : vector<8x128xf32>
    %324 = arith.negf %323 : vector<8x128xf32>
    %325 = math.exp %324 : vector<8x128xf32>
    %cst_90 = arith.constant 1.000000e+00 : f32
    %326 = vector.broadcast %cst_90 : f32 to vector<8x128xf32>
    %327 = arith.addf %326, %325 : vector<8x128xf32>
    %328 = arith.divf %326, %327 : vector<8x128xf32>
    %329 = vector.extract_strided_slice %319 {offsets = [0, 128], sizes = [8, 128], strides = [1, 1]} : vector<8x384xf32> to vector<8x128xf32>
    %330 = vector.extract_strided_slice %318 {offsets = [0, 128], sizes = [8, 128], strides = [1, 1]} : vector<8x768xf32> to vector<8x128xf32>
    %331 = arith.addf %329, %330 : vector<8x128xf32>
    %332 = arith.negf %331 : vector<8x128xf32>
    %333 = math.exp %332 : vector<8x128xf32>
    %cst_91 = arith.constant 1.000000e+00 : f32
    %334 = vector.broadcast %cst_91 : f32 to vector<8x128xf32>
    %335 = arith.addf %334, %333 : vector<8x128xf32>
    %336 = arith.divf %334, %335 : vector<8x128xf32>
    %337 = vector.extract_strided_slice %319 {offsets = [0, 256], sizes = [8, 128], strides = [1, 1]} : vector<8x384xf32> to vector<8x128xf32>
    %338 = vector.extract_strided_slice %318 {offsets = [0, 256], sizes = [8, 128], strides = [1, 1]} : vector<8x768xf32> to vector<8x128xf32>
    %339 = arith.mulf %328, %338 : vector<8x128xf32>
    %340 = arith.addf %337, %339 : vector<8x128xf32>
    %341 = math.tanh %340 : vector<8x128xf32>
    %cst_92 = arith.constant 1.000000e+00 : f32
    %342 = vector.broadcast %cst_92 : f32 to vector<8x128xf32>
    %343 = arith.subf %342, %336 : vector<8x128xf32>
    %344 = arith.mulf %343, %341 : vector<8x128xf32>
    %345 = vector.extract_strided_slice %315 {offsets = [0, 0], sizes = [8, 128], strides = [1, 1]} : vector<8x256xf32> to vector<8x128xf32>
    %346 = arith.mulf %336, %345 : vector<8x128xf32>
    %347 = arith.addf %344, %346 : vector<8x128xf32>
    %348 = vector.extract_strided_slice %320 {offsets = [0, 0], sizes = [8, 128], strides = [1, 1]} : vector<8x384xf32> to vector<8x128xf32>
    %349 = vector.extract_strided_slice %318 {offsets = [0, 384], sizes = [8, 128], strides = [1, 1]} : vector<8x768xf32> to vector<8x128xf32>
    %350 = arith.addf %348, %349 : vector<8x128xf32>
    %351 = arith.negf %350 : vector<8x128xf32>
    %352 = math.exp %351 : vector<8x128xf32>
    %cst_93 = arith.constant 1.000000e+00 : f32
    %353 = vector.broadcast %cst_93 : f32 to vector<8x128xf32>
    %354 = arith.addf %353, %352 : vector<8x128xf32>
    %355 = arith.divf %353, %354 : vector<8x128xf32>
    %356 = vector.extract_strided_slice %320 {offsets = [0, 128], sizes = [8, 128], strides = [1, 1]} : vector<8x384xf32> to vector<8x128xf32>
    %357 = vector.extract_strided_slice %318 {offsets = [0, 512], sizes = [8, 128], strides = [1, 1]} : vector<8x768xf32> to vector<8x128xf32>
    %358 = arith.addf %356, %357 : vector<8x128xf32>
    %359 = arith.negf %358 : vector<8x128xf32>
    %360 = math.exp %359 : vector<8x128xf32>
    %cst_94 = arith.constant 1.000000e+00 : f32
    %361 = vector.broadcast %cst_94 : f32 to vector<8x128xf32>
    %362 = arith.addf %361, %360 : vector<8x128xf32>
    %363 = arith.divf %361, %362 : vector<8x128xf32>
    %364 = vector.extract_strided_slice %320 {offsets = [0, 256], sizes = [8, 128], strides = [1, 1]} : vector<8x384xf32> to vector<8x128xf32>
    %365 = vector.extract_strided_slice %318 {offsets = [0, 640], sizes = [8, 128], strides = [1, 1]} : vector<8x768xf32> to vector<8x128xf32>
    %366 = arith.mulf %355, %365 : vector<8x128xf32>
    %367 = arith.addf %364, %366 : vector<8x128xf32>
    %368 = math.tanh %367 : vector<8x128xf32>
    %cst_95 = arith.constant 1.000000e+00 : f32
    %369 = vector.broadcast %cst_95 : f32 to vector<8x128xf32>
    %370 = arith.subf %369, %363 : vector<8x128xf32>
    %371 = arith.mulf %370, %368 : vector<8x128xf32>
    %372 = vector.extract_strided_slice %315 {offsets = [0, 128], sizes = [8, 128], strides = [1, 1]} : vector<8x256xf32> to vector<8x128xf32>
    %373 = arith.mulf %363, %372 : vector<8x128xf32>
    %374 = arith.addf %371, %373 : vector<8x128xf32>
    %c40_96 = arith.constant 40 : index
    %c0_97 = arith.constant 0 : index
    %375 = vector.load %arg7[%c40_96, %c0_97] : memref<64x256xf32, #tpu.memory_space<vmem>>, vector<8x128xf32>
    tpu.vector_store %arg7[%c40_96, %c0_97], %347 {strides = array<i32>} : memref<64x256xf32, #tpu.memory_space<vmem>>, vector<8x128xf32>,
    %c16_98 = arith.constant 16 : index
    %c128_99 = arith.constant 128 : index
    %376 = vector.load %arg7[%c16_98, %c128_99] : memref<64x256xf32, #tpu.memory_space<vmem>>, vector<8x128xf32>
    tpu.vector_store %arg7[%c16_98, %c128_99], %374 {strides = array<i32>} : memref<64x256xf32, #tpu.memory_space<vmem>>, vector<8x128xf32>,
    %377 = tpu.concatenate %347, %374 in 1 : vector<8x128xf32>, vector<8x128xf32> -> vector<8x256xf32>
    %378 = arith.truncf %377 : vector<8x256xf32> to vector<8x256xbf16>
    %c0_100 = arith.constant 0 : index
    %c0_101 = arith.constant 0 : index
    %379 = vector.load %arg3[%c0_100, %c0_101] : memref<256x768xbf16, #tpu.memory_space<vmem>>, vector<256x768xbf16>
    %cst_102 = arith.constant dense<0.000000e+00> : vector<8x768xf32>
    %380 = tpu.matmul %378, %379, %cst_102 {dimension_numbers = #tpu.dot_dimension_numbers<[1], [0], [0], [1], [0, 0, 1, 1], [], []>} : vector<8x256xbf16>, vector<256x768xbf16>, vector<8x768xf32> -> vector<8x768xf32>
    %c48_103 = arith.constant 48 : index
    %c0_104 = arith.constant 0 : index
    %381 = vector.load %arg6[%c48_103, %c0_104] : memref<64x768xf32, #tpu.memory_space<vmem>>, vector<8x384xf32>
    %c8_105 = arith.constant 8 : index
    %c384_106 = arith.constant 384 : index
    %382 = vector.load %arg6[%c8_105, %c384_106] : memref<64x768xf32, #tpu.memory_space<vmem>>, vector<8x384xf32>
    %383 = vector.extract_strided_slice %381 {offsets = [0, 0], sizes = [8, 128], strides = [1, 1]} : vector<8x384xf32> to vector<8x128xf32>
    %384 = vector.extract_strided_slice %380 {offsets = [0, 0], sizes = [8, 128], strides = [1, 1]} : vector<8x768xf32> to vector<8x128xf32>
    %385 = arith.addf %383, %384 : vector<8x128xf32>
    %386 = arith.negf %385 : vector<8x128xf32>
    %387 = math.exp %386 : vector<8x128xf32>
    %cst_107 = arith.constant 1.000000e+00 : f32
    %388 = vector.broadcast %cst_107 : f32 to vector<8x128xf32>
    %389 = arith.addf %388, %387 : vector<8x128xf32>
    %390 = arith.divf %388, %389 : vector<8x128xf32>
    %391 = vector.extract_strided_slice %381 {offsets = [0, 128], sizes = [8, 128], strides = [1, 1]} : vector<8x384xf32> to vector<8x128xf32>
    %392 = vector.extract_strided_slice %380 {offsets = [0, 128], sizes = [8, 128], strides = [1, 1]} : vector<8x768xf32> to vector<8x128xf32>
    %393 = arith.addf %391, %392 : vector<8x128xf32>
    %394 = arith.negf %393 : vector<8x128xf32>
    %395 = math.exp %394 : vector<8x128xf32>
    %cst_108 = arith.constant 1.000000e+00 : f32
    %396 = vector.broadcast %cst_108 : f32 to vector<8x128xf32>
    %397 = arith.addf %396, %395 : vector<8x128xf32>
    %398 = arith.divf %396, %397 : vector<8x128xf32>
    %399 = vector.extract_strided_slice %381 {offsets = [0, 256], sizes = [8, 128], strides = [1, 1]} : vector<8x384xf32> to vector<8x128xf32>
    %400 = vector.extract_strided_slice %380 {offsets = [0, 256], sizes = [8, 128], strides = [1, 1]} : vector<8x768xf32> to vector<8x128xf32>
    %401 = arith.mulf %390, %400 : vector<8x128xf32>
    %402 = arith.addf %399, %401 : vector<8x128xf32>
    %403 = math.tanh %402 : vector<8x128xf32>
    %cst_109 = arith.constant 1.000000e+00 : f32
    %404 = vector.broadcast %cst_109 : f32 to vector<8x128xf32>
    %405 = arith.subf %404, %398 : vector<8x128xf32>
    %406 = arith.mulf %405, %403 : vector<8x128xf32>
    %407 = vector.extract_strided_slice %377 {offsets = [0, 0], sizes = [8, 128], strides = [1, 1]} : vector<8x256xf32> to vector<8x128xf32>
    %408 = arith.mulf %398, %407 : vector<8x128xf32>
    %409 = arith.addf %406, %408 : vector<8x128xf32>
    %410 = vector.extract_strided_slice %382 {offsets = [0, 0], sizes = [8, 128], strides = [1, 1]} : vector<8x384xf32> to vector<8x128xf32>
    %411 = vector.extract_strided_slice %380 {offsets = [0, 384], sizes = [8, 128], strides = [1, 1]} : vector<8x768xf32> to vector<8x128xf32>
    %412 = arith.addf %410, %411 : vector<8x128xf32>
    %413 = arith.negf %412 : vector<8x128xf32>
    %414 = math.exp %413 : vector<8x128xf32>
    %cst_110 = arith.constant 1.000000e+00 : f32
    %415 = vector.broadcast %cst_110 : f32 to vector<8x128xf32>
    %416 = arith.addf %415, %414 : vector<8x128xf32>
    %417 = arith.divf %415, %416 : vector<8x128xf32>
    %418 = vector.extract_strided_slice %382 {offsets = [0, 128], sizes = [8, 128], strides = [1, 1]} : vector<8x384xf32> to vector<8x128xf32>
    %419 = vector.extract_strided_slice %380 {offsets = [0, 512], sizes = [8, 128], strides = [1, 1]} : vector<8x768xf32> to vector<8x128xf32>
    %420 = arith.addf %418, %419 : vector<8x128xf32>
    %421 = arith.negf %420 : vector<8x128xf32>
    %422 = math.exp %421 : vector<8x128xf32>
    %cst_111 = arith.constant 1.000000e+00 : f32
    %423 = vector.broadcast %cst_111 : f32 to vector<8x128xf32>
    %424 = arith.addf %423, %422 : vector<8x128xf32>
    %425 = arith.divf %423, %424 : vector<8x128xf32>
    %426 = vector.extract_strided_slice %382 {offsets = [0, 256], sizes = [8, 128], strides = [1, 1]} : vector<8x384xf32> to vector<8x128xf32>
    %427 = vector.extract_strided_slice %380 {offsets = [0, 640], sizes = [8, 128], strides = [1, 1]} : vector<8x768xf32> to vector<8x128xf32>
    %428 = arith.mulf %417, %427 : vector<8x128xf32>
    %429 = arith.addf %426, %428 : vector<8x128xf32>
    %430 = math.tanh %429 : vector<8x128xf32>
    %cst_112 = arith.constant 1.000000e+00 : f32
    %431 = vector.broadcast %cst_112 : f32 to vector<8x128xf32>
    %432 = arith.subf %431, %425 : vector<8x128xf32>
    %433 = arith.mulf %432, %430 : vector<8x128xf32>
    %434 = vector.extract_strided_slice %377 {offsets = [0, 128], sizes = [8, 128], strides = [1, 1]} : vector<8x256xf32> to vector<8x128xf32>
    %435 = arith.mulf %425, %434 : vector<8x128xf32>
    %436 = arith.addf %433, %435 : vector<8x128xf32>
    %c48_113 = arith.constant 48 : index
    %c0_114 = arith.constant 0 : index
    %437 = vector.load %arg7[%c48_113, %c0_114] : memref<64x256xf32, #tpu.memory_space<vmem>>, vector<8x128xf32>
    tpu.vector_store %arg7[%c48_113, %c0_114], %409 {strides = array<i32>} : memref<64x256xf32, #tpu.memory_space<vmem>>, vector<8x128xf32>,
    %c8_115 = arith.constant 8 : index
    %c128_116 = arith.constant 128 : index
    %438 = vector.load %arg7[%c8_115, %c128_116] : memref<64x256xf32, #tpu.memory_space<vmem>>, vector<8x128xf32>
    tpu.vector_store %arg7[%c8_115, %c128_116], %436 {strides = array<i32>} : memref<64x256xf32, #tpu.memory_space<vmem>>, vector<8x128xf32>,
    %439 = tpu.concatenate %409, %436 in 1 : vector<8x128xf32>, vector<8x128xf32> -> vector<8x256xf32>
    %440 = arith.truncf %439 : vector<8x256xf32> to vector<8x256xbf16>
    %c0_117 = arith.constant 0 : index
    %c0_118 = arith.constant 0 : index
    %441 = vector.load %arg3[%c0_117, %c0_118] : memref<256x768xbf16, #tpu.memory_space<vmem>>, vector<256x768xbf16>
    %cst_119 = arith.constant dense<0.000000e+00> : vector<8x768xf32>
    %442 = tpu.matmul %440, %441, %cst_119 {dimension_numbers = #tpu.dot_dimension_numbers<[1], [0], [0], [1], [0, 0, 1, 1], [], []>} : vector<8x256xbf16>, vector<256x768xbf16>, vector<8x768xf32> -> vector<8x768xf32>
    %c56_120 = arith.constant 56 : index
    %c0_121 = arith.constant 0 : index
    %443 = vector.load %arg6[%c56_120, %c0_121] : memref<64x768xf32, #tpu.memory_space<vmem>>, vector<8x384xf32>
    %c0_122 = arith.constant 0 : index
    %c384_123 = arith.constant 384 : index
    %444 = vector.load %arg6[%c0_122, %c384_123] : memref<64x768xf32, #tpu.memory_space<vmem>>, vector<8x384xf32>
    %445 = vector.extract_strided_slice %443 {offsets = [0, 0], sizes = [8, 128], strides = [1, 1]} : vector<8x384xf32> to vector<8x128xf32>
    %446 = vector.extract_strided_slice %442 {offsets = [0, 0], sizes = [8, 128], strides = [1, 1]} : vector<8x768xf32> to vector<8x128xf32>
    %447 = arith.addf %445, %446 : vector<8x128xf32>
    %448 = arith.negf %447 : vector<8x128xf32>
    %449 = math.exp %448 : vector<8x128xf32>
    %cst_124 = arith.constant 1.000000e+00 : f32
    %450 = vector.broadcast %cst_124 : f32 to vector<8x128xf32>
    %451 = arith.addf %450, %449 : vector<8x128xf32>
    %452 = arith.divf %450, %451 : vector<8x128xf32>
    %453 = vector.extract_strided_slice %443 {offsets = [0, 128], sizes = [8, 128], strides = [1, 1]} : vector<8x384xf32> to vector<8x128xf32>
    %454 = vector.extract_strided_slice %442 {offsets = [0, 128], sizes = [8, 128], strides = [1, 1]} : vector<8x768xf32> to vector<8x128xf32>
    %455 = arith.addf %453, %454 : vector<8x128xf32>
    %456 = arith.negf %455 : vector<8x128xf32>
    %457 = math.exp %456 : vector<8x128xf32>
    %cst_125 = arith.constant 1.000000e+00 : f32
    %458 = vector.broadcast %cst_125 : f32 to vector<8x128xf32>
    %459 = arith.addf %458, %457 : vector<8x128xf32>
    %460 = arith.divf %458, %459 : vector<8x128xf32>
    %461 = vector.extract_strided_slice %443 {offsets = [0, 256], sizes = [8, 128], strides = [1, 1]} : vector<8x384xf32> to vector<8x128xf32>
    %462 = vector.extract_strided_slice %442 {offsets = [0, 256], sizes = [8, 128], strides = [1, 1]} : vector<8x768xf32> to vector<8x128xf32>
    %463 = arith.mulf %452, %462 : vector<8x128xf32>
    %464 = arith.addf %461, %463 : vector<8x128xf32>
    %465 = math.tanh %464 : vector<8x128xf32>
    %cst_126 = arith.constant 1.000000e+00 : f32
    %466 = vector.broadcast %cst_126 : f32 to vector<8x128xf32>
    %467 = arith.subf %466, %460 : vector<8x128xf32>
    %468 = arith.mulf %467, %465 : vector<8x128xf32>
    %469 = vector.extract_strided_slice %439 {offsets = [0, 0], sizes = [8, 128], strides = [1, 1]} : vector<8x256xf32> to vector<8x128xf32>
    %470 = arith.mulf %460, %469 : vector<8x128xf32>
    %471 = arith.addf %468, %470 : vector<8x128xf32>
    %472 = vector.extract_strided_slice %444 {offsets = [0, 0], sizes = [8, 128], strides = [1, 1]} : vector<8x384xf32> to vector<8x128xf32>
    %473 = vector.extract_strided_slice %442 {offsets = [0, 384], sizes = [8, 128], strides = [1, 1]} : vector<8x768xf32> to vector<8x128xf32>
    %474 = arith.addf %472, %473 : vector<8x128xf32>
    %475 = arith.negf %474 : vector<8x128xf32>
    %476 = math.exp %475 : vector<8x128xf32>
    %cst_127 = arith.constant 1.000000e+00 : f32
    %477 = vector.broadcast %cst_127 : f32 to vector<8x128xf32>
    %478 = arith.addf %477, %476 : vector<8x128xf32>
    %479 = arith.divf %477, %478 : vector<8x128xf32>
    %480 = vector.extract_strided_slice %444 {offsets = [0, 128], sizes = [8, 128], strides = [1, 1]} : vector<8x384xf32> to vector<8x128xf32>
    %481 = vector.extract_strided_slice %442 {offsets = [0, 512], sizes = [8, 128], strides = [1, 1]} : vector<8x768xf32> to vector<8x128xf32>
    %482 = arith.addf %480, %481 : vector<8x128xf32>
    %483 = arith.negf %482 : vector<8x128xf32>
    %484 = math.exp %483 : vector<8x128xf32>
    %cst_128 = arith.constant 1.000000e+00 : f32
    %485 = vector.broadcast %cst_128 : f32 to vector<8x128xf32>
    %486 = arith.addf %485, %484 : vector<8x128xf32>
    %487 = arith.divf %485, %486 : vector<8x128xf32>
    %488 = vector.extract_strided_slice %444 {offsets = [0, 256], sizes = [8, 128], strides = [1, 1]} : vector<8x384xf32> to vector<8x128xf32>
    %489 = vector.extract_strided_slice %442 {offsets = [0, 640], sizes = [8, 128], strides = [1, 1]} : vector<8x768xf32> to vector<8x128xf32>
    %490 = arith.mulf %479, %489 : vector<8x128xf32>
    %491 = arith.addf %488, %490 : vector<8x128xf32>
    %492 = math.tanh %491 : vector<8x128xf32>
    %cst_129 = arith.constant 1.000000e+00 : f32
    %493 = vector.broadcast %cst_129 : f32 to vector<8x128xf32>
    %494 = arith.subf %493, %487 : vector<8x128xf32>
    %495 = arith.mulf %494, %492 : vector<8x128xf32>
    %496 = vector.extract_strided_slice %439 {offsets = [0, 128], sizes = [8, 128], strides = [1, 1]} : vector<8x256xf32> to vector<8x128xf32>
    %497 = arith.mulf %487, %496 : vector<8x128xf32>
    %498 = arith.addf %495, %497 : vector<8x128xf32>
    %c56_130 = arith.constant 56 : index
    %c0_131 = arith.constant 0 : index
    %499 = vector.load %arg7[%c56_130, %c0_131] : memref<64x256xf32, #tpu.memory_space<vmem>>, vector<8x128xf32>
    tpu.vector_store %arg7[%c56_130, %c0_131], %471 {strides = array<i32>} : memref<64x256xf32, #tpu.memory_space<vmem>>, vector<8x128xf32>,
    %c0_132 = arith.constant 0 : index
    %c128_133 = arith.constant 128 : index
    %500 = vector.load %arg7[%c0_132, %c128_133] : memref<64x256xf32, #tpu.memory_space<vmem>>, vector<8x128xf32>
    tpu.vector_store %arg7[%c0_132, %c128_133], %498 {strides = array<i32>} : memref<64x256xf32, #tpu.memory_space<vmem>>, vector<8x128xf32>,
    %c0_134 = arith.constant 0 : index
    %c0_135 = arith.constant 0 : index
    %501 = vector.load %arg7[%c0_134, %c0_135] : memref<64x256xf32, #tpu.memory_space<vmem>>, vector<64x256xf32>
    %502 = arith.truncf %501 : vector<64x256xf32> to vector<64x256xbf16>
    %c0_136 = arith.constant 0 : index
    %c0_137 = arith.constant 0 : index
    %503 = vector.load %arg4[%c0_136, %c0_137] : memref<256x128xbf16, #tpu.memory_space<vmem>>, vector<256x128xbf16>
    %cst_138 = arith.constant dense<0.000000e+00> : vector<64x128xf32>
    %504 = tpu.matmul %502, %503, %cst_138 {dimension_numbers = #tpu.dot_dimension_numbers<[1], [0], [0], [1], [0, 0, 1, 1], [], []>} : vector<64x256xbf16>, vector<256x128xbf16>, vector<64x128xf32> -> vector<64x128xf32>
    %c0_139 = arith.constant 0 : index
    %c0_140 = arith.constant 0 : index
    %c0_141 = arith.constant 0 : index
    %505 = vector.load %arg5[%c0_139, %c0_140, %c0_141] : memref<1x64x128xf32, #tpu.memory_space<vmem>>, vector<1x64x128xf32>
    %506 = vector.shape_cast %505 : vector<1x64x128xf32> to vector<64x128xf32>
    %507 = vector.shape_cast %504 : vector<64x128xf32> to vector<1x64x128xf32>
    tpu.vector_store %arg5[%c0_139, %c0_140, %c0_141], %507 {strides = array<i32>} : memref<1x64x128xf32, #tpu.memory_space<vmem>>, vector<1x64x128xf32>,
    return
  }
  func.func @transform_0(%arg0: i32) -> (i32, i32, i32) {
    %c0_i32 = arith.constant 0 : i32
    %c0_i32_0 = arith.constant 0 : i32
    %c0_i32_1 = arith.constant 0 : i32
    return %arg0, %c0_i32, %c0_i32_0 : i32, i32, i32
  }
  func.func @transform_1(%arg0: i32) -> (i32, i32) {
    %c0_i32 = arith.constant 0 : i32
    %c0_i32_0 = arith.constant 0 : i32
    %c0_i32_1 = arith.constant 0 : i32
    return %c0_i32, %c0_i32_0 : i32, i32
  }
  func.func @transform_2(%arg0: i32) -> (i32, i32) {
    %c0_i32 = arith.constant 0 : i32
    %c0_i32_0 = arith.constant 0 : i32
    %c0_i32_1 = arith.constant 0 : i32
    return %c0_i32, %c0_i32_0 : i32, i32
  }
  func.func @transform_3(%arg0: i32) -> (i32, i32) {
    %c0_i32 = arith.constant 0 : i32
    %c0_i32_0 = arith.constant 0 : i32
    %c0_i32_1 = arith.constant 0 : i32
    return %c0_i32, %c0_i32_0 : i32, i32
  }
  func.func @transform_4(%arg0: i32) -> (i32, i32, i32) {
    %c0_i32 = arith.constant 0 : i32
    %c0_i32_0 = arith.constant 0 : i32
    %c0_i32_1 = arith.constant 0 : i32
    return %arg0, %c0_i32, %c0_i32_0 : i32, i32, i32
  }
}

</mosaic_0001>

<bundles_post_ra>
// kernel: rnn_forward.1
= control target key start
LH: loop header
LB: loop body
LE: loop exit
PB: predicated region body
PF: predicated region fallthrough
CT: control target
= control target key end

     0   :  { %v9562_v1 = vmov 0   ;;  %vm785_vm0 = vcmask 1045504   ;;  %vm772_vm1 = vcmask 359424   ;;  %s13066_s1 = inlined_call_operand.vmem [shape: bf16[300,768], index: 1, kind: input, shape index: {}]   ;;  %s13067_s0 = inlined_call_operand.vmem [shape: bf16[1,64,300], index: 0, kind: input, shape index: {}]   ;;  %s13068_s2 = inlined_call_operand.vmem [shape: bf16[256,768], index: 2, kind: input, shape index: {}]   ;;  %s13069_s3 = inlined_call_operand.vmem [shape: bf16[256,128], index: 3, kind: input, shape index: {}]   ;;  %s13070_s4 = inlined_call_operand.vmem [shape: f32[1,64,128], index: 4, kind: output, shape index: {}]  }
   0x1   :  { %v8571_v0 = vld [vmem:[%s13066_s1 + $0x4] ss:$24 sps:$4 sm:$0xff]   ;;  %909 = vmatprep.mubr.bf16.mxu1 %v9562_v1  ;;  %v8575_v3 = vld [vmem:[%s13066_s1] ss:$24 sps:$4 sm:$0xff]   ;;  %v8577_v5 = vld [vmem:[%s13066_s1 + $0x34] ss:$24 sps:$4 sm:$0xff]  }
   0x2   :  { %v8573_v2 = vld [vmem:[%s13066_s1 + $0x304] ss:$24 sps:$4 sm:$0xff]   ;;  %804 = vmatprep.subr.bf16.mxu0 %v8571_v0  ;;  %v8576_v4 = vld [vmem:[%s13066_s1 + $0x300] ss:$24 sps:$4 sm:$0xff]   ;;  %v8579_v6 = vld [vmem:[%s13066_s1 + $0x334] ss:$24 sps:$4 sm:$0xff]  }
   0x3   :  { %877 = vmatprep.subr.bf16.mxu1 %v8573_v2  ;;  %805 = vmatpush1.bf16.msra.mxu0 %v8575_v3  ;;  %v8581_v7 = vld [vmem:[%s13066_s1 + $0x30] ss:$24 sps:$4 sm:$0xff]   ;;  %v8583_v9 = vld [vmem:[%s13066_s1 + $0x64] ss:$24 sps:$4 sm:$0xff]   ;;  %v8587_v11 = vld [vmem:[%s13066_s1 + $0x60] ss:$24 sps:$4 sm:$0xff]  }
   0x4   :  { %878 = vmatpush1.bf16.msra.mxu1 %v8576_v4  ;;  %806 = vmatprep.subr.bf16.mxu0 %v8577_v5  ;;  %v8582_v8 = vld [vmem:[%s13066_s1 + $0x330] ss:$24 sps:$4 sm:$0xff]   ;;  %v8585_v10 = vld [vmem:[%s13066_s1 + $0x364] ss:$24 sps:$4 sm:$0x3f]  }
   0x5   :  { %879 = vmatprep.subr.bf16.mxu1 %v8579_v6  ;;  %v8588_v12 = vld [vmem:[%s13066_s1 + $0x360] ss:$24 sps:$4 sm:$0x3f]   ;;  %v8589_v13 = vld [vmem:[%s13066_s1 + $0x94] ss:$24 sps:$4 sm:$0xff]  }
   0x6   :  { %v787_v14 = vsel %vm785_vm0, %v8588_v12, 0  ;;  %v9633_v15 = vld [vmem:[%s13067_s0 + $0x8] ss:$12 sps:$4 sm:$0xff]   ;;  %v8594_v17 = vld [vmem:[%s13066_s1 + $0xc] ss:$24 sps:$4 sm:$0xff]  }
   0x7   :  { %807 = vmatpush1.bf16.msra.mxu0 %v8581_v7  ;;  %v8592_v16 = vld [vmem:[%s13066_s1 + $0x8] ss:$24 sps:$4 sm:$0xff]   ;;  %v8596_v19 = vld [vmem:[%s13066_s1 + $0xc4] ss:$24 sps:$4 sm:$0xff]   ;;  %v8598_v21 = vld [vmem:[%s13066_s1 + $0x38] ss:$24 sps:$4 sm:$0xff]  }
   0x8   :  { %880 = vmatpush1.bf16.msra.mxu1 %v8582_v8  ;;  %808 = vmatprep.subr.bf16.mxu0 %v8583_v9  ;;  %v8595_v18 = vld [vmem:[%s13066_s1 + $0x90] ss:$24 sps:$4 sm:$0xff]   ;;  %v8600_v20 = vld [vmem:[%s13066_s1 + $0x3c] ss:$24 sps:$4 sm:$0xff]   ;;  %v8601_v22 = vld [vmem:[%s13066_s1 + $0xc0] ss:$24 sps:$4 sm:$0xff]  }
   0x9   :  { %7651 = vmatprep.subr.msk.bf16.mxu1 %vm785_vm0, %v8585_v10  ;;  %v8602_v23 = vld [vmem:[%s13066_s1 + $0xf4] ss:$24 sps:$4 sm:$0xff]   ;;  %v8604_v25 = vld [vmem:[%s13066_s1 + $0x68] ss:$24 sps:$4 sm:$0xff]   ;;  %v8608_v27 = vld [vmem:[%s13066_s1 + $0x124] ss:$24 sps:$4 sm:$0xff]  }
   0xa   :  { %v8606_v24 = vld [vmem:[%s13066_s1 + $0x6c] ss:$24 sps:$4 sm:$0xff]   ;;  %v8607_v26 = vld [vmem:[%s13066_s1 + $0xf0] ss:$24 sps:$4 sm:$0xff]   ;;  %v8612_v28 = vld [vmem:[%s13066_s1 + $0x9c] ss:$24 sps:$4 sm:$0xff]  }
   0xb   :  { %809 = vmatpush1.bf16.msra.mxu0 %v8587_v11  ;;  %v8610_v29 = vld [vmem:[%s13066_s1 + $0x98] ss:$24 sps:$4 sm:$0xff]   ;;  %v8614_v31 = vld [vmem:[%s13066_s1 + $0x154] ss:$24 sps:$4 sm:$0xff]   ;;  %v8616_v33 = vld [vmem:[%s13066_s1 + $0xc8] ss:$24 sps:$4 sm:$0xff]  }
   0xc   :  { %882 = vmatpush1.bf16.msra.mxu1 %v787_v14  ;;  %810 = vmatprep.subr.bf16.mxu0 %v8589_v13  ;;  %v8613_v30 = vld [vmem:[%s13066_s1 + $0x120] ss:$24 sps:$4 sm:$0xff]   ;;  %v8618_v32 = vld [vmem:[%s13066_s1 + $0xcc] ss:$24 sps:$4 sm:$0xff]   ;;  %v8619_v34 = vld [vmem:[%s13066_s1 + $0x150] ss:$24 sps:$4 sm:$0xff]  }
   0xd   :  { %950 = vmatprep.subr.bf16.mxu1 %v8594_v17  ;;  %v8620_v35 = vld [vmem:[%s13066_s1 + $0x184] ss:$24 sps:$4 sm:$0xff]   ;;  %v8622_v37 = vld [vmem:[%s13066_s1 + $0xf8] ss:$24 sps:$4 sm:$0xff]   ;;  %v8626_v39 = vld [vmem:[%s13066_s1 + $0x1b4] ss:$24 sps:$4 sm:$0xff]  }
   0xe   :  { %v8624_v36 = vld [vmem:[%s13066_s1 + $0xfc] ss:$24 sps:$4 sm:$0xff]   ;;  %v8625_v38 = vld [vmem:[%s13066_s1 + $0x180] ss:$24 sps:$4 sm:$0xff]   ;;  %v8630_v40 = vld [vmem:[%s13066_s1 + $0x12c] ss:$24 sps:$4 sm:$0xff]  }
   0xf   :  { %7652 = vmatmul.mubr.msk.bf16.vlgmr.msra.gmra.mrb[0].mxu1 %vm772_vm1, %v9633_v15  ;;  %811 = vmatpush1.bf16.msra.mxu0 %v8595_v18  ;;  %v8628_v41 = vld [vmem:[%s13066_s1 + $0x128] ss:$24 sps:$4 sm:$0xff]   ;;  %v8632_v43 = vld [vmem:[%s13066_s1 + $0x1e4] ss:$24 sps:$4 sm:$0xff]   ;;  %v8634_v46 = vld [vmem:[%s13066_s1 + $0x158] ss:$24 sps:$4 sm:$0xff]  }
  0x10   :  { %951 = vmatpush1.bf16.msra.mxu1 %v8592_v16  ;;  %812 = vmatprep.subr.bf16.mxu0 %v8596_v19  ;;  %v8631_v42 = vld [vmem:[%s13066_s1 + $0x1b0] ss:$24 sps:$4 sm:$0xff]   ;;  %v9725_v44 = vld [vmem:[%s13067_s0 + $0x20] ss:$12 sps:$4 sm:$0xff]   ;;  %v8636_v45 = vld [vmem:[%s13066_s1 + $0x15c] ss:$24 sps:$4 sm:$0xff]  }
  0x11   :  { %952 = vmatprep.subr.bf16.mxu1 %v8600_v20  ;;  %919 = vmatprep.mubr.bf16.mxu1 %v9562_v1  ;;  %v8637_v47 = vld [vmem:[%s13066_s1 + $0x1e0] ss:$24 sps:$4 sm:$0xff]   ;;  %v8638_v48 = vld [vmem:[%s13066_s1 + $0x214] ss:$24 sps:$4 sm:$0xff]   ;;  %v8643_v52 = vld [vmem:[%s13066_s1 + $0x210] ss:$24 sps:$4 sm:$0xff]  }
  0x12   :  { %v8642_v49 = vld [vmem:[%s13066_s1 + $0x18c] ss:$24 sps:$4 sm:$0xff]   ;;  %v8640_v51 = vld [vmem:[%s13066_s1 + $0x188] ss:$24 sps:$4 sm:$0xff]   ;;  %v8648_v54 = vld [vmem:[%s13066_s1 + $0x1bc] ss:$24 sps:$4 sm:$0xff]  }
  0x13   :  { %813 = vmatpush1.bf16.msra.mxu0 %v8601_v22  ;;  %v9748_v50 = vld [vmem:[%s13067_s0 + $0x38] ss:$12 sps:$4 sm:$0xff]   ;;  %v8651_v58 = vld [vmem:[%s13066_s1 + $0x274] ss:$24 sps:$4 sm:$0xff]   ;;  %v9786_v60 = vld [vmem:[%s13067_s0 + $0x50] ss:$12 sps:$4 sm:$0xff]  }
  0x14   :  { %953 = vmatpush1.bf16.msra.mxu1 %v8598_v21  ;;  %814 = vmatprep.subr.bf16.mxu0 %v8602_v23  ;;  %v8644_v53 = vld [vmem:[%s13066_s1 + $0x244] ss:$24 sps:$4 sm:$0xff]   ;;  %v8646_v56 = vld [vmem:[%s13066_s1 + $0x1b8] ss:$24 sps:$4 sm:$0xff]   ;;  %v8653_v61 = vld [vmem:[%s13066_s1 + $0x1e8] ss:$24 sps:$4 sm:$0xff]  }
  0x15   :  { %954 = vmatprep.subr.bf16.mxu1 %v8606_v24  ;;  %v9767_v55 = vld [vmem:[%s13067_s0 + $0x4] ss:$12 sps:$4 sm:$0xff]   ;;  %v8649_v57 = vld [vmem:[%s13066_s1 + $0x240] ss:$24 sps:$4 sm:$0xff]   ;;  %v8661_v0 = vld [vmem:[%s13066_s1 + $0x21c] ss:$24 sps:$4 sm:$0xff]  }
  0x16   :  { %v8655_v59 = vld [vmem:[%s13066_s1 + $0x1ec] ss:$24 sps:$4 sm:$0xff]   ;;  %836 = vmatprep.mubr.bf16.mxu0 %v9767_v55  ;;  %v8656_v62 = vld [vmem:[%s13066_s1 + $0x270] ss:$24 sps:$4 sm:$0xff]   ;;  %v8662_v3 = vld [vmem:[%s13066_s1 + $0x2a0] ss:$24 sps:$4 sm:$0xff]  }
  0x17   :  { %815 = vmatpush1.bf16.msra.mxu0 %v8607_v26  ;;  %7653 = vmatmul.mubr.msk.bf16.gmra.mrb[4].mxu1 %vm772_vm1, %v9725_v44  ;;  %v8657_v63 = vld [vmem:[%s13066_s1 + $0x2a4] ss:$24 sps:$4 sm:$0xff]   ;;  %v8659_v2 = vld [vmem:[%s13066_s1 + $0x218] ss:$24 sps:$4 sm:$0xff]   ;;  %v8664_v4 = vld [vmem:[%s13066_s1 + $0x2d4] ss:$24 sps:$4 sm:$0xff]  }
  0x18   :  { %955 = vmatpush1.bf16.msra.mxu1 %v8604_v25  ;;  %816 = vmatprep.subr.bf16.mxu0 %v8608_v27  ;;  %v8668_v5 = vld [vmem:[%s13066_s1 + $0x24c] ss:$24 sps:$4 sm:$0xff]   ;;  %v8666_v6 = vld [vmem:[%s13066_s1 + $0x248] ss:$24 sps:$4 sm:$0xff]   ;;  %v8675_v8 = vld [vmem:[%s13066_s1 + $0x27c] ss:$24 sps:$4 sm:$0xff]  }
  0x19   :  { %956 = vmatprep.subr.bf16.mxu1 %v8612_v28  ;;  %929 = vmatprep.mubr.bf16.mxu1 %v9562_v1  ;;  %v8669_v7 = vld [vmem:[%s13066_s1 + $0x2d0] ss:$24 sps:$4 sm:$0xff]   ;;  %v8678_v9 = vld [vmem:[%s13066_s1 + $0x14] ss:$24 sps:$4 sm:$0xff]   ;;  %v8685_v14 = vld [vmem:[%s13066_s1 + $0x44] ss:$24 sps:$4 sm:$0xff]  }
  0x1a   :  { %v9830_v10 = vld [vmem:[%s13067_s0] ss:$12 sps:$4 sm:$0xff]   ;;  %v8673_v11 = vld [vmem:[%s13066_s1 + $0x278] ss:$24 sps:$4 sm:$0xff]   ;;  %v9847_v16 = vld [vmem:[%s13067_s0 + $0x1c] ss:$12 sps:$4 sm:$0xff]  }
  0x1b   :  { %817 = vmatpush1.bf16.msra.mxu0 %v8613_v30  ;;  %v8676_v12 = vld [vmem:[%s13066_s1 + $0x10] ss:$24 sps:$4 sm:$0xff]   ;;  %v8682_v13 = vld [vmem:[%s13066_s1 + $0x2ac] ss:$24 sps:$4 sm:$0xff]   ;;  %v8683_v18 = vld [vmem:[%s13066_s1 + $0x40] ss:$24 sps:$4 sm:$0xff]  }
  0x1c   :  { %957 = vmatpush1.bf16.msra.mxu1 %v8610_v29  ;;  %818 = vmatprep.subr.bf16.mxu0 %v8614_v31  ;;  %v8680_v17 = vld [vmem:[%s13066_s1 + $0x2a8] ss:$24 sps:$4 sm:$0xff]   ;;  %v8691_v19 = vld [vmem:[%s13066_s1 + $0x2dc] ss:$24 sps:$4 sm:$0xff]   ;;  %v9866_v21 = vld [vmem:[%s13067_s0 + $0x18] ss:$12 sps:$4 sm:$0xff]  }
  0x1d   :  { %958 = vmatprep.subr.bf16.mxu1 %v8618_v32  ;;  %v8694_v20 = vld [vmem:[%s13066_s1 + $0x74] ss:$24 sps:$4 sm:$0xff]   ;;  %v8689_v22 = vld [vmem:[%s13066_s1 + $0x2d8] ss:$24 sps:$4 sm:$0xff]   ;;  %v8700_v25 = vld [vmem:[%s13066_s1 + $0xa4] ss:$24 sps:$4 sm:$0xff]  }
  0x1e   :  { %v8692_v23 = vld [vmem:[%s13066_s1 + $0x70] ss:$24 sps:$4 sm:$0xff]   ;;  %v8697_v24 = vld [vmem:[%s13066_s1 + $0x30c] ss:$24 sps:$4 sm:$0xff]   ;;  %v9883_v26 = vld [vmem:[%s13067_s0 + $0x34] ss:$12 sps:$4 sm:$0xff]  }
  0x1f   :  { %819 = vmatpush1.bf16.msra.mxu0 %v8619_v34  ;;  %7654 = vmatmul.mubr.msk.bf16.gmra.mrb[8].mxu1 %vm772_vm1, %v9748_v50  ;;  %v8695_v27 = vld [vmem:[%s13066_s1 + $0x308] ss:$24 sps:$4 sm:$0xff]   ;;  %v9895_v29 = vld [vmem:[%s13067_s0 + $0x30] ss:$12 sps:$4 sm:$0xff]   ;;  %v8706_v30 = vld [vmem:[%s13066_s1 + $0xd4] ss:$24 sps:$4 sm:$0xff]  }
  0x20   :  { %959 = vmatpush1.bf16.msra.mxu1 %v8616_v33  ;;  %820 = vmatprep.subr.bf16.mxu0 %v8620_v35  ;;  %v8698_v28 = vld [vmem:[%s13066_s1 + $0xa0] ss:$24 sps:$4 sm:$0xff]   ;;  %v8704_v31 = vld [vmem:[%s13066_s1 + $0xd0] ss:$24 sps:$4 sm:$0xff]   ;;  %v8714_v32 = vld [vmem:[%s13066_s1 + $0x33c] ss:$24 sps:$4 sm:$0xff]  }
  0x21   :  { %960 = vmatprep.subr.bf16.mxu1 %v8624_v36  ;;  %939 = vmatprep.mubr.bf16.mxu1 %v9562_v1  ;;  %v8709_v33 = vld [vmem:[%s13066_s1 + $0x104] ss:$24 sps:$4 sm:$0xff]   ;;  %v9914_v34 = vld [vmem:[%s13067_s0 + $0x4c] ss:$12 sps:$4 sm:$0xff]  }
  0x22   :  { %v8712_v35 = vld [vmem:[%s13066_s1 + $0x338] ss:$24 sps:$4 sm:$0xff]   ;;  %v8725_v36 = vld [vmem:[%s13066_s1 + $0x36c] ss:$24 sps:$4 sm:$0x3f]  }
  0x23   :  { %821 = vmatpush1.bf16.msra.mxu0 %v8625_v38  ;;  %v8707_v38 = vld [vmem:[%s13066_s1 + $0x100] ss:$24 sps:$4 sm:$0xff]  }
  0x24   :  { %961 = vmatpush1.bf16.msra.mxu1 %v8622_v37  ;;  %822 = vmatprep.subr.bf16.mxu0 %v8626_v39  ;;  %v8727_v37 = vld [vmem:[%s13066_s1 + $0x368] ss:$24 sps:$4 sm:$0x3f]   ;;  %v8718_v39 = vld [vmem:[%s13066_s1 + $0x134] ss:$24 sps:$4 sm:$0xff]  }
  0x25   :  { %962 = vmatprep.subr.bf16.mxu1 %v8630_v40  ;;  %v793_v40 = vsel %vm785_vm0, %v8727_v37, 0  ;;  %v10147_v37 = vld [vmem:[%s13068_s2 + $0x2a0] ss:$24 sps:$4 sm:$0xff]  }
  0x27   :  { %823 = vmatpush1.bf16.msra.mxu0 %v8631_v42  ;;  %7655 = vmatmul.mubr.msk.bf16.gmra.mrb[12].mxu1 %vm772_vm1, %v9786_v60  ;;  %v9943_v42 = vld [vmem:[%s13067_s0 + $0x48] ss:$12 sps:$4 sm:$0xff]  }
  0x28   :  { %963 = vmatpush1.bf16.msra.mxu1 %v8628_v41  ;;  %824 = vmatprep.subr.bf16.mxu0 %v8632_v43  ;;  %v8736_v41 = vld [vmem:[%s13068_s2 + $0x4] ss:$24 sps:$4 sm:$0xff]   ;;  %v8716_v43 = vld [vmem:[%s13066_s1 + $0x130] ss:$24 sps:$4 sm:$0xff]  }
  0x29   :  { %964 = vmatprep.subr.bf16.mxu1 %v8636_v45  ;;  %982 = vmatprep.mubr.bf16.mxu1 %v9767_v55  ;;  %v8721_v45 = vld [vmem:[%s13066_s1 + $0x164] ss:$24 sps:$4 sm:$0xff]  }
  0x2b   :  { %825 = vmatpush1.bf16.msra.mxu0 %v8637_v47  ;;  %v8724_v47 = vld [vmem:[%s13066_s1 + $0x194] ss:$24 sps:$4 sm:$0xff]  }
  0x2c   :  { %965 = vmatpush1.bf16.msra.mxu1 %v8634_v46  ;;  %826 = vmatprep.subr.bf16.mxu0 %v8638_v48  ;;  %v8719_v46 = vld [vmem:[%s13066_s1 + $0x160] ss:$24 sps:$4 sm:$0xff]   ;;  %v8722_v48 = vld [vmem:[%s13066_s1 + $0x190] ss:$24 sps:$4 sm:$0xff]  }
  0x2d   :  { %966 = vmatprep.subr.bf16.mxu1 %v8642_v49  ;;  %v8730_v49 = vld [vmem:[%s13066_s1 + $0x1c4] ss:$24 sps:$4 sm:$0xff]  }
  0x2f   :  { %827 = vmatpush1.bf16.msra.mxu0 %v8643_v52  ;;  %v8733_v52 = vld [vmem:[%s13066_s1 + $0x1f4] ss:$24 sps:$4 sm:$0xff]  }
  0x30   :  { %967 = vmatpush1.bf16.msra.mxu1 %v8640_v51  ;;  %828 = vmatprep.subr.bf16.mxu0 %v8644_v53  ;;  %v8728_v51 = vld [vmem:[%s13066_s1 + $0x1c0] ss:$24 sps:$4 sm:$0xff]   ;;  %v8731_v53 = vld [vmem:[%s13066_s1 + $0x1f0] ss:$24 sps:$4 sm:$0xff]  }
  0x31   :  { %968 = vmatprep.subr.bf16.mxu1 %v8648_v54  ;;  %v8739_v54 = vld [vmem:[%s13066_s1 + $0x224] ss:$24 sps:$4 sm:$0xff]  }
  0x33   :  { %829 = vmatpush1.bf16.msra.mxu0 %v8649_v57  ;;  %v8742_v57 = vld [vmem:[%s13068_s2 + $0x34] ss:$24 sps:$4 sm:$0xff]  }
  0x34   :  { %969 = vmatpush1.bf16.msra.mxu1 %v8646_v56  ;;  %830 = vmatprep.subr.bf16.mxu0 %v8651_v58  ;;  %v8737_v56 = vld [vmem:[%s13066_s1 + $0x220] ss:$24 sps:$4 sm:$0xff]   ;;  %v8745_v58 = vld [vmem:[%s13066_s1 + $0x254] ss:$24 sps:$4 sm:$0xff]  }
  0x35   :  { %970 = vmatprep.subr.bf16.mxu1 %v8655_v59  ;;  %v8740_v59 = vld [vmem:[%s13068_s2 + $0x30] ss:$24 sps:$4 sm:$0xff]  }
  0x37   :  { %831 = vmatpush1.bf16.msra.mxu0 %v8656_v62  ;;  %v8748_v62 = vld [vmem:[%s13068_s2 + $0x64] ss:$24 sps:$4 sm:$0xff]  }
  0x38   :  { %971 = vmatpush1.bf16.msra.mxu1 %v8653_v61  ;;  %832 = vmatprep.subr.bf16.mxu0 %v8657_v63  ;;  %v8743_v61 = vld [vmem:[%s13066_s1 + $0x250] ss:$24 sps:$4 sm:$0xff]   ;;  %v8746_v63 = vld [vmem:[%s13068_s2 + $0x60] ss:$24 sps:$4 sm:$0xff]  }
  0x39   :  { %972 = vmatprep.subr.bf16.mxu1 %v8661_v0  ;;  %v8749_v0 = vld [vmem:[%s13066_s1 + $0x280] ss:$24 sps:$4 sm:$0xff]  }
  0x3b   :  { %833 = vmatpush1.bf16.msra.mxu0 %v8662_v3  ;;  %v8757_v3 = vld [vmem:[%s13066_s1 + $0x2b4] ss:$24 sps:$4 sm:$0xff]  }
  0x3c   :  { %973 = vmatpush1.bf16.msra.mxu1 %v8659_v2  ;;  %834 = vmatprep.subr.bf16.mxu0 %v8664_v4  ;;  %v8754_v2 = vld [vmem:[%s13068_s2 + $0x94] ss:$24 sps:$4 sm:$0xff]   ;;  %v8752_v4 = vld [vmem:[%s13068_s2 + $0x90] ss:$24 sps:$4 sm:$0xff]  }
  0x3d   :  { %974 = vmatprep.subr.bf16.mxu1 %v8668_v5  ;;  %v8755_v5 = vld [vmem:[%s13066_s1 + $0x2b0] ss:$24 sps:$4 sm:$0xff]  }
  0x3f   :  { %835 = vmatpush1.bf16.msra.mxu0 %v8669_v7  ;;  %v8758_v7 = vld [vmem:[%s13068_s2 + $0xc0] ss:$24 sps:$4 sm:$0xff]  }
  0x40   :  { %975 = vmatpush1.bf16.msra.mxu1 %v8666_v6  ;;  %1096 = vmatprep.subr.bf16.mxu0 %v8678_v9  ;;  %v8760_v6 = vld [vmem:[%s13068_s2 + $0xc4] ss:$24 sps:$4 sm:$0xff]   ;;  %v8766_v9 = vld [vmem:[%s13068_s2 + $0xf4] ss:$24 sps:$4 sm:$0xff]  }
  0x41   :  { %976 = vmatprep.subr.bf16.mxu1 %v8675_v8  ;;  %v8761_v8 = vld [vmem:[%s13066_s1 + $0x2e0] ss:$24 sps:$4 sm:$0xff]  }
  0x42   :  { %837 = vmatmul.mubr.bf16.vlgmr.msra.gmra.mrb[0].mxu0 %v9830_v10 }
  0x43   :  { %1097 = vmatpush1.bf16.msra.mxu0 %v8676_v12  ;;  %846 = vmatprep.mubr.bf16.mxu0 %v9847_v16  ;;  %v8764_v12 = vld [vmem:[%s13068_s2 + $0xf0] ss:$24 sps:$4 sm:$0xff]  }
  0x44   :  { %977 = vmatpush1.bf16.msra.mxu1 %v8673_v11  ;;  %1098 = vmatprep.subr.bf16.mxu0 %v8685_v14  ;;  %v8781_v11 = vld [vmem:[%s13066_s1 + $0x314] ss:$24 sps:$4 sm:$0xff]   ;;  %v8779_v14 = vld [vmem:[%s13066_s1 + $0x310] ss:$24 sps:$4 sm:$0xff]  }
  0x45   :  { %978 = vmatprep.subr.bf16.mxu1 %v8682_v13  ;;  %v8769_v13 = vld [vmem:[%s13068_s2 + $0x124] ss:$24 sps:$4 sm:$0xff]  }
  0x47   :  { %1099 = vmatpush1.bf16.msra.mxu0 %v8683_v18  ;;  %v8772_v18 = vld [vmem:[%s13068_s2 + $0x154] ss:$24 sps:$4 sm:$0xff]  }
  0x48   :  { %979 = vmatpush1.bf16.msra.mxu1 %v8680_v17  ;;  %1100 = vmatprep.subr.bf16.mxu0 %v8694_v20  ;;  %v8767_v17 = vld [vmem:[%s13068_s2 + $0x120] ss:$24 sps:$4 sm:$0xff]   ;;  %v8796_v20 = vld [vmem:[%s13066_s1 + $0x370] ss:$24 sps:$4 sm:$0x3f]  }
  0x49   :  { %980 = vmatprep.subr.bf16.mxu1 %v8691_v19  ;;  %v8785_v19 = vld [vmem:[%s13066_s1 + $0x340] ss:$24 sps:$4 sm:$0xff]  }
  0x4a   :  { %847 = vmatmul.mubr.bf16.gmra.mrb[4].mxu0 %v9866_v21 }
  0x4b   :  { %1101 = vmatpush1.bf16.msra.mxu0 %v8692_v23  ;;  %856 = vmatprep.mubr.bf16.mxu0 %v9883_v26  ;;  %v799_v23 = vsel %vm785_vm0, %v8796_v20, 0  ;;  %v10370_v20 = vld [vmem:[%s13068_s2 + $0x188] ss:$24 sps:$4 sm:$0xff]  }
  0x4c   :  { %981 = vmatpush1.bf16.msra.mxu1 %v8689_v22  ;;  %1102 = vmatprep.subr.bf16.mxu0 %v8700_v25  ;;  %v8775_v22 = vld [vmem:[%s13068_s2 + $0x184] ss:$24 sps:$4 sm:$0xff]   ;;  %v8778_v25 = vld [vmem:[%s13068_s2 + $0x1b4] ss:$24 sps:$4 sm:$0xff]  }
  0x4d   :  { %1023 = vmatprep.subr.bf16.mxu1 %v8697_v24  ;;  %v8773_v24 = vld [vmem:[%s13068_s2 + $0x180] ss:$24 sps:$4 sm:$0xff]  }
  0x4f   :  { %983 = vmatmul.mubr.bf16.vlgmr.msra.gmra.mrb[16].mxu1 %v9830_v10  ;;  %1103 = vmatpush1.bf16.msra.mxu0 %v8698_v28  ;;  %v8790_v28 = vld [vmem:[%s13068_s2 + $0x214] ss:$24 sps:$4 sm:$0xff]  }
  0x50   :  { %1024 = vmatpush1.bf16.msra.mxu1 %v8695_v27  ;;  %1104 = vmatprep.subr.bf16.mxu0 %v8706_v30  ;;  %v8776_v27 = vld [vmem:[%s13068_s2 + $0x1b0] ss:$24 sps:$4 sm:$0xff]  }
  0x51   :  { %992 = vmatprep.mubr.bf16.mxu1 %v9847_v16  ;;  %1025 = vmatprep.subr.bf16.mxu1 %v8714_v32  ;;  %v8788_v30 = vld [vmem:[%s13068_s2 + $0x210] ss:$24 sps:$4 sm:$0xff]   ;;  %v8799_v32 = vld [vmem:[%s13068_s2 + $0x274] ss:$24 sps:$4 sm:$0xff]  }
  0x52   :  { %857 = vmatmul.mubr.bf16.gmra.mrb[8].mxu0 %v9895_v29 }
  0x53   :  { %1105 = vmatpush1.bf16.msra.mxu0 %v8704_v31  ;;  %866 = vmatprep.mubr.bf16.mxu0 %v9914_v34  ;;  %v8793_v31 = vld [vmem:[%s13068_s2 + $0x240] ss:$24 sps:$4 sm:$0xff]  }
  0x54   :  { %1106 = vmatprep.subr.bf16.mxu0 %v8709_v33  ;;  %1026 = vmatpush1.bf16.msra.mxu1 %v8712_v35  ;;  %v8797_v33 = vld [vmem:[%s13068_s2 + $0x270] ss:$24 sps:$4 sm:$0xff]   ;;  %v10139_v35 = vld [vmem:[%s13068_s2 + $0x2a4] ss:$24 sps:$4 sm:$0xff]  }
  0x55   :  { %7656 = vmatprep.subr.msk.bf16.mxu1 %vm785_vm0, %v8725_v36  ;;  %v8808_v36 = vld [vmem:[%s13068_s2 + $0x44] ss:$24 sps:$4 sm:$0xff]  }
  0x57   :  { %993 = vmatmul.mubr.bf16.gmra.mrb[20].mxu1 %v9866_v21  ;;  %1107 = vmatpush1.bf16.msra.mxu0 %v8707_v38  ;;  %v8806_v38 = vld [vmem:[%s13068_s2 + $0x40] ss:$24 sps:$4 sm:$0xff]  }
  0x58   :  { %1002 = vmatprep.mubr.bf16.mxu1 %v9883_v26  ;;  %1108 = vmatprep.subr.bf16.mxu0 %v8718_v39  ;;  %v9525_v39 = vld [vmem:[%s13067_s0 + $0x8] ss:$12 sps:$4 sm:$0xff]  }
  0x59   :  { %1028 = vmatpush1.bf16.msra.mxu1 %v793_v40  ;;  %v10159_v40 = vld [vmem:[%s13068_s2 + $0x2d4] ss:$24 sps:$4 sm:$0xff]  }
  0x5a   :  { %1866 = vmatprep.subr.bf16.mxu1 %v8736_v41  ;;  %867 = vmatmul.mubr.bf16.gmra.mrb[12].mxu0 %v9943_v42  ;;  %v8814_v41 = vld [vmem:[%s13068_s2 + $0x74] ss:$24 sps:$4 sm:$0xff]  }
  0x5b   :  { %1109 = vmatpush1.bf16.msra.mxu0 %v8716_v43  ;;  %1128 = vmatprep.mubr.bf16.mxu0 %v9767_v55  ;;  %v8734_v55 = vld [vmem:[%s13068_s2] ss:$24 sps:$4 sm:$0xff]   ;;  %v8812_v43 = vld [vmem:[%s13068_s2 + $0x70] ss:$24 sps:$4 sm:$0xff]  }
  0x5c   :  { %1110 = vmatprep.subr.bf16.mxu0 %v8721_v45  ;;  %v10177_v45 = vld [vmem:[%s13068_s2 + $0xc] ss:$24 sps:$4 sm:$0xff]  }
  0x5f   :  { %1003 = vmatmul.mubr.bf16.gmra.mrb[24].mxu1 %v9895_v29  ;;  %1111 = vmatpush1.bf16.msra.mxu0 %v8719_v46  ;;  %v8820_v46 = vld [vmem:[%s13068_s2 + $0xa4] ss:$24 sps:$4 sm:$0xff]  }
  0x60   :  { %1012 = vmatprep.mubr.bf16.mxu1 %v9914_v34  ;;  %1112 = vmatprep.subr.bf16.mxu0 %v8724_v47  ;;  %v10187_v47 = vld [vmem:[%s13068_s2 + $0x8] ss:$24 sps:$4 sm:$0xff]  }
  0x63   :  { %1113 = vmatpush1.bf16.msra.mxu0 %v8722_v48  ;;  %v8818_v48 = vld [vmem:[%s13068_s2 + $0xa0] ss:$24 sps:$4 sm:$0xff]  }
  0x64   :  { %1114 = vmatprep.subr.bf16.mxu0 %v8730_v49  ;;  %v9526_v49 = vld [vmem:[%s13067_s0 + $0x20] ss:$12 sps:$4 sm:$0xff]  }
  0x67   :  { %1013 = vmatmul.mubr.bf16.gmra.mrb[28].mxu1 %v9943_v42  ;;  %1115 = vmatpush1.bf16.msra.mxu0 %v8728_v51  ;;  %v10199_v51 = vld [vmem:[%s13068_s2 + $0x3c] ss:$24 sps:$4 sm:$0xff]  }
  0x68   :  { %1055 = vmatprep.mubr.bf16.mxu1 %v9562_v1  ;;  %1116 = vmatprep.subr.bf16.mxu0 %v8733_v52  ;;  %v8826_v52 = vld [vmem:[%s13068_s2 + $0xd4] ss:$24 sps:$4 sm:$0xff]  }
  0x6b   :  { %1117 = vmatpush1.bf16.msra.mxu0 %v8731_v53  ;;  %v10210_v53 = vld [vmem:[%s13068_s2 + $0x38] ss:$24 sps:$4 sm:$0xff]  }
  0x6c   :  { %1118 = vmatprep.subr.bf16.mxu0 %v8739_v54  ;;  %v8824_v54 = vld [vmem:[%s13068_s2 + $0xd0] ss:$24 sps:$4 sm:$0xff]  }
  0x6f   :  { %7657 = vmatmul.mubr.msk.bf16.vlgmr.msra.gmra.mrb[16].mxu1 %vm772_vm1, %v9633_v15  ;;  %1119 = vmatpush1.bf16.msra.mxu0 %v8737_v56  ;;  %v8751_v15 = vld [vmem:[%s13066_s1 + $0x284] ss:$24 sps:$4 sm:$0xff]  }
  0x70   :  { %1867 = vmatpush1.bf16.msra.mxu1 %v8734_v55  ;;  %1120 = vmatprep.subr.bf16.mxu0 %v8745_v58  ;;  %v10219_v55 = vld [vmem:[%s13068_s2 + $0x6c] ss:$24 sps:$4 sm:$0xff]   ;;  %v8830_v58 = vld [vmem:[%s13068_s2 + $0x100] ss:$24 sps:$4 sm:$0xff]  }
  0x71   :  { %1868 = vmatprep.subr.bf16.mxu1 %v8742_v57  ;;  %1065 = vmatprep.mubr.bf16.mxu1 %v9562_v1  ;;  %v8832_v56 = vld [vmem:[%s13068_s2 + $0x104] ss:$24 sps:$4 sm:$0xff]   ;;  %v10229_v57 = vld [vmem:[%s13068_s2 + $0x68] ss:$24 sps:$4 sm:$0xff]  }
  0x73   :  { %1121 = vmatpush1.bf16.msra.mxu0 %v8743_v61  ;;  %v10242_v61 = vld [vmem:[%s13068_s2 + $0x9c] ss:$24 sps:$4 sm:$0xff]  }
  0x74   :  { %1869 = vmatpush1.bf16.msra.mxu1 %v8740_v59  ;;  %1122 = vmatprep.subr.bf16.mxu0 %v8751_v15  ;;  %v9527_v59 = vld [vmem:[%s13067_s0 + $0x38] ss:$12 sps:$4 sm:$0xff]  }
  0x75   :  { %1870 = vmatprep.subr.bf16.mxu1 %v8748_v62  ;;  %v8838_v62 = vld [vmem:[%s13068_s2 + $0x134] ss:$24 sps:$4 sm:$0xff]   ;;  %v10253_v15 = vld [vmem:[%s13068_s2 + $0x98] ss:$24 sps:$4 sm:$0xff]  }
  0x77   :  { %7658 = vmatmul.mubr.msk.bf16.gmra.mrb[20].mxu1 %vm772_vm1, %v9725_v44  ;;  %1123 = vmatpush1.bf16.msra.mxu0 %v8749_v0  ;;  %v8763_v44 = vld [vmem:[%s13066_s1 + $0x2e4] ss:$24 sps:$4 sm:$0xff]  }
  0x78   :  { %1871 = vmatpush1.bf16.msra.mxu1 %v8746_v63  ;;  %1124 = vmatprep.subr.bf16.mxu0 %v8757_v3  ;;  %v8836_v63 = vld [vmem:[%s13068_s2 + $0x130] ss:$24 sps:$4 sm:$0xff]   ;;  %v10261_v0 = vld [vmem:[%s13068_s2 + $0xcc] ss:$24 sps:$4 sm:$0xff]  }
  0x79   :  { %1872 = vmatprep.subr.bf16.mxu1 %v8754_v2  ;;  %1075 = vmatprep.mubr.bf16.mxu1 %v9562_v1  ;;  %v8844_v2 = vld [vmem:[%s13068_s2 + $0x164] ss:$24 sps:$4 sm:$0xff]   ;;  %v10271_v3 = vld [vmem:[%s13068_s2 + $0xc8] ss:$24 sps:$4 sm:$0xff]  }
  0x7b   :  { %1125 = vmatpush1.bf16.msra.mxu0 %v8755_v5  ;;  %v9528_v5 = vld [vmem:[%s13067_s0 + $0x50] ss:$12 sps:$4 sm:$0xff]  }
  0x7c   :  { %1873 = vmatpush1.bf16.msra.mxu1 %v8752_v4  ;;  %1126 = vmatprep.subr.bf16.mxu0 %v8763_v44  ;;  %v10276_v4 = vld [vmem:[%s13068_s2 + $0x160] ss:$24 sps:$4 sm:$0xff]   ;;  %v10290_v44 = vld [vmem:[%s13068_s2 + $0x194] ss:$24 sps:$4 sm:$0xff]  }
  0x7d   :  { %1874 = vmatprep.subr.bf16.mxu1 %v8760_v6  ;;  %v10285_v6 = vld [vmem:[%s13068_s2 + $0xfc] ss:$24 sps:$4 sm:$0xff]  }
  0x7f   :  { %7659 = vmatmul.mubr.msk.bf16.gmra.mrb[24].mxu1 %vm772_vm1, %v9748_v50  ;;  %1127 = vmatpush1.bf16.msra.mxu0 %v8761_v8  ;;  %v8787_v50 = vld [vmem:[%s13066_s1 + $0x344] ss:$24 sps:$4 sm:$0xff]   ;;  %v10302_v8 = vld [vmem:[%s13068_s2 + $0x190] ss:$24 sps:$4 sm:$0xff]  }
  0x80   :  { %1875 = vmatpush1.bf16.msra.mxu1 %v8758_v7  ;;  %1085 = vmatprep.mubr.bf16.mxu1 %v9562_v1  ;;  %v10297_v7 = vld [vmem:[%s13068_s2 + $0xf8] ss:$24 sps:$4 sm:$0xff]  }
  0x81   :  { %1876 = vmatprep.subr.bf16.mxu1 %v8766_v9  ;;  %1169 = vmatprep.subr.bf16.mxu0 %v8781_v11  ;;  %v10308_v9 = vld [vmem:[%s13068_s2 + $0x12c] ss:$24 sps:$4 sm:$0xff]  }
  0x82   :  { %1129 = vmatmul.mubr.bf16.vlgmr.msra.gmra.mrb[16].mxu0 %v9830_v10  ;;  %v8791_v10 = vld [vmem:[%s13066_s1 + $0x374] ss:$24 sps:$4 sm:$0x3f]   ;;  %v10313_v11 = vld [vmem:[%s13068_s2 + $0x1c4] ss:$24 sps:$4 sm:$0xff]  }
  0x83   :  { %1138 = vmatprep.mubr.bf16.mxu0 %v9847_v16  ;;  %1170 = vmatpush1.bf16.msra.mxu0 %v8779_v14  ;;  %v8770_v16 = vld [vmem:[%s13068_s2 + $0x150] ss:$24 sps:$4 sm:$0xff]   ;;  %v10332_v14 = vld [vmem:[%s13068_s2 + $0x15c] ss:$24 sps:$4 sm:$0xff]  }
  0x84   :  { %1877 = vmatpush1.bf16.msra.mxu1 %v8764_v12  ;;  %1171 = vmatprep.subr.bf16.mxu0 %v8787_v50  ;;  %v10322_v12 = vld [vmem:[%s13068_s2 + $0x128] ss:$24 sps:$4 sm:$0xff]   ;;  %v10337_v50 = vld [vmem:[%s13068_s2 + $0x1f4] ss:$24 sps:$4 sm:$0xff]  }
  0x85   :  { %1878 = vmatprep.subr.bf16.mxu1 %v8769_v13  ;;  %v10327_v13 = vld [vmem:[%s13068_s2 + $0x1c0] ss:$24 sps:$4 sm:$0xff]  }
  0x87   :  { %7660 = vmatmul.mubr.msk.bf16.gmra.mrb[28].mxu1 %vm772_vm1, %v9786_v60  ;;  %1172 = vmatpush1.bf16.msra.mxu0 %v8785_v19  ;;  %v8802_v60 = vld [vmem:[%s13068_s2 + $0x14] ss:$24 sps:$4 sm:$0xff]  }
  0x88   :  { %1879 = vmatpush1.bf16.msra.mxu1 %v8767_v17  ;;  %1898 = vmatprep.mubr.bf16.mxu1 %v9562_v1  ;;  %v10346_v17 = vld [vmem:[%s13068_s2 + $0x158] ss:$24 sps:$4 sm:$0xff]   ;;  %v10356_v19 = vld [vmem:[%s13068_s2 + $0x18c] ss:$24 sps:$4 sm:$0xff]  }
  0x89   :  { %1880 = vmatprep.subr.bf16.mxu1 %v8772_v18  ;;  %7661 = vmatprep.subr.msk.bf16.mxu0 %vm785_vm0, %v8791_v10  ;;  %v10351_v18 = vld [vmem:[%s13068_s2 + $0x1f0] ss:$24 sps:$4 sm:$0xff]   ;;  %v10361_v10 = vld [vmem:[%s13068_s2 + $0x224] ss:$24 sps:$4 sm:$0xff]  }
  0x8a   :  { %1139 = vmatmul.mubr.bf16.gmra.mrb[20].mxu0 %v9866_v21  ;;  %v8784_v21 = vld [vmem:[%s13068_s2 + $0x1e4] ss:$24 sps:$4 sm:$0xff]  }
  0x8b   :  { %1148 = vmatprep.mubr.bf16.mxu0 %v9883_v26  ;;  %1174 = vmatpush1.bf16.msra.mxu0 %v799_v23  ;;  %v8782_v26 = vld [vmem:[%s13068_s2 + $0x1e0] ss:$24 sps:$4 sm:$0xff]   ;;  %v10385_v23 = vld [vmem:[%s13068_s2 + $0x254] ss:$24 sps:$4 sm:$0xff]  }
  0x8c   :  { %1881 = vmatpush1.bf16.msra.mxu1 %v8770_v16  ;;  %1948 = vmatprep.subr.bf16.mxu0 %v8802_v60  ;;  %v10375_v16 = vld [vmem:[%s13068_s2 + $0x220] ss:$24 sps:$4 sm:$0xff]  }
  0x8d   :  { %1882 = vmatprep.subr.bf16.mxu1 %v8775_v22  ;;  %v10380_v22 = vld [vmem:[%s13068_s2 + $0x1bc] ss:$24 sps:$4 sm:$0xff]   ;;  %v10394_v60 = vld [vmem:[%s13068_s2 + $0x1b8] ss:$24 sps:$4 sm:$0xff]  }
  0x90   :  { %1883 = vmatpush1.bf16.msra.mxu1 %v8773_v24  ;;  %v10399_v24 = vld [vmem:[%s13068_s2 + $0x250] ss:$24 sps:$4 sm:$0xff]  }
  0x91   :  { %1884 = vmatprep.subr.bf16.mxu1 %v8778_v25  ;;  %v10404_v25 = vld [vmem:[%s13068_s2 + $0x1ec] ss:$24 sps:$4 sm:$0xff]  }
  0x92   :  { %1149 = vmatmul.mubr.bf16.gmra.mrb[24].mxu0 %v9895_v29  ;;  %v8795_v29 = vld [vmem:[%s13068_s2 + $0x244] ss:$24 sps:$4 sm:$0xff]  }
  0x93   :  { %1158 = vmatprep.mubr.bf16.mxu0 %v9914_v34  ;;  %v8800_v34 = vld [vmem:[%s13068_s2 + $0x10] ss:$24 sps:$4 sm:$0xff]  }
  0x94   :  { %1885 = vmatpush1.bf16.msra.mxu1 %v8776_v27  ;;  %v10409_v27 = vld [vmem:[%s13068_s2 + $0x284] ss:$24 sps:$4 sm:$0xff]  }
  0x95   :  { %1886 = vmatprep.subr.bf16.mxu1 %v8784_v21  ;;  %v10418_v21 = vld [vmem:[%s13068_s2 + $0x1e8] ss:$24 sps:$4 sm:$0xff]  }
  0x98   :  { %1887 = vmatpush1.bf16.msra.mxu1 %v8782_v26  ;;  %v10423_v26 = vld [vmem:[%s13068_s2 + $0x280] ss:$24 sps:$4 sm:$0xff]  }
  0x99   :  { %1888 = vmatprep.subr.bf16.mxu1 %v8790_v28  ;;  %v10428_v28 = vld [vmem:[%s13068_s2 + $0x21c] ss:$24 sps:$4 sm:$0xff]  }
  0x9a   :  { %1159 = vmatmul.mubr.bf16.gmra.mrb[28].mxu0 %v9943_v42  ;;  %v10169_v42 = vld [vmem:[%s13068_s2 + $0x2d0] ss:$24 sps:$4 sm:$0xff]  }
  0x9b   :  { %1201 = vmatprep.mubr.bf16.mxu0 %v9562_v1 }
  0x9c   :  { %1889 = vmatpush1.bf16.msra.mxu1 %v8788_v30  ;;  %v10433_v30 = vld [vmem:[%s13068_s2 + $0x2b4] ss:$24 sps:$4 sm:$0xff]  }
  0x9d   :  { %1890 = vmatprep.subr.bf16.mxu1 %v8795_v29  ;;  %v10442_v29 = vld [vmem:[%s13068_s2 + $0x218] ss:$24 sps:$4 sm:$0xff]  }
  0xa0   :  { %1891 = vmatpush1.bf16.msra.mxu1 %v8793_v31  ;;  %v10447_v31 = vld [vmem:[%s13068_s2 + $0x2b0] ss:$24 sps:$4 sm:$0xff]  }
  0xa1   :  { %1892 = vmatprep.subr.bf16.mxu1 %v8799_v32  ;;  %v10452_v32 = vld [vmem:[%s13068_s2 + $0x24c] ss:$24 sps:$4 sm:$0xff]  }
  0xa2   :  { %7662 = vmatmul.mubr.msk.bf16.vlgmr.msra.gmra.mrb[16].mxu0 %vm772_vm1, %v9525_v39  ;;  %v10485_v39 = vld [vmem:[%s13068_s2 + $0x278] ss:$24 sps:$4 sm:$0xff]  }
  0xa3   :  { %1949 = vmatpush1.bf16.msra.mxu0 %v8800_v34  ;;  %1211 = vmatprep.mubr.bf16.mxu0 %v9562_v1  ;;  %v10466_v34 = vld [vmem:[%s13068_s2 + $0x248] ss:$24 sps:$4 sm:$0xff]  }
  0xa4   :  { %1893 = vmatpush1.bf16.msra.mxu1 %v8797_v33  ;;  %1950 = vmatprep.subr.bf16.mxu0 %v8808_v36  ;;  %v10457_v33 = vld [vmem:[%s13068_s2 + $0x2e4] ss:$24 sps:$4 sm:$0xff]   ;;  %v10471_v36 = vld [vmem:[%s13068_s2 + $0x2e0] ss:$24 sps:$4 sm:$0xff]  }
  0xa5   :  { %1894 = vmatprep.subr.bf16.mxu1 %v10139_v35 }
  0xa7   :  { %1951 = vmatpush1.bf16.msra.mxu0 %v8806_v38  ;;  %v10476_v38 = vld [vmem:[%s13068_s2 + $0x27c] ss:$24 sps:$4 sm:$0xff]  }
  0xa8   :  { %1895 = vmatpush1.bf16.msra.mxu1 %v10147_v37  ;;  %1952 = vmatprep.subr.bf16.mxu0 %v8814_v41  ;;  %v10490_v41 = vld [vmem:[%s13068_s2 + $0x2ac] ss:$24 sps:$4 sm:$0xff]  }
  0xa9   :  { %1896 = vmatprep.subr.bf16.mxu1 %v10159_v40 }
  0xaa   :  { %7663 = vmatmul.mubr.msk.bf16.gmra.mrb[20].mxu0 %vm772_vm1, %v9526_v49  ;;  %v10509_v49 = vld [vmem:[%s13068_s2 + $0x2dc] ss:$24 sps:$4 sm:$0xff]  }
  0xab   :  { %1953 = vmatpush1.bf16.msra.mxu0 %v8812_v43  ;;  %1221 = vmatprep.mubr.bf16.mxu0 %v9562_v1 }
  0xac   :  { %1897 = vmatpush1.bf16.msra.mxu1 %v10169_v42  ;;  %1954 = vmatprep.subr.bf16.mxu0 %v8820_v46  ;;  %v10501_v46 = vld [vmem:[%s13068_s2 + $0x2a8] ss:$24 sps:$4 sm:$0xff]  }
  0xad   :  { %1907 = vmatprep.subr.bf16.mxu1 %v10177_v45 }
  0xaf   :  { %1899 = vmatmul.mubr.bf16.vlgmr.msra.gmra.mrb[32].mxu1 %v9562_v1  ;;  %1955 = vmatpush1.bf16.msra.mxu0 %v8818_v48 }
  0xb0   :  { %1908 = vmatpush1.bf16.msra.mxu1 %v10187_v47  ;;  %1956 = vmatprep.subr.bf16.mxu0 %v8826_v52 }
  0xb1   :  { %1909 = vmatprep.subr.bf16.mxu1 %v10199_v51  ;;  %1939 = vmatprep.mubr.bf16.mxu1 %v9562_v1 }
  0xb2   :  { %7664 = vmatmul.mubr.msk.bf16.gmra.mrb[24].mxu0 %vm772_vm1, %v9527_v59 }
  0xb3   :  { %1957 = vmatpush1.bf16.msra.mxu0 %v8824_v54  ;;  %1231 = vmatprep.mubr.bf16.mxu0 %v9562_v1  ;;  %v10522_v54 = vld [vmem:[%s13068_s2 + $0x2d8] ss:$24 sps:$4 sm:$0xff]  }
  0xb4   :  { %1910 = vmatpush1.bf16.msra.mxu1 %v10210_v53  ;;  %1958 = vmatprep.subr.bf16.mxu0 %v8832_v56  ;;  %v9534_v56 = vld [vmem:[%s13068_s2 + $0x60] ss:$24 sps:$4 sm:$0xff]  }
  0xb5   :  { %1911 = vmatprep.subr.bf16.mxu1 %v10219_v55 }
  0xb7   :  { %1959 = vmatpush1.bf16.msra.mxu0 %v8830_v58  ;;  %v9535_v58 = vld [vmem:[%s13068_s2 + $0x94] ss:$24 sps:$4 sm:$0xff]  }
  0xb8   :  { %1912 = vmatpush1.bf16.msra.mxu1 %v10229_v57  ;;  %1960 = vmatprep.subr.bf16.mxu0 %v8838_v62 }
  0xb9   :  { %1913 = vmatprep.subr.bf16.mxu1 %v10242_v61 }
  0xba   :  { %7665 = vmatmul.mubr.msk.bf16.gmra.mrb[28].mxu0 %vm772_vm1, %v9528_v5 }
  0xbb   :  { %1961 = vmatpush1.bf16.msra.mxu0 %v8836_v63  ;;  %1980 = vmatprep.mubr.bf16.mxu0 %v9562_v1  ;;  %v9537_v63 = vld [vmem:[%s13068_s2 + $0xc4] ss:$24 sps:$4 sm:$0xff]  }
  0xbc   :  { %1914 = vmatpush1.bf16.msra.mxu1 %v10253_v15  ;;  %1962 = vmatprep.subr.bf16.mxu0 %v8844_v2 }
  0xbd   :  { %1915 = vmatprep.subr.bf16.mxu1 %v10261_v0 }
  0xbf   :  { %1963 = vmatpush1.bf16.msra.mxu0 %v10276_v4 }
  0xc0   :  { %1916 = vmatpush1.bf16.msra.mxu1 %v10271_v3  ;;  %1964 = vmatprep.subr.bf16.mxu0 %v10290_v44 }
  0xc1   :  { %1917 = vmatprep.subr.bf16.mxu1 %v10285_v6 }
  0xc3   :  { %1965 = vmatpush1.bf16.msra.mxu0 %v10302_v8 }
  0xc4   :  { %1918 = vmatpush1.bf16.msra.mxu1 %v10297_v7  ;;  %1966 = vmatprep.subr.bf16.mxu0 %v10313_v11 }
  0xc5   :  { %1919 = vmatprep.subr.bf16.mxu1 %v10308_v9 }
  0xc7   :  { %1967 = vmatpush1.bf16.msra.mxu0 %v10327_v13 }
  0xc8   :  { %1920 = vmatpush1.bf16.msra.mxu1 %v10322_v12  ;;  %1968 = vmatprep.subr.bf16.mxu0 %v10337_v50 }
  0xc9   :  { %1921 = vmatprep.subr.bf16.mxu1 %v10332_v14 }
  0xcb   :  { %1969 = vmatpush1.bf16.msra.mxu0 %v10351_v18 }
  0xcc   :  { %1922 = vmatpush1.bf16.msra.mxu1 %v10346_v17  ;;  %1970 = vmatprep.subr.bf16.mxu0 %v10361_v10 }
  0xcd   :  { %1923 = vmatprep.subr.bf16.mxu1 %v10356_v19 }
  0xcf   :  { %1971 = vmatpush1.bf16.msra.mxu0 %v10375_v16 }
  0xd0   :  { %1924 = vmatpush1.bf16.msra.mxu1 %v10370_v20  ;;  %1972 = vmatprep.subr.bf16.mxu0 %v10385_v23 }
  0xd1   :  { %1925 = vmatprep.subr.bf16.mxu1 %v10380_v22 }
  0xd3   :  { %1973 = vmatpush1.bf16.msra.mxu0 %v10399_v24 }
  0xd4   :  { %1926 = vmatpush1.bf16.msra.mxu1 %v10394_v60  ;;  %1974 = vmatprep.subr.bf16.mxu0 %v10409_v27 }
  0xd5   :  { %1927 = vmatprep.subr.bf16.mxu1 %v10404_v25 }
  0xd7   :  { %1975 = vmatpush1.bf16.msra.mxu0 %v10423_v26 }
  0xd8   :  { %1928 = vmatpush1.bf16.msra.mxu1 %v10418_v21  ;;  %1976 = vmatprep.subr.bf16.mxu0 %v10433_v30 }
  0xd9   :  { %1929 = vmatprep.subr.bf16.mxu1 %v10428_v28 }
  0xdb   :  { %1977 = vmatpush1.bf16.msra.mxu0 %v10447_v31 }
  0xdc   :  { %1930 = vmatpush1.bf16.msra.mxu1 %v10442_v29  ;;  %1978 = vmatprep.subr.bf16.mxu0 %v10457_v33 }
  0xdd   :  { %1931 = vmatprep.subr.bf16.mxu1 %v10452_v32 }
  0xdf   :  { %1979 = vmatpush1.bf16.msra.mxu0 %v10471_v36 }
  0xe0   :  { %1932 = vmatpush1.bf16.msra.mxu1 %v10466_v34  ;;  %2658 = vmatprep.subr.bf16.mxu0 %v10177_v45 }
  0xe1   :  { %1933 = vmatprep.subr.bf16.mxu1 %v10476_v38 }
  0xe2   :  { %v10496_v43 = vpop.f32.mrb[0].mxu1  ;;  %1981 = vmatmul.mubr.bf16.vlgmr.msra.gmra.mrb[32].mxu0 %v9562_v1 }
  0xe3   :  { %v10504_v48 = vpop.f32.mrb[1].mxu1  ;;  %2659 = vmatpush1.bf16.msra.mxu0 %v10187_v47  ;;  %v9529_v47 = vld [vmem:[%s13068_s2 + $0x4] ss:$24 sps:$4 sm:$0xff]  }
  0xe4   :  { %1934 = vmatpush1.bf16.msra.mxu1 %v10485_v39  ;;  %v10512_v52 = vpop.f32.mrb[2].mxu1  ;;  %2660 = vmatprep.subr.bf16.mxu0 %v10199_v51  ;;  %v9530_v51 = vld [vmem:[%s13068_s2] ss:$24 sps:$4 sm:$0xff]  }
  0xe5   :  { %v10515_v45 = vpop.f32.mrb[3].mxu1  ;;  %1935 = vmatprep.subr.bf16.mxu1 %v10490_v41 }
  0xe7   :  { %2661 = vmatpush1.bf16.msra.mxu0 %v10210_v53  ;;  %v9531_v53 = vld [vmem:[%s13068_s2 + $0x34] ss:$24 sps:$4 sm:$0xff]  }
  0xe8   :  { %1936 = vmatpush1.bf16.msra.mxu1 %v10501_v46  ;;  %2662 = vmatprep.subr.bf16.mxu0 %v10219_v55  ;;  %v9532_v55 = vld [vmem:[%s13068_s2 + $0x30] ss:$24 sps:$4 sm:$0xff]  }
  0xe9   :  { %1937 = vmatprep.subr.bf16.mxu1 %v10509_v49 }
  0xeb   :  { %2663 = vmatpush1.bf16.msra.mxu0 %v10229_v57  ;;  %v10555_v57 = vpop.f32.mrb[4].mxu1 }
  0xec   :  { %1938 = vmatpush1.bf16.msra.mxu1 %v10522_v54  ;;  %2664 = vmatprep.subr.bf16.mxu0 %v10242_v61  ;;  %v10561_v59 = vpop.f32.mrb[5].mxu1 }
  0xed   :  { %2617 = vmatprep.subr.bf16.mxu1 %v9529_v47  ;;  %v10563_v61 = vpop.f32.mrb[6].mxu1 }
  0xee   :  { %v10565_v62 = vpop.f32.mrb[7].mxu1 }
  0xef   :  { %1940 = vmatmul.mubr.bf16.vlgmr.msra.gmra.mrb[36].mxu1 %v9562_v1  ;;  %2665 = vmatpush1.bf16.msra.mxu0 %v10253_v15  ;;  %v9533_v1 = vld [vmem:[%s13068_s2 + $0x64] ss:$24 sps:$4 sm:$0xff]   ;;  %v9536_v15 = vld [vmem:[%s13068_s2 + $0x90] ss:$24 sps:$4 sm:$0xff]  }
  0xf0   :  { %2618 = vmatpush1.bf16.msra.mxu1 %v9530_v51  ;;  %2666 = vmatprep.subr.bf16.mxu0 %v10261_v0  ;;  %v9538_v0 = vld [vmem:[%s13068_s2 + $0xc0] ss:$24 sps:$4 sm:$0xff]   ;;  %v9544_v51 = vld [vmem:[%s13068_s2 + $0x150] ss:$24 sps:$4 sm:$0xff]  }
  0xf1   :  { %2619 = vmatprep.subr.bf16.mxu1 %v9531_v53  ;;  %v9547_v53 = vld [vmem:[%s13068_s2 + $0x1b4] ss:$24 sps:$4 sm:$0xff]  }
  0xf2   :  { %v10579_v2 = vpop.f32.mrb[8].mxu1 }
  0xf3   :  { %2667 = vmatpush1.bf16.msra.mxu0 %v10271_v3  ;;  %v9539_v3 = vld [vmem:[%s13068_s2 + $0xf4] ss:$24 sps:$4 sm:$0xff]   ;;  %v10585_v5 = vpop.f32.mrb[9].mxu1 }
  0xf4   :  { %2620 = vmatpush1.bf16.msra.mxu1 %v9532_v55  ;;  %2668 = vmatprep.subr.bf16.mxu0 %v10285_v6  ;;  %v10587_v6 = vpop.f32.mrb[10].mxu1 }
  0xf5   :  { %2621 = vmatprep.subr.bf16.mxu1 %v9533_v1 }
  0xf7   :  { %2669 = vmatpush1.bf16.msra.mxu0 %v10297_v7  ;;  %v10589_v7 = vpop.f32.mrb[11].mxu1 }
  0xf8   :  { %2622 = vmatpush1.bf16.msra.mxu1 %v9534_v56  ;;  %2670 = vmatprep.subr.bf16.mxu0 %v10308_v9  ;;  %v9540_v9 = vld [vmem:[%s13068_s2 + $0xf0] ss:$24 sps:$4 sm:$0xff]  }
  0xf9   :  { %2623 = vmatprep.subr.bf16.mxu1 %v9535_v58 }
  0xfb   :  { %2671 = vmatpush1.bf16.msra.mxu0 %v10322_v12  ;;  %v9541_v12 = vld [vmem:[%s13068_s2 + $0x124] ss:$24 sps:$4 sm:$0xff]  }
  0xfc   :  { %2624 = vmatpush1.bf16.msra.mxu1 %v9536_v15  ;;  %2672 = vmatprep.subr.bf16.mxu0 %v10332_v14  ;;  %v9542_v14 = vld [vmem:[%s13068_s2 + $0x120] ss:$24 sps:$4 sm:$0xff]   ;;  %v9552_v15 = vld [vmem:[%s13068_s2 + $0x210] ss:$24 sps:$4 sm:$0xff]  }
  0xfd   :  { %2625 = vmatprep.subr.bf16.mxu1 %v9537_v63 }
  0xff   :  { %2673 = vmatpush1.bf16.msra.mxu0 %v10346_v17  ;;  %v10603_v17 = vpop.f32.mrb[12].mxu1 }
 0x100   :  { %2626 = vmatpush1.bf16.msra.mxu1 %v9538_v0  ;;  %2674 = vmatprep.subr.bf16.mxu0 %v10356_v19  ;;  %v9543_v19 = vld [vmem:[%s13068_s2 + $0x154] ss:$24 sps:$4 sm:$0xff]  }
 0x101   :  { %2627 = vmatprep.subr.bf16.mxu1 %v9539_v3 }
 0x103   :  { %2675 = vmatpush1.bf16.msra.mxu0 %v10370_v20  ;;  %v10609_v20 = vpop.f32.mrb[13].mxu1 }
 0x104   :  { %2628 = vmatpush1.bf16.msra.mxu1 %v9540_v9  ;;  %2676 = vmatprep.subr.bf16.mxu0 %v10380_v22  ;;  %v10611_v47 = vpop.f32.mrb[14].mxu1  ;;  %v9556_v9 = vld [vmem:[%s13068_s2 + $0x270] ss:$24 sps:$4 sm:$0xff]  }
 0x105   :  { %2629 = vmatprep.subr.bf16.mxu1 %v9541_v12  ;;  %v10613_v22 = vpop.f32.mrb[15].mxu1 }
 0x107   :  { %2677 = vmatpush1.bf16.msra.mxu0 %v10394_v60  ;;  %v9545_v60 = vld [vmem:[%s13068_s2 + $0x184] ss:$24 sps:$4 sm:$0xff]  }
 0x108   :  { %2630 = vmatpush1.bf16.msra.mxu1 %v9542_v14  ;;  %2678 = vmatprep.subr.bf16.mxu0 %v10404_v25  ;;  %v9546_v25 = vld [vmem:[%s13068_s2 + $0x180] ss:$24 sps:$4 sm:$0xff]  }
 0x109   :  { %2631 = vmatprep.subr.bf16.mxu1 %v9543_v19 }
 0x10b   :  { %2679 = vmatpush1.bf16.msra.mxu0 %v10418_v21  ;;  %v9548_v21 = vld [vmem:[%s13068_s2 + $0x1b0] ss:$24 sps:$4 sm:$0xff]  }
 0x10c   :  { %2632 = vmatpush1.bf16.msra.mxu1 %v9544_v51  ;;  %2680 = vmatprep.subr.bf16.mxu0 %v10428_v28  ;;  %v9549_v28 = vld [vmem:[%s13068_s2 + $0x1e4] ss:$24 sps:$4 sm:$0xff]  }
 0x10d   :  { %2633 = vmatprep.subr.bf16.mxu1 %v9545_v60 }
 0x10f   :  { %2681 = vmatpush1.bf16.msra.mxu0 %v10442_v29 }
 0x110   :  { %2634 = vmatpush1.bf16.msra.mxu1 %v9546_v25  ;;  %2682 = vmatprep.subr.bf16.mxu0 %v10452_v32 }
 0x111   :  { %2635 = vmatprep.subr.bf16.mxu1 %v9547_v53 }
 0x113   :  { %2683 = vmatpush1.bf16.msra.mxu0 %v10466_v34  ;;  %v9550_v34 = vld [vmem:[%s13068_s2 + $0x1e0] ss:$24 sps:$4 sm:$0xff]  }
 0x114   :  { %2636 = vmatpush1.bf16.msra.mxu1 %v9548_v21  ;;  %2684 = vmatprep.subr.bf16.mxu0 %v10476_v38 }
 0x115   :  { %2637 = vmatprep.subr.bf16.mxu1 %v9549_v28  ;;  %v838_v29 = vpop.f32.mrb[0].mxu0 }
 0x116   :  { %v10640_v55 = vadd.f32 %v10496_v43, %v838_v29  ;;  %v840_v1 = vpop.f32.mrb[1].mxu0  ;;  %v9551_v43 = vld [vmem:[%s13068_s2 + $0x214] ss:$24 sps:$4 sm:$0xff]  }
 0x117   :  { %v10643_v32 = vadd.f32 %v10504_v48, %v840_v1  ;;  %v842_v56 = vpop.f32.mrb[2].mxu0  ;;  %2685 = vmatpush1.bf16.msra.mxu0 %v10485_v39  ;;  %v9553_v39 = vld [vmem:[%s13068_s2 + $0x244] ss:$24 sps:$4 sm:$0xff]  }
 0x118   :  { %2638 = vmatpush1.bf16.msra.mxu1 %v9550_v34  ;;  %v10650_v58 = vadd.f32 %v10512_v52, %v842_v56  ;;  %v844_v38 = vpop.f32.mrb[3].mxu0  ;;  %2686 = vmatprep.subr.bf16.mxu0 %v10490_v41 }
 0x119   :  { %2639 = vmatprep.subr.bf16.mxu1 %v9551_v43  ;;  %v10657_v48 = vadd.f32 %v10515_v45, %v844_v38 }
 0x11b   :  { %2687 = vmatpush1.bf16.msra.mxu0 %v10501_v46  ;;  %v9554_v46 = vld [vmem:[%s13068_s2 + $0x240] ss:$24 sps:$4 sm:$0xff]  }
 0x11c   :  { %2640 = vmatpush1.bf16.msra.mxu1 %v9552_v15  ;;  %2688 = vmatprep.subr.bf16.mxu0 %v10509_v49 }
 0x11d   :  { %2641 = vmatprep.subr.bf16.mxu1 %v9553_v39  ;;  %v848_v52 = vpop.f32.mrb[4].mxu0 }
 0x11e   :  { %v10668_v41 = vadd.f32 %v10555_v57, %v848_v52  ;;  %v850_v45 = vpop.f32.mrb[5].mxu0  ;;  %v9555_v57 = vld [vmem:[%s13068_s2 + $0x274] ss:$24 sps:$4 sm:$0xff]  }
 0x11f   :  { %v10671_v63 = vadd.f32 %v10561_v59, %v850_v45  ;;  %v852_v0 = vpop.f32.mrb[6].mxu0  ;;  %2689 = vmatpush1.bf16.msra.mxu0 %v10522_v54  ;;  %v10748_v52 = vld [vmem:[%s13068_s2 + $0x14] ss:$24 sps:$4 sm:$0xff]  }
 0x120   :  { %13174 = vst [vmem:[#allocation4_spill] sm:$0xff] %v10668_v41  ;;  %2642 = vmatpush1.bf16.msra.mxu1 %v9554_v46  ;;  %v10678_v3 = vadd.f32 %v10563_v61, %v852_v0  ;;  %v854_v49 = vpop.f32.mrb[7].mxu0  ;;  %v11147_v41 = vld [vmem:[%s13068_s2 + $0x210] ss:$24 sps:$4 sm:$0xff]  }
 0x121   :  { %13175 = vst [vmem:[#allocation5_spill] sm:$0xff] %v10671_v63  ;;  %2643 = vmatprep.subr.bf16.mxu1 %v9555_v57  ;;  %v10684_v59 = vadd.f32 %v10565_v62, %v854_v49  ;;  %v11142_v63 = vld [vmem:[%s13068_s2 + $0x214] ss:$24 sps:$4 sm:$0xff]  }
 0x122   :  { %13176 = vst [vmem:[#allocation6_spill] sm:$0xff] %v10678_v3  ;;  %v11110_v3 = vld [vmem:[%s13068_s2 + $0x1b8] ss:$24 sps:$4 sm:$0xff]  }
 0x123   :  { %13177 = vst [vmem:[#allocation7_spill] sm:$0xff] %v10684_v59  ;;  %v11104_v59 = vld [vmem:[%s13068_s2 + $0x1bc] ss:$24 sps:$4 sm:$0xff]   ;;  %13231 = vst [vmem:[#allocation61_spill] sm:$0xff] %v11110_v3 }
 0x124   :  { %2644 = vmatpush1.bf16.msra.mxu1 %v9556_v9  ;;  %13230 = vst [vmem:[#allocation60_spill] sm:$0xff] %v11104_v59 }
 0x125   :  { %2645 = vmatprep.subr.bf16.mxu1 %v10139_v35  ;;  %v858_v54 = vpop.f32.mrb[8].mxu0 }
 0x126   :  { %v10691_v61 = vadd.f32 %v10579_v2, %v858_v54  ;;  %v860_v12 = vpop.f32.mrb[9].mxu0 }
 0x127   :  { %v10694_v14 = vadd.f32 %v10585_v5, %v860_v12  ;;  %v862_v19 = vpop.f32.mrb[10].mxu0 }
 0x128   :  { %13178 = vst [vmem:[#allocation8_spill] sm:$0xff] %v10691_v61  ;;  %2646 = vmatpush1.bf16.msra.mxu1 %v10147_v37  ;;  %v10698_v62 = vadd.f32 %v10587_v6, %v862_v19  ;;  %v864_v51 = vpop.f32.mrb[11].mxu0  ;;  %v11075_v61 = vld [vmem:[%s13068_s2 + $0x180] ss:$24 sps:$4 sm:$0xff]  }
 0x129   :  { %13179 = vst [vmem:[#allocation9_spill] sm:$0xff] %v10694_v14  ;;  %2647 = vmatprep.subr.bf16.mxu1 %v10159_v40  ;;  %v10702_v60 = vadd.f32 %v10589_v7, %v864_v51  ;;  %v11070_v14 = vld [vmem:[%s13068_s2 + $0x184] ss:$24 sps:$4 sm:$0xff]  }
 0x12a   :  { %13180 = vst [vmem:[#allocation10_spill] sm:$0xff] %v10698_v62 }
 0x12b   :  { %13181 = vst [vmem:[#allocation11_spill] sm:$0xff] %v10702_v60 }
 0x12c   :  { %2648 = vmatpush1.bf16.msra.mxu1 %v10169_v42 }
 0x12d   :  { %v868_v35 = vpop.f32.mrb[12].mxu0  ;;  %2699 = vmatprep.subr.bf16.mxu1 %v10748_v52 }
 0x12e   :  { %v10706_v2 = vadd.f32 %v10603_v17, %v868_v35  ;;  %v870_v5 = vpop.f32.mrb[13].mxu0 }
 0x12f   :  { %v10709_v25 = vadd.f32 %v10609_v20, %v870_v5  ;;  %v872_v37 = vpop.f32.mrb[14].mxu0 }
 0x130   :  { %13182 = vst [vmem:[#allocation12_spill] sm:$0xff] %v10706_v2  ;;  %v10712_v6 = vadd.f32 %v10611_v47, %v872_v37  ;;  %v874_v53 = vpop.f32.mrb[15].mxu0 }
 0x131   :  { %13183 = vst [vmem:[#allocation13_spill] sm:$0xff] %v10709_v25  ;;  %v10715_v40 = vadd.f32 %v10613_v22, %v874_v53 }
 0x132   :  { %13184 = vst [vmem:[#allocation14_spill] sm:$0xff] %v10712_v6 }
 0x133   :  { %13185 = vst [vmem:[#allocation15_spill] sm:$0xff] %v10715_v40 }
 0x142   :  { %v1057_v7 = vpop.f32.mrb[16].mxu1 }
 0x143   :  { %v10717_v21 = vpop.f32.mrb[17].mxu1 }
 0x144   :  { %13186 = vst [vmem:[#allocation16_spill] sm:$0xff] %v10717_v21  ;;  %v10719_v42 = vpop.f32.mrb[18].mxu1 }
 0x145   :  { %v10721_v28 = vpop.f32.mrb[19].mxu1 }
 0x146   :  { %13187 = vst [vmem:[#allocation17_spill] sm:$0xff] %v10721_v28 }
 0x14a   :  { %v10723_v17 = vpop.f32.mrb[20].mxu1 }
 0x14b   :  { %13188 = vst [vmem:[#allocation18_spill] sm:$0xff] %v10723_v17  ;;  %v10725_v29 = vpop.f32.mrb[21].mxu1  ;;  %v11128_v17 = vld [vmem:[%s13068_s2 + $0x1ec] ss:$24 sps:$4 sm:$0xff]  }
 0x14c   :  { %13189 = vst [vmem:[#allocation19_spill] sm:$0xff] %v10725_v29  ;;  %v10727_v20 = vpop.f32.mrb[22].mxu1  ;;  %13232 = vst [vmem:[#allocation62_spill] sm:$0xff] %v11128_v17 }
 0x14d   :  { %13190 = vst [vmem:[#allocation20_spill] sm:$0xff] %v10727_v20  ;;  %v10729_v1 = vpop.f32.mrb[23].mxu1  ;;  %v11094_v20 = vld [vmem:[%s13068_s2 + $0x1b4] ss:$24 sps:$4 sm:$0xff]  }
 0x14e   :  { %13191 = vst [vmem:[#allocation21_spill] sm:$0xff] %v10729_v1  ;;  %v11062_v1 = vld [vmem:[%s13068_s2 + $0x158] ss:$24 sps:$4 sm:$0xff]  }
 0x14f   :  { %13227 = vst [vmem:[#allocation57_spill] sm:$0xff] %v11062_v1 }
 0x152   :  { %v10731_v47 = vpop.f32.mrb[24].mxu1 }
 0x153   :  { %13192 = vst [vmem:[#allocation22_spill] sm:$0xff] %v10731_v47  ;;  %v10733_v56 = vpop.f32.mrb[25].mxu1  ;;  %v11056_v47 = vld [vmem:[%s13068_s2 + $0x15c] ss:$24 sps:$4 sm:$0xff]  }
 0x154   :  { %13193 = vst [vmem:[#allocation23_spill] sm:$0xff] %v10733_v56  ;;  %v10735_v22 = vpop.f32.mrb[26].mxu1  ;;  %13226 = vst [vmem:[#allocation56_spill] sm:$0xff] %v11056_v47  ;;  %v11099_v56 = vld [vmem:[%s13068_s2 + $0x1b0] ss:$24 sps:$4 sm:$0xff]  }
 0x155   :  { %13194 = vst [vmem:[#allocation24_spill] sm:$0xff] %v10735_v22  ;;  %v10737_v34 = vpop.f32.mrb[27].mxu1 }
 0x156   :  { %13195 = vst [vmem:[#allocation25_spill] sm:$0xff] %v10737_v34  ;;  %v11134_v34 = vld [vmem:[%s13068_s2 + $0x1e8] ss:$24 sps:$4 sm:$0xff]  }
 0x157   :  { %13233 = vst [vmem:[#allocation63_spill] sm:$0xff] %v11134_v34 }
 0x15a   :  { %v10739_v38 = vpop.f32.mrb[28].mxu1 }
 0x15b   :  { %13196 = vst [vmem:[#allocation26_spill] sm:$0xff] %v10739_v38  ;;  %v10741_v43 = vpop.f32.mrb[29].mxu1 }
 0x15c   :  { %v10743_v15 = vpop.f32.mrb[30].mxu1 }
 0x15d   :  { %13197 = vst [vmem:[#allocation27_spill] sm:$0xff] %v10743_v15  ;;  %v1093_v39 = vpop.f32.mrb[31].mxu1 }
 0x175   :  { %v10750_v45 = vpop.f32.mrb[16].mxu0 }
 0x176   :  { %13198 = vst [vmem:[#allocation28_spill] sm:$0xff] %v10750_v45  ;;  %v10753_v0 = vpop.f32.mrb[17].mxu0 }
 0x177   :  { %13199 = vst [vmem:[#allocation29_spill] sm:$0xff] %v10753_v0  ;;  %v10755_v46 = vpop.f32.mrb[18].mxu0 }
 0x178   :  { %13200 = vst [vmem:[#allocation30_spill] sm:$0xff] %v10755_v46  ;;  %v10757_v49 = vpop.f32.mrb[19].mxu0 }
 0x179   :  { %13201 = vst [vmem:[#allocation31_spill] sm:$0xff] %v10757_v49 }
 0x17d   :  { %v10759_v57 = vpop.f32.mrb[20].mxu0 }
 0x17e   :  { %13202 = vst [vmem:[#allocation32_spill] sm:$0xff] %v10759_v57  ;;  %v10761_v9 = vpop.f32.mrb[21].mxu0 }
 0x17f   :  { %13203 = vst [vmem:[#allocation33_spill] sm:$0xff] %v10761_v9  ;;  %v10763_v54 = vpop.f32.mrb[22].mxu0 }
 0x180   :  { %13204 = vst [vmem:[#allocation34_spill] sm:$0xff] %v10763_v54  ;;  %v10765_v12 = vpop.f32.mrb[23].mxu0 }
 0x181   :  { %13205 = vst [vmem:[#allocation35_spill] sm:$0xff] %v10765_v12 }
 0x182   :  { %v1900_v19 = vpop.f32.mrb[32].mxu1 }
 0x183   :  { %v1995_v51 = vadd.f32 %v1900_v19, %v10640_v55  ;;  %v1902_v35 = vpop.f32.mrb[33].mxu1 }
 0x184   :  { %v2002_v5 = vadd.f32 %v1902_v35, %v10643_v32  ;;  %v1904_v37 = vpop.f32.mrb[34].mxu1 }
 0x185   :  { %v1905_v53 = vpop.f32.mrb[35].mxu1  ;;  %v10769_v0 = vpop.f32.mrb[24].mxu0  ;;  %v7762_v55 = vmul.f32 -1.442695, %v1995_v51 }
 0x186   :  { %13206 = vst [vmem:[#allocation36_spill] sm:$0xff] %v10769_v0  ;;  %v10771_v45 = vpop.f32.mrb[25].mxu0  ;;  %v7763_v19 = vmul.f32 -1.442695, %v2002_v5  ;;  %v11086_v0 = vld [vmem:[%s13068_s2 + $0x188] ss:$24 sps:$4 sm:$0xff]  }
 0x187   :  { %13207 = vst [vmem:[#allocation37_spill] sm:$0xff] %v10771_v45  ;;  %v10773_v15 = vpop.f32.mrb[26].mxu0  ;;  %9365 = vpow2.f32 %v7762_v55  ;;  %v11080_v45 = vld [vmem:[%s13068_s2 + $0x18c] ss:$24 sps:$4 sm:$0xff]   ;;  %13229 = vst [vmem:[#allocation59_spill] sm:$0xff] %v11086_v0 }
 0x188   :  { %13208 = vst [vmem:[#allocation38_spill] sm:$0xff] %v10773_v15  ;;  %v10775_v21 = vpop.f32.mrb[27].mxu0  ;;  %9367 = vpow2.f32 %v7763_v19  ;;  %13228 = vst [vmem:[#allocation58_spill] sm:$0xff] %v11080_v45  ;;  %v11123_v15 = vld [vmem:[%s13068_s2 + $0x1e0] ss:$24 sps:$4 sm:$0xff]  }
 0x189   :  { %13209 = vst [vmem:[#allocation39_spill] sm:$0xff] %v10775_v21  ;;  %v11118_v21 = vld [vmem:[%s13068_s2 + $0x1e4] ss:$24 sps:$4 sm:$0xff]  }
 0x18d   :  { %v10777_v40 = vpop.f32.mrb[28].mxu0 }
 0x18e   :  { %v10779_v6 = vpop.f32.mrb[29].mxu0 }
 0x18f   :  { %v1237_v49 = vpop.f32.mrb[30].mxu0 }
 0x190   :  { %v1239_v46 = vpop.f32.mrb[31].mxu0 }
 0x191   :  { %v9366_v32 = vpop.eup %9365 }
 0x192   :  { %v1999_v35 = vadd.f32 1.0, %v9366_v32  ;;  %v9368_v2 = vpop.eup %9367 }
 0x193   :  { %v2006_v9 = vadd.f32 1.0, %v9368_v2 }
 0x194   :  { %9369 = vrcp.f32 %v1999_v35 }
 0x195   :  { %9371 = vrcp.f32 %v2006_v9 }
 0x19e   :  { %v9370_v57 = vpop.eup %9369 }
 0x1b5   :  { %v1982_v37 = vpop.f32.mrb[32].mxu0 }
 0x1b6   :  { %v2023_v53 = vadd.f32 %v1982_v37, %v1237_v49  ;;  %v1984_v38 = vpop.f32.mrb[33].mxu0  ;;  %v9372_v49 = vpop.eup %9371 }
 0x1b7   :  { %v1986_v28 = vpop.f32.mrb[34].mxu0  ;;  %v2012_v32 = vsub.f32 1.0, %v9372_v49  ;;  %v2014_v35 = vmul.f32 0.0, %v9372_v49  ;;  %v10809_v49 = vld [vmem:[%s13068_s2 + $0x74] ss:$24 sps:$4 sm:$0xff]  }
 0x1b8   :  { %v1987_v25 = vpop.f32.mrb[35].mxu0  ;;  %v7765_v19 = vmul.f32 -1.442695, %v2023_v53 }
 0x1c2   :  { %v1941_v22 = vpop.f32.mrb[36].mxu1 }
 0x1c3   :  { %v2009_v29 = vmul.f32 %v9370_v57, %v1941_v22  ;;  %v1943_v60 = vpop.f32.mrb[37].mxu1 }
 0x1c4   :  { %v2016_v62 = vadd.f32 %v1943_v60, %v1093_v39  ;;  %v1945_v51 = vpop.f32.mrb[38].mxu1 }
 0x1c5   :  { %v2010_v55 = vadd.f32 %v2009_v29, %v1057_v7  ;;  %v1946_v5 = vpop.f32.mrb[39].mxu1 }
 0x1c6   :  { %v7764_v12 = vmul.f32 -1.442695, %v2016_v62  ;;  %v10790_v5 = vld [vmem:[%s13068_s2 + $0x10] ss:$24 sps:$4 sm:$0xff]  }
 0x1c7   :  { %9373 = vtanh.f32 %v2010_v55 }
 0x1c8   :  { %9375 = vpow2.f32 %v7764_v12 }
 0x1c9   :  { %9377 = vpow2.f32 %v7765_v19  ;;  %v10803_v19 = vld [vmem:[%s13068_s2 + $0x40] ss:$24 sps:$4 sm:$0xff]  }
 0x1d1   :  { %v9374_v28 = vpop.eup %9373 }
 0x1d2   :  { %v2013_v25 = vmul.f32 %v9374_v28, %v2012_v32  ;;  %v9376_v2 = vpop.eup %9375  ;;  %v10815_v32 = vld [vmem:[%s13068_s2 + $0x70] ss:$24 sps:$4 sm:$0xff]   ;;  %v10821_v28 = vld [vmem:[%s13068_s2 + $0xa4] ss:$24 sps:$4 sm:$0xff]  }
 0x1d3   :  { %v2020_v37 = vadd.f32 1.0, %v9376_v2  ;;  %v9378_v22 = vpop.eup %9377  ;;  %v10839_v2 = vld [vmem:[%s13068_s2 + $0xd0] ss:$24 sps:$4 sm:$0xff]  }
 0x1d4   :  { %v10781_v54 = vadd.f32 %v2014_v35, %v2013_v25  ;;  %v2027_v60 = vadd.f32 1.0, %v9378_v22  ;;  %v10827_v25 = vld [vmem:[%s13068_s2 + $0xa0] ss:$24 sps:$4 sm:$0xff]   ;;  %v10833_v35 = vld [vmem:[%s13068_s2 + $0xd4] ss:$24 sps:$4 sm:$0xff]  }
 0x1d5   :  { %9379 = vrcp.f32 %v2020_v37  ;;  %v9557_v37 = vld [vmem:[%s13068_s2 + $0x104] ss:$24 sps:$4 sm:$0xff]   ;;  %v9558_v22 = vld [vmem:[%s13068_s2 + $0x100] ss:$24 sps:$4 sm:$0xff]  }
 0x1d6   :  { %13210 = vst [vmem:[#allocation40_spill] sm:$0xff] %v10781_v54  ;;  %9381 = vrcp.f32 %v2027_v60  ;;  %v9559_v60 = vld [vmem:[%s13068_s2 + $0x134] ss:$24 sps:$4 sm:$0xff]  }
 0x1df   :  { %v9380_v39 = vpop.eup %9379 }
 0x1e0   :  { %v2030_v7 = vmul.f32 %v9380_v39, %v1984_v38  ;;  %v9382_v29 = vpop.eup %9381  ;;  %v2039_v38 = vpack.c.bf16 %v10781_v54, %v10781_v54  ;;  %v9560_v39 = vld [vmem:[%s13068_s2 + $0x130] ss:$24 sps:$4 sm:$0xff]  }
 0x1e1   :  { %v2033_v57 = vsub.f32 1.0, %v9382_v29  ;;  %v2035_v53 = vmul.f32 0.0, %v9382_v29  ;;  %v10983_v29 = vld [vmem:[%s13068_s2 + $0xc0] ss:$24 sps:$4 sm:$0xff]  }
 0x1e2   :  { %v2031_v62 = vadd.f32 %v2030_v7, %v1239_v46  ;;  %v10797_v46 = vld [vmem:[%s13068_s2 + $0x44] ss:$24 sps:$4 sm:$0xff]  }
 0x1e3   :  { %v9561_v7 = vld [vmem:[%s13068_s2 + $0x164] ss:$24 sps:$4 sm:$0xff]  }
 0x1e4   :  { %9383 = vtanh.f32 %v2031_v62  ;;  %v10977_v62 = vld [vmem:[%s13068_s2 + $0xcc] ss:$24 sps:$4 sm:$0xff]  }
 0x1e5   :  { %13220 = vst [vmem:[#allocation50_spill] sm:$0xff] %v10977_v62 }
 0x1ee   :  { %v9384_v9 = vpop.eup %9383 }
 0x1ef   :  { %v2034_v12 = vmul.f32 %v9384_v9, %v2033_v57  ;;  %v10990_v57 = vld [vmem:[%s13068_s2 + $0xc8] ss:$24 sps:$4 sm:$0xff]   ;;  %v10995_v9 = vld [vmem:[%s13068_s2 + $0xf4] ss:$24 sps:$4 sm:$0xff]  }
 0x1f0   :  { %13221 = vst [vmem:[#allocation51_spill] sm:$0xff] %v10990_v57 }
 0x1f1   :  { %v10783_v51 = vadd.f32 %v2035_v53, %v2034_v12  ;;  %v11001_v12 = vld [vmem:[%s13068_s2 + $0xfc] ss:$24 sps:$4 sm:$0xff]   ;;  %v11007_v53 = vld [vmem:[%s13068_s2 + $0xf0] ss:$24 sps:$4 sm:$0xff]  }
 0x1f2   :  { %13222 = vst [vmem:[#allocation52_spill] sm:$0xff] %v11001_v12 }
 0x1f3   :  { %13211 = vst [vmem:[#allocation41_spill] sm:$0xff] %v10783_v51  ;;  %v2040_v55 = vpack.c.bf16 %v10783_v51, %v10783_v51 }
 0x1f5   :  { %2649 = vmatprep.mubr.bf16.mxu1 %v2040_v55  ;;  %2690 = vmatprep.mubr.bf16.mxu0 %v2040_v55 }
 0x1f6   :  { %2650 = vmatmul.mubr.bf16.vlgmr.msra.gmra.mrb[40].mxu1 %v2039_v38  ;;  %2691 = vmatmul.mubr.bf16.vlgmr.msra.gmra.mrb[36].mxu0 %v2039_v38 }
 0x1f7   :  { %2700 = vmatpush1.bf16.msra.mxu1 %v10790_v5  ;;  %2731 = vmatprep.mubr.bf16.mxu1 %v2040_v55  ;;  %v11014_v55 = vld [vmem:[%s13068_s2 + $0xf8] ss:$24 sps:$4 sm:$0xff]  }
 0x1f8   :  { %2701 = vmatprep.subr.bf16.mxu1 %v10797_v46  ;;  %13223 = vst [vmem:[#allocation53_spill] sm:$0xff] %v11014_v55 }
 0x1fb   :  { %2702 = vmatpush1.bf16.msra.mxu1 %v10803_v19 }
 0x1fc   :  { %2703 = vmatprep.subr.bf16.mxu1 %v10809_v49 }
 0x1ff   :  { %2704 = vmatpush1.bf16.msra.mxu1 %v10815_v32 }
 0x200   :  { %2705 = vmatprep.subr.bf16.mxu1 %v10821_v28 }
 0x203   :  { %2706 = vmatpush1.bf16.msra.mxu1 %v10827_v25 }
 0x204   :  { %2707 = vmatprep.subr.bf16.mxu1 %v10833_v35 }
 0x207   :  { %2708 = vmatpush1.bf16.msra.mxu1 %v10839_v2 }
 0x208   :  { %2709 = vmatprep.subr.bf16.mxu1 %v9557_v37  ;;  %v11025_v37 = vld [vmem:[%s13068_s2 + $0x12c] ss:$24 sps:$4 sm:$0xff]  }
 0x209   :  { %13224 = vst [vmem:[#allocation54_spill] sm:$0xff] %v11025_v37 }
 0x20b   :  { %2710 = vmatpush1.bf16.msra.mxu1 %v9558_v22  ;;  %v11031_v22 = vld [vmem:[%s13068_s2 + $0x120] ss:$24 sps:$4 sm:$0xff]  }
 0x20c   :  { %2711 = vmatprep.subr.bf16.mxu1 %v9559_v60  ;;  %v11038_v60 = vld [vmem:[%s13068_s2 + $0x128] ss:$24 sps:$4 sm:$0xff]  }
 0x20d   :  { %13225 = vst [vmem:[#allocation55_spill] sm:$0xff] %v11038_v60 }
 0x20f   :  { %2712 = vmatpush1.bf16.msra.mxu1 %v9560_v39  ;;  %v11046_v39 = vld [vmem:[%s13068_s2 + $0x154] ss:$24 sps:$4 sm:$0xff]  }
 0x210   :  { %2713 = vmatprep.subr.bf16.mxu1 %v9561_v7  ;;  %v11051_v7 = vld [vmem:[%s13068_s2 + $0x150] ss:$24 sps:$4 sm:$0xff]  }
 0x213   :  { %2714 = vmatpush1.bf16.msra.mxu1 %v10276_v4  ;;  %v10878_v4 = vld [vmem:[%s13068_s2] ss:$24 sps:$4 sm:$0xff]  }
 0x214   :  { %2715 = vmatprep.subr.bf16.mxu1 %v10290_v44  ;;  %v10883_v44 = vld [vmem:[%s13068_s2 + $0x4] ss:$24 sps:$4 sm:$0xff]  }
 0x215   :  { %3368 = vmatprep.subr.bf16.mxu0 %v10883_v44 }
 0x216   :  { %3369 = vmatpush1.bf16.msra.mxu0 %v10878_v4 }
 0x217   :  { %2716 = vmatpush1.bf16.msra.mxu1 %v10302_v8  ;;  %v10888_v8 = vld [vmem:[%s13068_s2 + $0x8] ss:$24 sps:$4 sm:$0xff]  }
 0x218   :  { %2717 = vmatprep.subr.bf16.mxu1 %v10313_v11  ;;  %13212 = vst [vmem:[#allocation42_spill] sm:$0xff] %v10888_v8  ;;  %v10893_v11 = vld [vmem:[%s13068_s2 + $0xc] ss:$24 sps:$4 sm:$0xff]  }
 0x219   :  { %13213 = vst [vmem:[#allocation43_spill] sm:$0xff] %v10893_v11 }
 0x21b   :  { %2718 = vmatpush1.bf16.msra.mxu1 %v10327_v13  ;;  %v10898_v13 = vld [vmem:[%s13068_s2 + $0x34] ss:$24 sps:$4 sm:$0xff]  }
 0x21c   :  { %2719 = vmatprep.subr.bf16.mxu1 %v10337_v50  ;;  %v10904_v50 = vld [vmem:[%s13068_s2 + $0x3c] ss:$24 sps:$4 sm:$0xff]   ;;  %3370 = vmatprep.subr.bf16.mxu0 %v10898_v13 }
 0x21d   :  { %13214 = vst [vmem:[#allocation44_spill] sm:$0xff] %v10904_v50 }
 0x21f   :  { %2720 = vmatpush1.bf16.msra.mxu1 %v10351_v18  ;;  %v10911_v18 = vld [vmem:[%s13068_s2 + $0x30] ss:$24 sps:$4 sm:$0xff]  }
 0x220   :  { %2721 = vmatprep.subr.bf16.mxu1 %v10361_v10  ;;  %v10918_v10 = vld [vmem:[%s13068_s2 + $0x38] ss:$24 sps:$4 sm:$0xff]   ;;  %3371 = vmatpush1.bf16.msra.mxu0 %v10911_v18 }
 0x221   :  { %13215 = vst [vmem:[#allocation45_spill] sm:$0xff] %v10918_v10 }
 0x223   :  { %2722 = vmatpush1.bf16.msra.mxu1 %v10375_v16  ;;  %v10923_v16 = vld [vmem:[%s13068_s2 + $0x64] ss:$24 sps:$4 sm:$0xff]  }
 0x224   :  { %2723 = vmatprep.subr.bf16.mxu1 %v10385_v23  ;;  %v10929_v23 = vld [vmem:[%s13068_s2 + $0x6c] ss:$24 sps:$4 sm:$0xff]   ;;  %3372 = vmatprep.subr.bf16.mxu0 %v10923_v16 }
 0x225   :  { %13216 = vst [vmem:[#allocation46_spill] sm:$0xff] %v10929_v23 }
 0x227   :  { %2724 = vmatpush1.bf16.msra.mxu1 %v10399_v24  ;;  %v10935_v24 = vld [vmem:[%s13068_s2 + $0x60] ss:$24 sps:$4 sm:$0xff]  }
 0x228   :  { %2725 = vmatprep.subr.bf16.mxu1 %v10409_v27  ;;  %v10942_v27 = vld [vmem:[%s13068_s2 + $0x68] ss:$24 sps:$4 sm:$0xff]   ;;  %3373 = vmatpush1.bf16.msra.mxu0 %v10935_v24 }
 0x229   :  { %13217 = vst [vmem:[#allocation47_spill] sm:$0xff] %v10942_v27 }
 0x22b   :  { %2726 = vmatpush1.bf16.msra.mxu1 %v10423_v26  ;;  %v10947_v26 = vld [vmem:[%s13068_s2 + $0x94] ss:$24 sps:$4 sm:$0xff]  }
 0x22c   :  { %2727 = vmatprep.subr.bf16.mxu1 %v10433_v30  ;;  %v10953_v30 = vld [vmem:[%s13068_s2 + $0x9c] ss:$24 sps:$4 sm:$0xff]   ;;  %3374 = vmatprep.subr.bf16.mxu0 %v10947_v26 }
 0x22d   :  { %13218 = vst [vmem:[#allocation48_spill] sm:$0xff] %v10953_v30 }
 0x22f   :  { %2728 = vmatpush1.bf16.msra.mxu1 %v10447_v31  ;;  %v10959_v31 = vld [vmem:[%s13068_s2 + $0x90] ss:$24 sps:$4 sm:$0xff]  }
 0x230   :  { %2729 = vmatprep.subr.bf16.mxu1 %v10457_v33  ;;  %v10966_v33 = vld [vmem:[%s13068_s2 + $0x98] ss:$24 sps:$4 sm:$0xff]   ;;  %3375 = vmatpush1.bf16.msra.mxu0 %v10959_v31 }
 0x231   :  { %13219 = vst [vmem:[#allocation49_spill] sm:$0xff] %v10966_v33 }
 0x233   :  { %2730 = vmatpush1.bf16.msra.mxu1 %v10471_v36  ;;  %v10971_v36 = vld [vmem:[%s13068_s2 + $0xc4] ss:$24 sps:$4 sm:$0xff]  }
 0x234   :  { %3409 = vmatprep.subr.bf16.mxu1 %v10893_v11  ;;  %3376 = vmatprep.subr.bf16.mxu0 %v10971_v36 }
 0x235   :  { %3377 = vmatpush1.bf16.msra.mxu0 %v10983_v29 }
 0x236   :  { %2732 = vmatmul.mubr.bf16.vlgmr.msra.gmra.mrb[44].mxu1 %v2039_v38  ;;  %3378 = vmatprep.subr.bf16.mxu0 %v10995_v9  ;;  %v11019_v38 = vld [vmem:[%s13068_s2 + $0x124] ss:$24 sps:$4 sm:$0xff]  }
 0x237   :  { %3410 = vmatpush1.bf16.msra.mxu1 %v10888_v8 }
 0x238   :  { %3411 = vmatprep.subr.bf16.mxu1 %v10904_v50 }
 0x239   :  { %3379 = vmatpush1.bf16.msra.mxu0 %v11007_v53 }
 0x23a   :  { %3380 = vmatprep.subr.bf16.mxu0 %v11019_v38 }
 0x23b   :  { %3412 = vmatpush1.bf16.msra.mxu1 %v10918_v10 }
 0x23c   :  { %3413 = vmatprep.subr.bf16.mxu1 %v10929_v23 }
 0x23d   :  { %3381 = vmatpush1.bf16.msra.mxu0 %v11031_v22 }
 0x23e   :  { %3382 = vmatprep.subr.bf16.mxu0 %v11046_v39 }
 0x23f   :  { %3414 = vmatpush1.bf16.msra.mxu1 %v10942_v27 }
 0x240   :  { %3415 = vmatprep.subr.bf16.mxu1 %v10953_v30 }
 0x241   :  { %3383 = vmatpush1.bf16.msra.mxu0 %v11051_v7 }
 0x242   :  { %3384 = vmatprep.subr.bf16.mxu0 %v11070_v14 }
 0x243   :  { %3416 = vmatpush1.bf16.msra.mxu1 %v10966_v33 }
 0x244   :  { %3417 = vmatprep.subr.bf16.mxu1 %v10977_v62 }
 0x245   :  { %3385 = vmatpush1.bf16.msra.mxu0 %v11075_v61 }
 0x246   :  { %3386 = vmatprep.subr.bf16.mxu0 %v11094_v20 }
 0x247   :  { %3418 = vmatpush1.bf16.msra.mxu1 %v10990_v57 }
 0x248   :  { %3419 = vmatprep.subr.bf16.mxu1 %v11001_v12 }
 0x249   :  { %3387 = vmatpush1.bf16.msra.mxu0 %v11099_v56 }
 0x24a   :  { %3388 = vmatprep.subr.bf16.mxu0 %v11118_v21 }
 0x24b   :  { %3420 = vmatpush1.bf16.msra.mxu1 %v11014_v55  ;;  %v11241_v55 = vld [vmem:[%s13068_s2 + $0x2dc] ss:$24 sps:$4 sm:$0xff]  }
 0x24c   :  { %3421 = vmatprep.subr.bf16.mxu1 %v11025_v37  ;;  %v11235_v37 = vld [vmem:[%s13068_s2 + $0x2d4] ss:$24 sps:$4 sm:$0xff]   ;;  %13242 = vst [vmem:[#allocation72_spill] sm:$0xff] %v11241_v55 }
 0x24d   :  { %3389 = vmatpush1.bf16.msra.mxu0 %v11123_v15 }
 0x24e   :  { %3390 = vmatprep.subr.bf16.mxu0 %v11142_v63 }
 0x24f   :  { %3422 = vmatpush1.bf16.msra.mxu1 %v11038_v60  ;;  %v11217_v60 = vld [vmem:[%s13068_s2 + $0x2ac] ss:$24 sps:$4 sm:$0xff]  }
 0x250   :  { %3423 = vmatprep.subr.bf16.mxu1 %v11056_v47  ;;  %v11206_v47 = vld [vmem:[%s13068_s2 + $0x278] ss:$24 sps:$4 sm:$0xff]   ;;  %13240 = vst [vmem:[#allocation70_spill] sm:$0xff] %v11217_v60 }
 0x251   :  { %3391 = vmatpush1.bf16.msra.mxu0 %v11147_v41  ;;  %13239 = vst [vmem:[#allocation69_spill] sm:$0xff] %v11206_v47 }
 0x253   :  { %3424 = vmatpush1.bf16.msra.mxu1 %v11062_v1  ;;  %v11199_v1 = vld [vmem:[%s13068_s2 + $0x270] ss:$24 sps:$4 sm:$0xff]  }
 0x254   :  { %3425 = vmatprep.subr.bf16.mxu1 %v11080_v45  ;;  %v11186_v45 = vld [vmem:[%s13068_s2 + $0x274] ss:$24 sps:$4 sm:$0xff]  }
 0x257   :  { %3426 = vmatpush1.bf16.msra.mxu1 %v11086_v0  ;;  %v11176_v0 = vld [vmem:[%s13068_s2 + $0x248] ss:$24 sps:$4 sm:$0xff]  }
 0x258   :  { %3427 = vmatprep.subr.bf16.mxu1 %v11104_v59  ;;  %v11170_v59 = vld [vmem:[%s13068_s2 + $0x244] ss:$24 sps:$4 sm:$0xff]   ;;  %13236 = vst [vmem:[#allocation66_spill] sm:$0xff] %v11176_v0 }
 0x259   :  { %3392 = vmatprep.subr.bf16.mxu0 %v11170_v59 }
 0x25b   :  { %3428 = vmatpush1.bf16.msra.mxu1 %v11110_v3  ;;  %v11152_v3 = vld [vmem:[%s13068_s2 + $0x21c] ss:$24 sps:$4 sm:$0xff]  }
 0x25c   :  { %3429 = vmatprep.subr.bf16.mxu1 %v11128_v17  ;;  %13234 = vst [vmem:[#allocation64_spill] sm:$0xff] %v11152_v3  ;;  %v11165_v17 = vld [vmem:[%s13068_s2 + $0x240] ss:$24 sps:$4 sm:$0xff]  }
 0x25d   :  { %3393 = vmatpush1.bf16.msra.mxu0 %v11165_v17 }
 0x25e   :  { %3394 = vmatprep.subr.bf16.mxu0 %v11186_v45 }
 0x25f   :  { %3430 = vmatpush1.bf16.msra.mxu1 %v11134_v34  ;;  %v11158_v34 = vld [vmem:[%s13068_s2 + $0x218] ss:$24 sps:$4 sm:$0xff]  }
 0x260   :  { %13235 = vst [vmem:[#allocation65_spill] sm:$0xff] %v11158_v34  ;;  %3431 = vmatprep.subr.bf16.mxu1 %v11152_v3  ;;  %v11181_v3 = vld [vmem:[%s13068_s2 + $0x24c] ss:$24 sps:$4 sm:$0xff]  }
 0x261   :  { %13237 = vst [vmem:[#allocation67_spill] sm:$0xff] %v11181_v3  ;;  %3395 = vmatpush1.bf16.msra.mxu0 %v11199_v1 }
 0x263   :  { %3432 = vmatpush1.bf16.msra.mxu1 %v11158_v34  ;;  %v11192_v34 = vld [vmem:[%s13068_s2 + $0x27c] ss:$24 sps:$4 sm:$0xff]  }
 0x264   :  { %13238 = vst [vmem:[#allocation68_spill] sm:$0xff] %v11192_v34  ;;  %3433 = vmatprep.subr.bf16.mxu1 %v11181_v3  ;;  %v11211_v3 = vld [vmem:[%s13068_s2 + $0x2a4] ss:$24 sps:$4 sm:$0xff]  }
 0x265   :  { %3396 = vmatprep.subr.bf16.mxu0 %v11211_v3 }
 0x267   :  { %3434 = vmatpush1.bf16.msra.mxu1 %v11176_v0  ;;  %v11223_v0 = vld [vmem:[%s13068_s2 + $0x2a0] ss:$24 sps:$4 sm:$0xff]  }
 0x268   :  { %3435 = vmatprep.subr.bf16.mxu1 %v11192_v34  ;;  %v11230_v34 = vld [vmem:[%s13068_s2 + $0x2a8] ss:$24 sps:$4 sm:$0xff]   ;;  %3397 = vmatpush1.bf16.msra.mxu0 %v11223_v0 }
 0x269   :  { %13241 = vst [vmem:[#allocation71_spill] sm:$0xff] %v11230_v34  ;;  %3398 = vmatprep.subr.bf16.mxu0 %v11235_v37 }
 0x26b   :  { %3436 = vmatpush1.bf16.msra.mxu1 %v11206_v47  ;;  %v11247_v47 = vld [vmem:[%s13068_s2 + $0x2d0] ss:$24 sps:$4 sm:$0xff]  }
 0x26c   :  { %3437 = vmatprep.subr.bf16.mxu1 %v11217_v60  ;;  %13243 = vst [vmem:[#allocation73_spill] sm:$0xff] %v11247_v47  ;;  %v11254_v60 = vld [vmem:[%s13068_s2 + $0x2d8] ss:$24 sps:$4 sm:$0xff]   ;;  %3399 = vmatpush1.bf16.msra.mxu0 %v11247_v47 }
 0x26d   :  { %13244 = vst [vmem:[#allocation74_spill] sm:$0xff] %v11254_v60  ;;  %3450 = vmatprep.subr.bf16.mxu0 %v10748_v52 }
 0x26f   :  { %3438 = vmatpush1.bf16.msra.mxu1 %v11230_v34 }
 0x270   :  { %3439 = vmatprep.subr.bf16.mxu1 %v11241_v55 }
 0x273   :  { %3440 = vmatpush1.bf16.msra.mxu1 %v11254_v60 }
 0x274   :  { %4119 = vmatprep.subr.bf16.mxu1 %v10883_v44 }
 0x2c9   :  { %v2651_v12 = vpop.f32.mrb[40].mxu1  ;;  %v2692_v57 = vpop.f32.mrb[36].mxu0 }
 0x2ca   :  { %v2746_v34 = vadd.f32 %v2651_v12, %v10650_v58  ;;  %v2653_v62 = vpop.f32.mrb[41].mxu1  ;;  %v2694_v33 = vpop.f32.mrb[37].mxu0 }
 0x2cb   :  { %v2753_v30 = vadd.f32 %v2653_v62, %v10657_v48  ;;  %v2767_v27 = vadd.f32 %v2694_v33, %v10741_v43  ;;  %v2655_v23 = vpop.f32.mrb[42].mxu1  ;;  %v2696_v55 = vpop.f32.mrb[38].mxu0 }
 0x2cc   :  { %v7862_v10 = vmul.f32 -1.442695, %v2746_v34  ;;  %v2656_v50 = vpop.f32.mrb[43].mxu1  ;;  %v2697_v8 = vpop.f32.mrb[39].mxu0 }
 0x2cd   :  { %v7863_v60 = vmul.f32 -1.442695, %v2753_v30  ;;  %v7864_v43 = vmul.f32 -1.442695, %v2767_v27 }
 0x2ce   :  { %9385 = vpow2.f32 %v7862_v10 }
 0x2cf   :  { %9387 = vpow2.f32 %v7863_v60 }
 0x2d8   :  { %v9386_v52 = vpop.eup %9385 }
 0x2d9   :  { %v2750_v44 = vadd.f32 1.0, %v9386_v52  ;;  %v9388_v47 = vpop.eup %9387 }
 0x2da   :  { %v2757_v11 = vadd.f32 1.0, %v9388_v47 }
 0x2db   :  { %9389 = vrcp.f32 %v2750_v44 }
 0x2dc   :  { %9391 = vrcp.f32 %v2757_v11 }
 0x2e5   :  { %v9390_v58 = vpop.eup %9389 }
 0x2e6   :  { %v2760_v12 = vmul.f32 %v9390_v58, %v2692_v57  ;;  %v9392_v23 = vpop.eup %9391 }
 0x2e7   :  { %v2763_v34 = vsub.f32 1.0, %v9392_v23  ;;  %v2765_v10 = vmul.f32 %v9392_v23, %v10781_v54  ;;  %v11890_v54 = vld [vmem:[%s13068_s2 + $0x24c] ss:$24 sps:$4 sm:$0xff]  }
 0x2e8   :  { %v2761_v48 = vadd.f32 %v2760_v12, %v10719_v42 }
 0x2ea   :  { %9393 = vtanh.f32 %v2761_v48 }
 0x2eb   :  { %9395 = vpow2.f32 %v7864_v43 }
 0x2f4   :  { %v9394_v50 = vpop.eup %9393 }
 0x2f5   :  { %v2764_v8 = vmul.f32 %v9394_v50, %v2763_v34  ;;  %v9396_v33 = vpop.eup %9395 }
 0x2f6   :  { %v2771_v62 = vadd.f32 1.0, %v9396_v33  ;;  %v13265_v33 = vld [vmem:[#allocation59_spill] sm:$0xff] }
 0x2f7   :  { %v11266_v30 = vadd.f32 %v2765_v10, %v2764_v8 }
 0x2f8   :  { %9397 = vrcp.f32 %v2771_v62  ;;  %v13266_v62 = vld [vmem:[#allocation60_spill] sm:$0xff] }
 0x2f9   :  { %13245 = vst [vmem:[#allocation75_spill] sm:$0xff] %v11266_v30  ;;  %v11277_v10 = vpack.c.bf16 %v11266_v30, %v11266_v30 }
 0x302   :  { %v9398_v55 = vpop.eup %9397 }
 0x309   :  { %v2733_v47 = vpop.f32.mrb[44].mxu1 }
 0x30a   :  { %v2774_v11 = vadd.f32 %v2733_v47, %v10777_v40  ;;  %v2735_v57 = vpop.f32.mrb[45].mxu1  ;;  %v13267_v47 = vld [vmem:[#allocation61_spill] sm:$0xff] }
 0x30b   :  { %v2781_v42 = vmul.f32 %v9398_v55, %v2735_v57  ;;  %v2737_v60 = vpop.f32.mrb[46].mxu1  ;;  %v13268_v55 = vld [vmem:[#allocation62_spill] sm:$0xff]  ;;  %v13270_v57 = vld [vmem:[#allocation64_spill] sm:$0xff] }
 0x30c   :  { %v7865_v27 = vmul.f32 -1.442695, %v2774_v11  ;;  %v2738_v52 = vpop.f32.mrb[47].mxu1  ;;  %v13269_v11 = vld [vmem:[#allocation63_spill] sm:$0xff] }
 0x30d   :  { %v2782_v44 = vadd.f32 %v2781_v42, %v10779_v6  ;;  %v11298_v6 = vld [vmem:[%s13068_s2 + $0x104] ss:$24 sps:$4 sm:$0xff]   ;;  %v13271_v42 = vld [vmem:[#allocation65_spill] sm:$0xff] }
 0x30e   :  { %9399 = vpow2.f32 %v7865_v27  ;;  %v13272_v60 = vld [vmem:[#allocation67_spill] sm:$0xff]  ;;  %v13273_v27 = vld [vmem:[#allocation66_spill] sm:$0xff]  ;;  %v13274_v52 = vld [vmem:[#allocation68_spill] sm:$0xff] }
 0x30f   :  { %13312 = vst [vmem:[#allocation66_spill] sm:$0xff] %v11890_v54 }
 0x318   :  { %v9400_v58 = vpop.eup %9399 }
 0x319   :  { %v2778_v12 = vadd.f32 1.0, %v9400_v58  ;;  %v13276_v58 = vld [vmem:[#allocation70_spill] sm:$0xff] }
 0x31b   :  { %9401 = vrcp.f32 %v2778_v12  ;;  %v13277_v12 = vld [vmem:[#allocation71_spill] sm:$0xff] }
 0x31c   :  { %9403 = vtanh.f32 %v2782_v44  ;;  %v13275_v44 = vld [vmem:[#allocation69_spill] sm:$0xff] }
 0x325   :  { %v9402_v48 = vpop.eup %9401 }
 0x326   :  { %v2784_v43 = vsub.f32 1.0, %v9402_v48  ;;  %v9404_v23 = vpop.eup %9403  ;;  %v2786_v50 = vmul.f32 %v9402_v48, %v10783_v51  ;;  %v13278_v48 = vld [vmem:[#allocation72_spill] sm:$0xff] }
 0x327   :  { %v11874_v51 = vld [vmem:[%s13068_s2 + $0x240] ss:$24 sps:$4 sm:$0xff]  }
 0x328   :  { %v2785_v34 = vmul.f32 %v9404_v23, %v2784_v43  ;;  %v13279_v43 = vld [vmem:[#allocation74_spill] sm:$0xff] }
 0x329   :  { %v11489_v23 = vld [vmem:[%s13068_s2 + $0x14] ss:$24 sps:$4 sm:$0xff]  }
 0x32a   :  { %v11271_v8 = vadd.f32 %v2786_v50, %v2785_v34 }
 0x32c   :  { %13246 = vst [vmem:[#allocation76_spill] sm:$0xff] %v11271_v8  ;;  %v2791_v40 = vpack.c.bf16 %v11271_v8, %v11271_v8 }
 0x32e   :  { %3400 = vmatprep.mubr.bf16.mxu0 %v2791_v40  ;;  %3441 = vmatprep.mubr.bf16.mxu1 %v2791_v40 }
 0x32f   :  { %3401 = vmatmul.mubr.bf16.vlgmr.msra.gmra.mrb[40].mxu0 %v11277_v10  ;;  %3442 = vmatmul.mubr.bf16.vlgmr.msra.gmra.mrb[48].mxu1 %v11277_v10 }
 0x330   :  { %3451 = vmatpush1.bf16.msra.mxu0 %v10790_v5  ;;  %3482 = vmatprep.mubr.bf16.mxu0 %v2791_v40  ;;  %v11306_v5 = vld [vmem:[%s13068_s2 + $0x100] ss:$24 sps:$4 sm:$0xff]  }
 0x331   :  { %3452 = vmatprep.subr.bf16.mxu0 %v10797_v46  ;;  %4120 = vmatpush1.bf16.msra.mxu1 %v10878_v4  ;;  %v11312_v46 = vld [vmem:[%s13068_s2 + $0x134] ss:$24 sps:$4 sm:$0xff]   ;;  %v13280_v40 = vld [vmem:[#allocation4_spill] sm:$0xff] }
 0x332   :  { %4121 = vmatprep.subr.bf16.mxu1 %v10898_v13  ;;  %v11368_v4 = vld [vmem:[%s13068_s2 + $0x1f4] ss:$24 sps:$4 sm:$0xff]   ;;  %v11382_v13 = vld [vmem:[%s13068_s2 + $0x224] ss:$24 sps:$4 sm:$0xff]  }
 0x334   :  { %3453 = vmatpush1.bf16.msra.mxu0 %v10803_v19  ;;  %v11320_v19 = vld [vmem:[%s13068_s2 + $0x130] ss:$24 sps:$4 sm:$0xff]  }
 0x335   :  { %3454 = vmatprep.subr.bf16.mxu0 %v10809_v49  ;;  %4122 = vmatpush1.bf16.msra.mxu1 %v10911_v18  ;;  %v11326_v49 = vld [vmem:[%s13068_s2 + $0x164] ss:$24 sps:$4 sm:$0xff]  }
 0x336   :  { %4123 = vmatprep.subr.bf16.mxu1 %v10923_v16  ;;  %v13250_v18 = vld [vmem:[#allocation44_spill] sm:$0xff]  ;;  %v13251_v16 = vld [vmem:[#allocation45_spill] sm:$0xff] }
 0x338   :  { %3455 = vmatpush1.bf16.msra.mxu0 %v10815_v32  ;;  %v11334_v32 = vld [vmem:[%s13068_s2 + $0x160] ss:$24 sps:$4 sm:$0xff]  }
 0x339   :  { %3456 = vmatprep.subr.bf16.mxu0 %v10821_v28  ;;  %4124 = vmatpush1.bf16.msra.mxu1 %v10935_v24  ;;  %v11340_v28 = vld [vmem:[%s13068_s2 + $0x194] ss:$24 sps:$4 sm:$0xff]  }
 0x33a   :  { %4125 = vmatprep.subr.bf16.mxu1 %v10947_v26  ;;  %v13252_v24 = vld [vmem:[#allocation46_spill] sm:$0xff]  ;;  %v13253_v26 = vld [vmem:[#allocation47_spill] sm:$0xff] }
 0x33c   :  { %3457 = vmatpush1.bf16.msra.mxu0 %v10827_v25  ;;  %v11348_v25 = vld [vmem:[%s13068_s2 + $0x190] ss:$24 sps:$4 sm:$0xff]  }
 0x33d   :  { %3458 = vmatprep.subr.bf16.mxu0 %v10833_v35  ;;  %4126 = vmatpush1.bf16.msra.mxu1 %v10959_v31  ;;  %v11354_v35 = vld [vmem:[%s13068_s2 + $0x1c4] ss:$24 sps:$4 sm:$0xff]   ;;  %v13255_v31 = vld [vmem:[#allocation49_spill] sm:$0xff] }
 0x33e   :  { %4127 = vmatprep.subr.bf16.mxu1 %v10971_v36  ;;  %v13256_v36 = vld [vmem:[#allocation50_spill] sm:$0xff] }
 0x340   :  { %3459 = vmatpush1.bf16.msra.mxu0 %v10839_v2  ;;  %v11362_v2 = vld [vmem:[%s13068_s2 + $0x1c0] ss:$24 sps:$4 sm:$0xff]  }
 0x341   :  { %3460 = vmatprep.subr.bf16.mxu0 %v11298_v6  ;;  %4128 = vmatpush1.bf16.msra.mxu1 %v10983_v29  ;;  %v13257_v29 = vld [vmem:[#allocation51_spill] sm:$0xff] }
 0x342   :  { %4129 = vmatprep.subr.bf16.mxu1 %v10995_v9  ;;  %v13258_v9 = vld [vmem:[#allocation52_spill] sm:$0xff] }
 0x344   :  { %3461 = vmatpush1.bf16.msra.mxu0 %v11306_v5 }
 0x345   :  { %3462 = vmatprep.subr.bf16.mxu0 %v11312_v46  ;;  %4130 = vmatpush1.bf16.msra.mxu1 %v11007_v53  ;;  %v13259_v53 = vld [vmem:[#allocation53_spill] sm:$0xff] }
 0x346   :  { %4131 = vmatprep.subr.bf16.mxu1 %v11019_v38  ;;  %v13260_v38 = vld [vmem:[#allocation54_spill] sm:$0xff] }
 0x348   :  { %3463 = vmatpush1.bf16.msra.mxu0 %v11320_v19 }
 0x349   :  { %3464 = vmatprep.subr.bf16.mxu0 %v11326_v49  ;;  %4132 = vmatpush1.bf16.msra.mxu1 %v11031_v22  ;;  %v13262_v22 = vld [vmem:[#allocation56_spill] sm:$0xff] }
 0x34a   :  { %4133 = vmatprep.subr.bf16.mxu1 %v11046_v39  ;;  %v13263_v39 = vld [vmem:[#allocation57_spill] sm:$0xff] }
 0x34c   :  { %3465 = vmatpush1.bf16.msra.mxu0 %v11334_v32 }
 0x34d   :  { %3466 = vmatprep.subr.bf16.mxu0 %v11340_v28  ;;  %4134 = vmatpush1.bf16.msra.mxu1 %v11051_v7  ;;  %v13264_v7 = vld [vmem:[#allocation58_spill] sm:$0xff] }
 0x34e   :  { %4135 = vmatprep.subr.bf16.mxu1 %v11070_v14  ;;  %v11376_v14 = vld [vmem:[%s13068_s2 + $0x1f0] ss:$24 sps:$4 sm:$0xff]  }
 0x350   :  { %3467 = vmatpush1.bf16.msra.mxu0 %v11348_v25 }
 0x351   :  { %3468 = vmatprep.subr.bf16.mxu0 %v11354_v35  ;;  %4136 = vmatpush1.bf16.msra.mxu1 %v11075_v61  ;;  %v11390_v61 = vld [vmem:[%s13068_s2 + $0x220] ss:$24 sps:$4 sm:$0xff]  }
 0x352   :  { %4137 = vmatprep.subr.bf16.mxu1 %v11094_v20  ;;  %v11396_v20 = vld [vmem:[%s13068_s2 + $0x254] ss:$24 sps:$4 sm:$0xff]  }
 0x354   :  { %3469 = vmatpush1.bf16.msra.mxu0 %v11362_v2 }
 0x355   :  { %3470 = vmatprep.subr.bf16.mxu0 %v11368_v4  ;;  %4138 = vmatpush1.bf16.msra.mxu1 %v11099_v56  ;;  %v11410_v56 = vld [vmem:[%s13068_s2 + $0x284] ss:$24 sps:$4 sm:$0xff]  }
 0x356   :  { %4139 = vmatprep.subr.bf16.mxu1 %v11118_v21  ;;  %v11404_v21 = vld [vmem:[%s13068_s2 + $0x250] ss:$24 sps:$4 sm:$0xff]  }
 0x358   :  { %3471 = vmatpush1.bf16.msra.mxu0 %v11376_v14 }
 0x359   :  { %3472 = vmatprep.subr.bf16.mxu0 %v11382_v13  ;;  %4140 = vmatpush1.bf16.msra.mxu1 %v11123_v15  ;;  %v11424_v15 = vld [vmem:[%s13068_s2 + $0x2b4] ss:$24 sps:$4 sm:$0xff]  }
 0x35a   :  { %4141 = vmatprep.subr.bf16.mxu1 %v11142_v63  ;;  %v11418_v63 = vld [vmem:[%s13068_s2 + $0x280] ss:$24 sps:$4 sm:$0xff]  }
 0x35c   :  { %3473 = vmatpush1.bf16.msra.mxu0 %v11390_v61 }
 0x35d   :  { %3474 = vmatprep.subr.bf16.mxu0 %v11396_v20  ;;  %4142 = vmatpush1.bf16.msra.mxu1 %v11147_v41  ;;  %v11432_v41 = vld [vmem:[%s13068_s2 + $0x2b0] ss:$24 sps:$4 sm:$0xff]  }
 0x35e   :  { %4143 = vmatprep.subr.bf16.mxu1 %v11170_v59  ;;  %v11438_v59 = vld [vmem:[%s13068_s2 + $0x2e4] ss:$24 sps:$4 sm:$0xff]  }
 0x360   :  { %3475 = vmatpush1.bf16.msra.mxu0 %v11404_v21 }
 0x361   :  { %3476 = vmatprep.subr.bf16.mxu0 %v11410_v56  ;;  %4144 = vmatpush1.bf16.msra.mxu1 %v11165_v17  ;;  %v11446_v17 = vld [vmem:[%s13068_s2 + $0x2e0] ss:$24 sps:$4 sm:$0xff]  }
 0x362   :  { %4145 = vmatprep.subr.bf16.mxu1 %v11186_v45  ;;  %v13247_v45 = vld [vmem:[#allocation43_spill] sm:$0xff] }
 0x364   :  { %3477 = vmatpush1.bf16.msra.mxu0 %v11418_v63 }
 0x365   :  { %3478 = vmatprep.subr.bf16.mxu0 %v11424_v15  ;;  %4146 = vmatpush1.bf16.msra.mxu1 %v11199_v1  ;;  %v13248_v1 = vld [vmem:[#allocation73_spill] sm:$0xff] }
 0x366   :  { %4147 = vmatprep.subr.bf16.mxu1 %v11211_v3  ;;  %v13249_v3 = vld [vmem:[#allocation42_spill] sm:$0xff] }
 0x368   :  { %3479 = vmatpush1.bf16.msra.mxu0 %v11432_v41 }
 0x369   :  { %3480 = vmatprep.subr.bf16.mxu0 %v11438_v59  ;;  %4148 = vmatpush1.bf16.msra.mxu1 %v11223_v0  ;;  %v13254_v0 = vld [vmem:[#allocation48_spill] sm:$0xff] }
 0x36a   :  { %4149 = vmatprep.subr.bf16.mxu1 %v11235_v37  ;;  %v13261_v37 = vld [vmem:[#allocation55_spill] sm:$0xff] }
 0x36c   :  { %3481 = vmatpush1.bf16.msra.mxu0 %v11446_v17 }
 0x36d   :  { %4160 = vmatprep.subr.bf16.mxu0 %v13247_v45  ;;  %4150 = vmatpush1.bf16.msra.mxu1 %v13248_v1 }
 0x36e   :  { %4201 = vmatprep.subr.bf16.mxu1 %v11489_v23 }
 0x36f   :  { %3483 = vmatmul.mubr.bf16.vlgmr.msra.gmra.mrb[44].mxu0 %v11277_v10 }
 0x370   :  { %4161 = vmatpush1.bf16.msra.mxu0 %v13249_v3  ;;  %v13281_v3 = vld [vmem:[#allocation5_spill] sm:$0xff] }
 0x371   :  { %4162 = vmatprep.subr.bf16.mxu0 %v13250_v18 }
 0x374   :  { %4163 = vmatpush1.bf16.msra.mxu0 %v13251_v16  ;;  %v13282_v16 = vld [vmem:[#allocation25_spill] sm:$0xff] }
 0x375   :  { %4164 = vmatprep.subr.bf16.mxu0 %v13252_v24 }
 0x378   :  { %4165 = vmatpush1.bf16.msra.mxu0 %v13253_v26 }
 0x379   :  { %4166 = vmatprep.subr.bf16.mxu0 %v13254_v0 }
 0x37c   :  { %4167 = vmatpush1.bf16.msra.mxu0 %v13255_v31 }
 0x37d   :  { %4168 = vmatprep.subr.bf16.mxu0 %v13256_v36 }
 0x380   :  { %4169 = vmatpush1.bf16.msra.mxu0 %v13257_v29 }
 0x381   :  { %4170 = vmatprep.subr.bf16.mxu0 %v13258_v9 }
 0x384   :  { %4171 = vmatpush1.bf16.msra.mxu0 %v13259_v53 }
 0x385   :  { %4172 = vmatprep.subr.bf16.mxu0 %v13260_v38 }
 0x388   :  { %4173 = vmatpush1.bf16.msra.mxu0 %v13261_v37 }
 0x389   :  { %4174 = vmatprep.subr.bf16.mxu0 %v13262_v22 }
 0x38c   :  { %4175 = vmatpush1.bf16.msra.mxu0 %v13263_v39 }
 0x38d   :  { %4176 = vmatprep.subr.bf16.mxu0 %v13264_v7 }
 0x390   :  { %4177 = vmatpush1.bf16.msra.mxu0 %v13265_v33  ;;  %v13283_v33 = vld [vmem:[#allocation18_spill] sm:$0xff] }
 0x391   :  { %4178 = vmatprep.subr.bf16.mxu0 %v13266_v62 }
 0x394   :  { %4179 = vmatpush1.bf16.msra.mxu0 %v13267_v47 }
 0x395   :  { %4180 = vmatprep.subr.bf16.mxu0 %v13268_v55 }
 0x398   :  { %4181 = vmatpush1.bf16.msra.mxu0 %v13269_v11 }
 0x399   :  { %4182 = vmatprep.subr.bf16.mxu0 %v13270_v57 }
 0x39c   :  { %4183 = vmatpush1.bf16.msra.mxu0 %v13271_v42 }
 0x39d   :  { %4184 = vmatprep.subr.bf16.mxu0 %v13272_v60 }
 0x3a0   :  { %4185 = vmatpush1.bf16.msra.mxu0 %v13273_v27 }
 0x3a1   :  { %4186 = vmatprep.subr.bf16.mxu0 %v13274_v52 }
 0x3a4   :  { %4187 = vmatpush1.bf16.msra.mxu0 %v13275_v44 }
 0x3a5   :  { %4188 = vmatprep.subr.bf16.mxu0 %v13276_v58 }
 0x3a8   :  { %4189 = vmatpush1.bf16.msra.mxu0 %v13277_v12 }
 0x3a9   :  { %4190 = vmatprep.subr.bf16.mxu0 %v13278_v48  ;;  %v13285_v48 = vld [vmem:[#allocation38_spill] sm:$0xff] }
 0x3ac   :  { %4191 = vmatpush1.bf16.msra.mxu0 %v13279_v43 }
 0x402   :  { %v3402_v34 = vpop.f32.mrb[40].mxu0  ;;  %v3443_v50 = vpop.f32.mrb[48].mxu1 }
 0x403   :  { %v3497_v10 = vadd.f32 %v3402_v34, %v13280_v40  ;;  %v3404_v45 = vpop.f32.mrb[41].mxu0  ;;  %v3445_v1 = vpop.f32.mrb[49].mxu1 }
 0x404   :  { %v3504_v18 = vadd.f32 %v3404_v45, %v13281_v3  ;;  %v3518_v24 = vadd.f32 %v3445_v1, %v13282_v16  ;;  %v3406_v26 = vpop.f32.mrb[42].mxu0  ;;  %v3447_v0 = vpop.f32.mrb[50].mxu1  ;;  %v13286_v1 = vld [vmem:[#allocation39_spill] sm:$0xff] }
 0x405   :  { %v7962_v31 = vmul.f32 -1.442695, %v3497_v10  ;;  %v3407_v36 = vpop.f32.mrb[43].mxu0  ;;  %v3448_v29 = vpop.f32.mrb[51].mxu1 }
 0x406   :  { %v7963_v9 = vmul.f32 -1.442695, %v3504_v18  ;;  %v7964_v47 = vmul.f32 -1.442695, %v3518_v24 }
 0x407   :  { %9405 = vpow2.f32 %v7962_v31 }
 0x408   :  { %9407 = vpow2.f32 %v7963_v9 }
 0x411   :  { %v9406_v53 = vpop.eup %9405 }
 0x412   :  { %v3501_v38 = vadd.f32 1.0, %v9406_v53  ;;  %v9408_v37 = vpop.eup %9407  ;;  %v11509_v53 = vld [vmem:[%s13068_s2 + $0x10] ss:$24 sps:$4 sm:$0xff]  }
 0x413   :  { %v3508_v22 = vadd.f32 1.0, %v9408_v37  ;;  %v11516_v37 = vld [vmem:[%s13068_s2 + $0x44] ss:$24 sps:$4 sm:$0xff]  }
 0x414   :  { %9409 = vrcp.f32 %v3501_v38 }
 0x415   :  { %9411 = vrcp.f32 %v3508_v22  ;;  %v11522_v22 = vld [vmem:[%s13068_s2 + $0x40] ss:$24 sps:$4 sm:$0xff]  }
 0x41e   :  { %v9410_v39 = vpop.eup %9409 }
 0x41f   :  { %v3511_v7 = vmul.f32 %v9410_v39, %v3443_v50  ;;  %v9412_v55 = vpop.eup %9411  ;;  %v11528_v39 = vld [vmem:[%s13068_s2 + $0x74] ss:$24 sps:$4 sm:$0xff]  }
 0x420   :  { %v3514_v11 = vsub.f32 1.0, %v9412_v55  ;;  %v3516_v60 = vmul.f32 %v9412_v55, %v11266_v30  ;;  %v11558_v55 = vld [vmem:[%s13068_s2 + $0xd0] ss:$24 sps:$4 sm:$0xff]  }
 0x421   :  { %v3512_v62 = vadd.f32 %v3511_v7, %v13283_v33  ;;  %v11534_v7 = vld [vmem:[%s13068_s2 + $0x70] ss:$24 sps:$4 sm:$0xff]   ;;  %v11540_v33 = vld [vmem:[%s13068_s2 + $0xa4] ss:$24 sps:$4 sm:$0xff]  }
 0x422   :  { %v11885_v30 = vld [vmem:[%s13068_s2 + $0x248] ss:$24 sps:$4 sm:$0xff]  }
 0x423   :  { %9413 = vtanh.f32 %v3512_v62  ;;  %v11546_v62 = vld [vmem:[%s13068_s2 + $0xa0] ss:$24 sps:$4 sm:$0xff]   ;;  %13311 = vst [vmem:[#allocation67_spill] sm:$0xff] %v11885_v30 }
 0x424   :  { %9415 = vpow2.f32 %v7964_v47  ;;  %v11552_v47 = vld [vmem:[%s13068_s2 + $0xd4] ss:$24 sps:$4 sm:$0xff]  }
 0x42d   :  { %v9414_v57 = vpop.eup %9413 }
 0x42e   :  { %v3515_v42 = vmul.f32 %v9414_v57, %v3514_v11  ;;  %v9416_v52 = vpop.eup %9415  ;;  %v11716_v11 = vld [vmem:[%s13068_s2 + $0xf0] ss:$24 sps:$4 sm:$0xff]  }
 0x42f   :  { %v3522_v44 = vadd.f32 1.0, %v9416_v52  ;;  %v11723_v57 = vld [vmem:[%s13068_s2 + $0xf8] ss:$24 sps:$4 sm:$0xff]  }
 0x430   :  { %v11497_v27 = vadd.f32 %v3516_v60, %v3515_v42  ;;  %13298 = vst [vmem:[#allocation53_spill] sm:$0xff] %v11723_v57  ;;  %v11728_v42 = vld [vmem:[%s13068_s2 + $0x124] ss:$24 sps:$4 sm:$0xff]   ;;  %v11740_v52 = vld [vmem:[%s13068_s2 + $0x120] ss:$24 sps:$4 sm:$0xff]  }
 0x431   :  { %9417 = vrcp.f32 %v3522_v44  ;;  %v11734_v60 = vld [vmem:[%s13068_s2 + $0x12c] ss:$24 sps:$4 sm:$0xff]   ;;  %v11747_v44 = vld [vmem:[%s13068_s2 + $0x128] ss:$24 sps:$4 sm:$0xff]  }
 0x432   :  { %13284 = vst [vmem:[#allocation43_spill] sm:$0xff] %v11497_v27  ;;  %v3541_v38 = vpack.c.bf16 %v11497_v27, %v11497_v27  ;;  %13299 = vst [vmem:[#allocation54_spill] sm:$0xff] %v11734_v60 }
 0x433   :  { %13300 = vst [vmem:[#allocation55_spill] sm:$0xff] %v11747_v44 }
 0x43b   :  { %v9418_v12 = vpop.eup %9417 }
 0x442   :  { %v3484_v58 = vpop.f32.mrb[44].mxu0 }
 0x443   :  { %v3525_v43 = vadd.f32 %v3484_v58, %v13285_v48  ;;  %v3486_v34 = vpop.f32.mrb[45].mxu0  ;;  %v11755_v58 = vld [vmem:[%s13068_s2 + $0x154] ss:$24 sps:$4 sm:$0xff]  }
 0x444   :  { %v3532_v50 = vmul.f32 %v9418_v12, %v3486_v34  ;;  %v3488_v40 = vpop.f32.mrb[46].mxu0  ;;  %v11760_v12 = vld [vmem:[%s13068_s2 + $0x150] ss:$24 sps:$4 sm:$0xff]   ;;  %v11765_v48 = vld [vmem:[%s13068_s2 + $0x15c] ss:$24 sps:$4 sm:$0xff]  }
 0x445   :  { %v7965_v10 = vmul.f32 -1.442695, %v3525_v43  ;;  %v3489_v45 = vpop.f32.mrb[47].mxu0  ;;  %13301 = vst [vmem:[#allocation56_spill] sm:$0xff] %v11765_v48  ;;  %v11771_v43 = vld [vmem:[%s13068_s2 + $0x158] ss:$24 sps:$4 sm:$0xff]  }
 0x446   :  { %v3533_v3 = vadd.f32 %v3532_v50, %v13286_v1  ;;  %13302 = vst [vmem:[#allocation57_spill] sm:$0xff] %v11771_v43  ;;  %v11779_v34 = vld [vmem:[%s13068_s2 + $0x184] ss:$24 sps:$4 sm:$0xff]   ;;  %v11784_v50 = vld [vmem:[%s13068_s2 + $0x180] ss:$24 sps:$4 sm:$0xff]  }
 0x447   :  { %9419 = vpow2.f32 %v7965_v10  ;;  %v11789_v40 = vld [vmem:[%s13068_s2 + $0x18c] ss:$24 sps:$4 sm:$0xff]   ;;  %v11795_v10 = vld [vmem:[%s13068_s2 + $0x188] ss:$24 sps:$4 sm:$0xff]  }
 0x448   :  { %13303 = vst [vmem:[#allocation58_spill] sm:$0xff] %v11789_v40  ;;  %13304 = vst [vmem:[#allocation59_spill] sm:$0xff] %v11795_v10  ;;  %v11803_v45 = vld [vmem:[%s13068_s2 + $0x1b4] ss:$24 sps:$4 sm:$0xff]   ;;  %v11808_v1 = vld [vmem:[%s13068_s2 + $0x1b0] ss:$24 sps:$4 sm:$0xff]  }
 0x451   :  { %v9420_v18 = vpop.eup %9419 }
 0x452   :  { %v3529_v16 = vadd.f32 1.0, %v9420_v18  ;;  %v11819_v18 = vld [vmem:[%s13068_s2 + $0x1b8] ss:$24 sps:$4 sm:$0xff]  }
 0x453   :  { %13306 = vst [vmem:[#allocation61_spill] sm:$0xff] %v11819_v18 }
 0x454   :  { %9421 = vrcp.f32 %v3529_v16  ;;  %v11827_v16 = vld [vmem:[%s13068_s2 + $0x1e4] ss:$24 sps:$4 sm:$0xff]  }
 0x455   :  { %9423 = vtanh.f32 %v3533_v3  ;;  %v11813_v3 = vld [vmem:[%s13068_s2 + $0x1bc] ss:$24 sps:$4 sm:$0xff]  }
 0x456   :  { %13305 = vst [vmem:[#allocation60_spill] sm:$0xff] %v11813_v3 }
 0x45e   :  { %v9422_v24 = vpop.eup %9421 }
 0x45f   :  { %v3535_v26 = vsub.f32 1.0, %v9422_v24  ;;  %v9424_v0 = vpop.eup %9423  ;;  %v3537_v36 = vmul.f32 %v9422_v24, %v11271_v8  ;;  %v11832_v24 = vld [vmem:[%s13068_s2 + $0x1e0] ss:$24 sps:$4 sm:$0xff]   ;;  %v11879_v8 = vld [vmem:[%s13068_s2 + $0x244] ss:$24 sps:$4 sm:$0xff]  }
 0x461   :  { %v3536_v31 = vmul.f32 %v9424_v0, %v3535_v26  ;;  %v11837_v26 = vld [vmem:[%s13068_s2 + $0x1ec] ss:$24 sps:$4 sm:$0xff]   ;;  %v11843_v0 = vld [vmem:[%s13068_s2 + $0x1e8] ss:$24 sps:$4 sm:$0xff]  }
 0x462   :  { %13307 = vst [vmem:[#allocation62_spill] sm:$0xff] %v11837_v26  ;;  %13308 = vst [vmem:[#allocation63_spill] sm:$0xff] %v11843_v0 }
 0x463   :  { %v11502_v29 = vadd.f32 %v3537_v36, %v3536_v31  ;;  %v11851_v31 = vld [vmem:[%s13068_s2 + $0x214] ss:$24 sps:$4 sm:$0xff]   ;;  %v11856_v36 = vld [vmem:[%s13068_s2 + $0x210] ss:$24 sps:$4 sm:$0xff]  }
 0x465   :  { %13287 = vst [vmem:[#allocation73_spill] sm:$0xff] %v11502_v29  ;;  %v3542_v9 = vpack.c.bf16 %v11502_v29, %v11502_v29 }
 0x467   :  { %4151 = vmatprep.mubr.bf16.mxu1 %v3542_v9  ;;  %4192 = vmatprep.mubr.bf16.mxu0 %v3542_v9 }
 0x468   :  { %4152 = vmatmul.mubr.bf16.vlgmr.msra.gmra.mrb[52].mxu1 %v3541_v38  ;;  %4193 = vmatmul.mubr.bf16.vlgmr.msra.gmra.mrb[48].mxu0 %v3541_v38 }
 0x469   :  { %4202 = vmatpush1.bf16.msra.mxu1 %v11509_v53  ;;  %4233 = vmatprep.mubr.bf16.mxu1 %v3542_v9  ;;  %v11861_v9 = vld [vmem:[%s13068_s2 + $0x21c] ss:$24 sps:$4 sm:$0xff]  }
 0x46a   :  { %4203 = vmatprep.subr.bf16.mxu1 %v11516_v37  ;;  %13309 = vst [vmem:[#allocation64_spill] sm:$0xff] %v11861_v9 }
 0x46d   :  { %4204 = vmatpush1.bf16.msra.mxu1 %v11522_v22 }
 0x46e   :  { %4205 = vmatprep.subr.bf16.mxu1 %v11528_v39 }
 0x471   :  { %4206 = vmatpush1.bf16.msra.mxu1 %v11534_v7 }
 0x472   :  { %4207 = vmatprep.subr.bf16.mxu1 %v11540_v33 }
 0x475   :  { %4208 = vmatpush1.bf16.msra.mxu1 %v11546_v62 }
 0x476   :  { %4209 = vmatprep.subr.bf16.mxu1 %v11552_v47 }
 0x479   :  { %4210 = vmatpush1.bf16.msra.mxu1 %v11558_v55 }
 0x47a   :  { %4211 = vmatprep.subr.bf16.mxu1 %v11298_v6  ;;  %v11587_v6 = vld [vmem:[%s13068_s2] ss:$24 sps:$4 sm:$0xff]  }
 0x47d   :  { %4212 = vmatpush1.bf16.msra.mxu1 %v11306_v5  ;;  %v11592_v5 = vld [vmem:[%s13068_s2 + $0x4] ss:$24 sps:$4 sm:$0xff]  }
 0x47e   :  { %4213 = vmatprep.subr.bf16.mxu1 %v11312_v46  ;;  %v11597_v46 = vld [vmem:[%s13068_s2 + $0x8] ss:$24 sps:$4 sm:$0xff]   ;;  %4870 = vmatprep.subr.bf16.mxu0 %v11592_v5 }
 0x47f   :  { %13288 = vst [vmem:[#allocation42_spill] sm:$0xff] %v11597_v46  ;;  %4871 = vmatpush1.bf16.msra.mxu0 %v11587_v6 }
 0x481   :  { %4214 = vmatpush1.bf16.msra.mxu1 %v11320_v19  ;;  %v11602_v19 = vld [vmem:[%s13068_s2 + $0xc] ss:$24 sps:$4 sm:$0xff]  }
 0x482   :  { %4215 = vmatprep.subr.bf16.mxu1 %v11326_v49  ;;  %v11607_v49 = vld [vmem:[%s13068_s2 + $0x34] ss:$24 sps:$4 sm:$0xff]  }
 0x483   :  { %4872 = vmatprep.subr.bf16.mxu0 %v11607_v49 }
 0x485   :  { %4216 = vmatpush1.bf16.msra.mxu1 %v11334_v32  ;;  %v11613_v32 = vld [vmem:[%s13068_s2 + $0x3c] ss:$24 sps:$4 sm:$0xff]  }
 0x486   :  { %4217 = vmatprep.subr.bf16.mxu1 %v11340_v28  ;;  %13289 = vst [vmem:[#allocation44_spill] sm:$0xff] %v11613_v32  ;;  %v11620_v28 = vld [vmem:[%s13068_s2 + $0x30] ss:$24 sps:$4 sm:$0xff]  }
 0x487   :  { %4873 = vmatpush1.bf16.msra.mxu0 %v11620_v28 }
 0x489   :  { %4218 = vmatpush1.bf16.msra.mxu1 %v11348_v25  ;;  %v11627_v25 = vld [vmem:[%s13068_s2 + $0x38] ss:$24 sps:$4 sm:$0xff]  }
 0x48a   :  { %4219 = vmatprep.subr.bf16.mxu1 %v11354_v35  ;;  %13290 = vst [vmem:[#allocation45_spill] sm:$0xff] %v11627_v25  ;;  %v11632_v35 = vld [vmem:[%s13068_s2 + $0x64] ss:$24 sps:$4 sm:$0xff]  }
 0x48b   :  { %4874 = vmatprep.subr.bf16.mxu0 %v11632_v35 }
 0x48d   :  { %4220 = vmatpush1.bf16.msra.mxu1 %v11362_v2  ;;  %v11638_v2 = vld [vmem:[%s13068_s2 + $0x6c] ss:$24 sps:$4 sm:$0xff]  }
 0x48e   :  { %4221 = vmatprep.subr.bf16.mxu1 %v11368_v4  ;;  %13291 = vst [vmem:[#allocation46_spill] sm:$0xff] %v11638_v2  ;;  %v11644_v4 = vld [vmem:[%s13068_s2 + $0x60] ss:$24 sps:$4 sm:$0xff]  }
 0x48f   :  { %4875 = vmatpush1.bf16.msra.mxu0 %v11644_v4 }
 0x491   :  { %4222 = vmatpush1.bf16.msra.mxu1 %v11376_v14  ;;  %v11651_v14 = vld [vmem:[%s13068_s2 + $0x68] ss:$24 sps:$4 sm:$0xff]  }
 0x492   :  { %4223 = vmatprep.subr.bf16.mxu1 %v11382_v13  ;;  %13292 = vst [vmem:[#allocation47_spill] sm:$0xff] %v11651_v14  ;;  %v11656_v13 = vld [vmem:[%s13068_s2 + $0x94] ss:$24 sps:$4 sm:$0xff]  }
 0x493   :  { %4876 = vmatprep.subr.bf16.mxu0 %v11656_v13 }
 0x495   :  { %4224 = vmatpush1.bf16.msra.mxu1 %v11390_v61  ;;  %v11662_v61 = vld [vmem:[%s13068_s2 + $0x9c] ss:$24 sps:$4 sm:$0xff]  }
 0x496   :  { %4225 = vmatprep.subr.bf16.mxu1 %v11396_v20  ;;  %13293 = vst [vmem:[#allocation48_spill] sm:$0xff] %v11662_v61  ;;  %v11668_v20 = vld [vmem:[%s13068_s2 + $0x90] ss:$24 sps:$4 sm:$0xff]  }
 0x497   :  { %4877 = vmatpush1.bf16.msra.mxu0 %v11668_v20 }
 0x499   :  { %4226 = vmatpush1.bf16.msra.mxu1 %v11404_v21  ;;  %v11675_v21 = vld [vmem:[%s13068_s2 + $0x98] ss:$24 sps:$4 sm:$0xff]  }
 0x49a   :  { %4227 = vmatprep.subr.bf16.mxu1 %v11410_v56  ;;  %13294 = vst [vmem:[#allocation49_spill] sm:$0xff] %v11675_v21  ;;  %v11680_v56 = vld [vmem:[%s13068_s2 + $0xc4] ss:$24 sps:$4 sm:$0xff]  }
 0x49b   :  { %4878 = vmatprep.subr.bf16.mxu0 %v11680_v56 }
 0x49d   :  { %4228 = vmatpush1.bf16.msra.mxu1 %v11418_v63  ;;  %v11686_v63 = vld [vmem:[%s13068_s2 + $0xcc] ss:$24 sps:$4 sm:$0xff]  }
 0x49e   :  { %4229 = vmatprep.subr.bf16.mxu1 %v11424_v15  ;;  %13295 = vst [vmem:[#allocation50_spill] sm:$0xff] %v11686_v63  ;;  %v11692_v15 = vld [vmem:[%s13068_s2 + $0xc0] ss:$24 sps:$4 sm:$0xff]  }
 0x49f   :  { %4879 = vmatpush1.bf16.msra.mxu0 %v11692_v15 }
 0x4a1   :  { %4230 = vmatpush1.bf16.msra.mxu1 %v11432_v41  ;;  %v11699_v41 = vld [vmem:[%s13068_s2 + $0xc8] ss:$24 sps:$4 sm:$0xff]  }
 0x4a2   :  { %4231 = vmatprep.subr.bf16.mxu1 %v11438_v59  ;;  %13296 = vst [vmem:[#allocation51_spill] sm:$0xff] %v11699_v41  ;;  %v11704_v59 = vld [vmem:[%s13068_s2 + $0xf4] ss:$24 sps:$4 sm:$0xff]  }
 0x4a3   :  { %4880 = vmatprep.subr.bf16.mxu0 %v11704_v59 }
 0x4a4   :  { %4881 = vmatpush1.bf16.msra.mxu0 %v11716_v11 }
 0x4a5   :  { %4232 = vmatpush1.bf16.msra.mxu1 %v11446_v17  ;;  %v11710_v17 = vld [vmem:[%s13068_s2 + $0xfc] ss:$24 sps:$4 sm:$0xff]   ;;  %4882 = vmatprep.subr.bf16.mxu0 %v11728_v42 }
 0x4a6   :  { %4911 = vmatprep.subr.bf16.mxu1 %v11602_v19  ;;  %13297 = vst [vmem:[#allocation52_spill] sm:$0xff] %v11710_v17 }
 0x4a8   :  { %4234 = vmatmul.mubr.bf16.vlgmr.msra.gmra.mrb[56].mxu1 %v3541_v38  ;;  %4883 = vmatpush1.bf16.msra.mxu0 %v11740_v52  ;;  %v11867_v38 = vld [vmem:[%s13068_s2 + $0x218] ss:$24 sps:$4 sm:$0xff]  }
 0x4a9   :  { %4912 = vmatpush1.bf16.msra.mxu1 %v11597_v46  ;;  %4884 = vmatprep.subr.bf16.mxu0 %v11755_v58  ;;  %13310 = vst [vmem:[#allocation65_spill] sm:$0xff] %v11867_v38  ;;  %v13322_v46 = vld [vmem:[#allocation20_spill] sm:$0xff] }
 0x4aa   :  { %4913 = vmatprep.subr.bf16.mxu1 %v11613_v32 }
 0x4ac   :  { %4885 = vmatpush1.bf16.msra.mxu0 %v11760_v12 }
 0x4ad   :  { %4914 = vmatpush1.bf16.msra.mxu1 %v11627_v25  ;;  %4886 = vmatprep.subr.bf16.mxu0 %v11779_v34 }
 0x4ae   :  { %4915 = vmatprep.subr.bf16.mxu1 %v11638_v2 }
 0x4b0   :  { %4887 = vmatpush1.bf16.msra.mxu0 %v11784_v50 }
 0x4b1   :  { %4916 = vmatpush1.bf16.msra.mxu1 %v11651_v14  ;;  %4888 = vmatprep.subr.bf16.mxu0 %v11803_v45 }
 0x4b2   :  { %4917 = vmatprep.subr.bf16.mxu1 %v11662_v61 }
 0x4b4   :  { %4889 = vmatpush1.bf16.msra.mxu0 %v11808_v1 }
 0x4b5   :  { %4918 = vmatpush1.bf16.msra.mxu1 %v11675_v21  ;;  %4890 = vmatprep.subr.bf16.mxu0 %v11827_v16 }
 0x4b6   :  { %4919 = vmatprep.subr.bf16.mxu1 %v11686_v63 }
 0x4b8   :  { %4891 = vmatpush1.bf16.msra.mxu0 %v11832_v24 }
 0x4b9   :  { %4920 = vmatpush1.bf16.msra.mxu1 %v11699_v41  ;;  %4892 = vmatprep.subr.bf16.mxu0 %v11851_v31  ;;  %v13321_v41 = vld [vmem:[#allocation23_spill] sm:$0xff] }
 0x4ba   :  { %4921 = vmatprep.subr.bf16.mxu1 %v11710_v17 }
 0x4bc   :  { %4893 = vmatpush1.bf16.msra.mxu0 %v11856_v36 }
 0x4bd   :  { %4922 = vmatpush1.bf16.msra.mxu1 %v11723_v57  ;;  %4894 = vmatprep.subr.bf16.mxu0 %v11879_v8  ;;  %v13320_v57 = vld [vmem:[#allocation7_spill] sm:$0xff] }
 0x4be   :  { %4923 = vmatprep.subr.bf16.mxu1 %v11734_v60 }
 0x4c0   :  { %4895 = vmatpush1.bf16.msra.mxu0 %v11874_v51 }
 0x4c1   :  { %4924 = vmatpush1.bf16.msra.mxu1 %v11747_v44 }
 0x4c2   :  { %4925 = vmatprep.subr.bf16.mxu1 %v11765_v48 }
 0x4c5   :  { %4926 = vmatpush1.bf16.msra.mxu1 %v11771_v43 }
 0x4c6   :  { %4927 = vmatprep.subr.bf16.mxu1 %v11789_v40 }
 0x4c9   :  { %4928 = vmatpush1.bf16.msra.mxu1 %v11795_v10  ;;  %v11950_v10 = vld [vmem:[%s13068_s2 + $0x2dc] ss:$24 sps:$4 sm:$0xff]  }
 0x4ca   :  { %4929 = vmatprep.subr.bf16.mxu1 %v11813_v3  ;;  %v11944_v3 = vld [vmem:[%s13068_s2 + $0x2d4] ss:$24 sps:$4 sm:$0xff]   ;;  %13317 = vst [vmem:[#allocation72_spill] sm:$0xff] %v11950_v10 }
 0x4cd   :  { %4930 = vmatpush1.bf16.msra.mxu1 %v11819_v18  ;;  %v11926_v18 = vld [vmem:[%s13068_s2 + $0x2ac] ss:$24 sps:$4 sm:$0xff]  }
 0x4ce   :  { %4931 = vmatprep.subr.bf16.mxu1 %v11837_v26  ;;  %v11915_v26 = vld [vmem:[%s13068_s2 + $0x278] ss:$24 sps:$4 sm:$0xff]   ;;  %13315 = vst [vmem:[#allocation70_spill] sm:$0xff] %v11926_v18 }
 0x4cf   :  { %13314 = vst [vmem:[#allocation69_spill] sm:$0xff] %v11915_v26 }
 0x4d1   :  { %4932 = vmatpush1.bf16.msra.mxu1 %v11843_v0  ;;  %v11908_v0 = vld [vmem:[%s13068_s2 + $0x270] ss:$24 sps:$4 sm:$0xff]  }
 0x4d2   :  { %4933 = vmatprep.subr.bf16.mxu1 %v11861_v9  ;;  %v11895_v9 = vld [vmem:[%s13068_s2 + $0x274] ss:$24 sps:$4 sm:$0xff]  }
 0x4d3   :  { %4896 = vmatprep.subr.bf16.mxu0 %v11895_v9 }
 0x4d4   :  { %4897 = vmatpush1.bf16.msra.mxu0 %v11908_v0 }
 0x4d5   :  { %4934 = vmatpush1.bf16.msra.mxu1 %v11867_v38  ;;  %v11901_v38 = vld [vmem:[%s13068_s2 + $0x27c] ss:$24 sps:$4 sm:$0xff]  }
 0x4d6   :  { %13313 = vst [vmem:[#allocation68_spill] sm:$0xff] %v11901_v38  ;;  %4935 = vmatprep.subr.bf16.mxu1 %v11890_v54  ;;  %v11920_v54 = vld [vmem:[%s13068_s2 + $0x2a4] ss:$24 sps:$4 sm:$0xff]  }
 0x4d7   :  { %4898 = vmatprep.subr.bf16.mxu0 %v11920_v54 }
 0x4d9   :  { %4936 = vmatpush1.bf16.msra.mxu1 %v11885_v30  ;;  %v11932_v30 = vld [vmem:[%s13068_s2 + $0x2a0] ss:$24 sps:$4 sm:$0xff]  }
 0x4da   :  { %4937 = vmatprep.subr.bf16.mxu1 %v11901_v38  ;;  %v11939_v38 = vld [vmem:[%s13068_s2 + $0x2a8] ss:$24 sps:$4 sm:$0xff]   ;;  %4899 = vmatpush1.bf16.msra.mxu0 %v11932_v30 }
 0x4db   :  { %13316 = vst [vmem:[#allocation71_spill] sm:$0xff] %v11939_v38  ;;  %4900 = vmatprep.subr.bf16.mxu0 %v11944_v3 }
 0x4dd   :  { %4938 = vmatpush1.bf16.msra.mxu1 %v11915_v26  ;;  %v11956_v26 = vld [vmem:[%s13068_s2 + $0x2d0] ss:$24 sps:$4 sm:$0xff]  }
 0x4de   :  { %4939 = vmatprep.subr.bf16.mxu1 %v11926_v18  ;;  %v11963_v18 = vld [vmem:[%s13068_s2 + $0x2d8] ss:$24 sps:$4 sm:$0xff]   ;;  %4901 = vmatpush1.bf16.msra.mxu0 %v11956_v26 }
 0x4df   :  { %13318 = vst [vmem:[#allocation74_spill] sm:$0xff] %v11963_v18  ;;  %4952 = vmatprep.subr.bf16.mxu0 %v11489_v23 }
 0x4e1   :  { %4940 = vmatpush1.bf16.msra.mxu1 %v11939_v38  ;;  %v13319_v38 = vld [vmem:[#allocation6_spill] sm:$0xff] }
 0x4e2   :  { %4941 = vmatprep.subr.bf16.mxu1 %v11950_v10 }
 0x4e5   :  { %4942 = vmatpush1.bf16.msra.mxu1 %v11963_v18 }
 0x4e6   :  { %5621 = vmatprep.subr.bf16.mxu1 %v11592_v5 }
 0x53b   :  { %v4153_v40 = vpop.f32.mrb[52].mxu1  ;;  %v4194_v43 = vpop.f32.mrb[48].mxu0 }
 0x53c   :  { %v4248_v48 = vadd.f32 %v4153_v40, %v13319_v38  ;;  %v4155_v44 = vpop.f32.mrb[53].mxu1  ;;  %v4196_v60 = vpop.f32.mrb[49].mxu0 }
 0x53d   :  { %v4255_v17 = vadd.f32 %v4155_v44, %v13320_v57  ;;  %v4269_v63 = vadd.f32 %v4196_v60, %v13321_v41  ;;  %v4157_v21 = vpop.f32.mrb[54].mxu1  ;;  %v4198_v10 = vpop.f32.mrb[50].mxu0 }
 0x53e   :  { %v8062_v61 = vmul.f32 -1.442695, %v4248_v48  ;;  %v4158_v14 = vpop.f32.mrb[55].mxu1  ;;  %v4199_v2 = vpop.f32.mrb[51].mxu0 }
 0x53f   :  { %v8063_v18 = vmul.f32 -1.442695, %v4255_v17  ;;  %v8064_v41 = vmul.f32 -1.442695, %v4269_v63 }
 0x540   :  { %9425 = vpow2.f32 %v8062_v61 }
 0x541   :  { %9427 = vpow2.f32 %v8063_v18 }
 0x54a   :  { %v9426_v23 = vpop.eup %9425 }
 0x54b   :  { %v4252_v5 = vadd.f32 1.0, %v9426_v23  ;;  %v9428_v25 = vpop.eup %9427 }
 0x54c   :  { %v4259_v32 = vadd.f32 1.0, %v9428_v25 }
 0x54d   :  { %9429 = vrcp.f32 %v4252_v5 }
 0x54e   :  { %9431 = vrcp.f32 %v4259_v32 }
 0x557   :  { %v9430_v40 = vpop.eup %9429 }
 0x558   :  { %v4262_v38 = vmul.f32 %v9430_v40, %v4194_v43  ;;  %v9432_v21 = vpop.eup %9431  ;;  %v13324_v43 = vld [vmem:[#allocation36_spill] sm:$0xff]  ;;  %v13325_v40 = vld [vmem:[#allocation37_spill] sm:$0xff] }
 0x559   :  { %v4265_v60 = vsub.f32 1.0, %v9432_v21  ;;  %v4267_v61 = vmul.f32 %v9432_v21, %v11497_v27  ;;  %v12599_v27 = vld [vmem:[%s13068_s2 + $0x24c] ss:$24 sps:$4 sm:$0xff]  }
 0x55a   :  { %v4263_v57 = vadd.f32 %v4262_v38, %v13322_v46 }
 0x55c   :  { %9433 = vtanh.f32 %v4263_v57 }
 0x55d   :  { %9435 = vpow2.f32 %v8064_v41 }
 0x566   :  { %v9434_v14 = vpop.eup %9433 }
 0x567   :  { %v4266_v2 = vmul.f32 %v9434_v14, %v4265_v60  ;;  %v9436_v44 = vpop.eup %9435 }
 0x568   :  { %v4273_v48 = vadd.f32 1.0, %v9436_v44 }
 0x569   :  { %v11975_v17 = vadd.f32 %v4267_v61, %v4266_v2 }
 0x56a   :  { %9437 = vrcp.f32 %v4273_v48 }
 0x56b   :  { %13323 = vst [vmem:[#allocation4_spill] sm:$0xff] %v11975_v17 }
 0x574   :  { %v9438_v10 = vpop.eup %9437 }
 0x57b   :  { %v4235_v25 = vpop.f32.mrb[56].mxu1 }
 0x57c   :  { %v4276_v32 = vadd.f32 %v4235_v25, %v13324_v43  ;;  %v4237_v18 = vpop.f32.mrb[57].mxu1  ;;  %v11986_v25 = vpack.c.bf16 %v11975_v17, %v11975_v17  ;;  %v13347_v43 = vld [vmem:[#allocation63_spill] sm:$0xff] }
 0x57d   :  { %v4283_v46 = vmul.f32 %v9438_v10, %v4237_v18  ;;  %v4239_v23 = vpop.f32.mrb[58].mxu1  ;;  %v13346_v10 = vld [vmem:[#allocation62_spill] sm:$0xff]  ;;  %v13349_v18 = vld [vmem:[#allocation65_spill] sm:$0xff] }
 0x57e   :  { %v8065_v63 = vmul.f32 -1.442695, %v4276_v32  ;;  %v4240_v5 = vpop.f32.mrb[59].mxu1  ;;  %v13348_v32 = vld [vmem:[#allocation64_spill] sm:$0xff]  ;;  %v13351_v23 = vld [vmem:[#allocation67_spill] sm:$0xff] }
 0x57f   :  { %v4284_v38 = vadd.f32 %v4283_v46, %v13325_v40  ;;  %v13350_v46 = vld [vmem:[#allocation66_spill] sm:$0xff]  ;;  %v13353_v5 = vld [vmem:[#allocation69_spill] sm:$0xff] }
 0x580   :  { %9439 = vpow2.f32 %v8065_v63  ;;  %v13352_v63 = vld [vmem:[#allocation68_spill] sm:$0xff]  ;;  %v13354_v40 = vld [vmem:[#allocation70_spill] sm:$0xff] }
 0x58a   :  { %v9440_v57 = vpop.eup %9439 }
 0x58b   :  { %v4280_v41 = vadd.f32 1.0, %v9440_v57  ;;  %v13356_v57 = vld [vmem:[#allocation72_spill] sm:$0xff] }
 0x58d   :  { %9441 = vrcp.f32 %v4280_v41  ;;  %v13357_v41 = vld [vmem:[#allocation74_spill] sm:$0xff] }
 0x58e   :  { %9443 = vtanh.f32 %v4284_v38  ;;  %v13355_v38 = vld [vmem:[#allocation71_spill] sm:$0xff] }
 0x597   :  { %v9442_v21 = vpop.eup %9441 }
 0x598   :  { %v4286_v60 = vsub.f32 1.0, %v9442_v21  ;;  %v9444_v14 = vpop.eup %9443  ;;  %v4288_v61 = vmul.f32 %v9442_v21, %v11502_v29  ;;  %v12198_v21 = vld [vmem:[%s13068_s2 + $0x14] ss:$24 sps:$4 sm:$0xff]   ;;  %v12583_v29 = vld [vmem:[%s13068_s2 + $0x240] ss:$24 sps:$4 sm:$0xff]  }
 0x59a   :  { %v4287_v2 = vmul.f32 %v9444_v14, %v4286_v60 }
 0x59c   :  { %v11980_v44 = vadd.f32 %v4288_v61, %v4287_v2  ;;  %v13358_v2 = vld [vmem:[#allocation8_spill] sm:$0xff] }
 0x59e   :  { %13326 = vst [vmem:[#allocation5_spill] sm:$0xff] %v11980_v44  ;;  %v4293_v48 = vpack.c.bf16 %v11980_v44, %v11980_v44 }
 0x5a0   :  { %4902 = vmatprep.mubr.bf16.mxu0 %v4293_v48  ;;  %4943 = vmatprep.mubr.bf16.mxu1 %v4293_v48 }
 0x5a1   :  { %4903 = vmatmul.mubr.bf16.vlgmr.msra.gmra.mrb[52].mxu0 %v11986_v25  ;;  %4944 = vmatmul.mubr.bf16.vlgmr.msra.gmra.mrb[60].mxu1 %v11986_v25 }
 0x5a2   :  { %4953 = vmatpush1.bf16.msra.mxu0 %v11509_v53  ;;  %4984 = vmatprep.mubr.bf16.mxu0 %v4293_v48  ;;  %v12007_v53 = vld [vmem:[%s13068_s2 + $0x104] ss:$24 sps:$4 sm:$0xff]  }
 0x5a3   :  { %4954 = vmatprep.subr.bf16.mxu0 %v11516_v37  ;;  %5622 = vmatpush1.bf16.msra.mxu1 %v11587_v6  ;;  %v12015_v37 = vld [vmem:[%s13068_s2 + $0x100] ss:$24 sps:$4 sm:$0xff]  }
 0x5a4   :  { %5623 = vmatprep.subr.bf16.mxu1 %v11607_v49  ;;  %v12071_v6 = vld [vmem:[%s13068_s2 + $0x1c0] ss:$24 sps:$4 sm:$0xff]   ;;  %v12077_v49 = vld [vmem:[%s13068_s2 + $0x1f4] ss:$24 sps:$4 sm:$0xff]  }
 0x5a6   :  { %4955 = vmatpush1.bf16.msra.mxu0 %v11522_v22  ;;  %v12021_v22 = vld [vmem:[%s13068_s2 + $0x134] ss:$24 sps:$4 sm:$0xff]  }
 0x5a7   :  { %4956 = vmatprep.subr.bf16.mxu0 %v11528_v39  ;;  %5624 = vmatpush1.bf16.msra.mxu1 %v11620_v28  ;;  %v12029_v39 = vld [vmem:[%s13068_s2 + $0x130] ss:$24 sps:$4 sm:$0xff]  }
 0x5a8   :  { %5625 = vmatprep.subr.bf16.mxu1 %v11632_v35  ;;  %v12085_v28 = vld [vmem:[%s13068_s2 + $0x1f0] ss:$24 sps:$4 sm:$0xff]   ;;  %v12091_v35 = vld [vmem:[%s13068_s2 + $0x224] ss:$24 sps:$4 sm:$0xff]  }
 0x5aa   :  { %4957 = vmatpush1.bf16.msra.mxu0 %v11534_v7  ;;  %v12035_v7 = vld [vmem:[%s13068_s2 + $0x164] ss:$24 sps:$4 sm:$0xff]  }
 0x5ab   :  { %4958 = vmatprep.subr.bf16.mxu0 %v11540_v33  ;;  %5626 = vmatpush1.bf16.msra.mxu1 %v11644_v4  ;;  %v12043_v33 = vld [vmem:[%s13068_s2 + $0x160] ss:$24 sps:$4 sm:$0xff]  }
 0x5ac   :  { %5627 = vmatprep.subr.bf16.mxu1 %v11656_v13  ;;  %v12099_v4 = vld [vmem:[%s13068_s2 + $0x220] ss:$24 sps:$4 sm:$0xff]   ;;  %v12105_v13 = vld [vmem:[%s13068_s2 + $0x254] ss:$24 sps:$4 sm:$0xff]  }
 0x5ae   :  { %4959 = vmatpush1.bf16.msra.mxu0 %v11546_v62  ;;  %v12049_v62 = vld [vmem:[%s13068_s2 + $0x194] ss:$24 sps:$4 sm:$0xff]  }
 0x5af   :  { %4960 = vmatprep.subr.bf16.mxu0 %v11552_v47  ;;  %5628 = vmatpush1.bf16.msra.mxu1 %v11668_v20  ;;  %v12057_v47 = vld [vmem:[%s13068_s2 + $0x190] ss:$24 sps:$4 sm:$0xff]  }
 0x5b0   :  { %5629 = vmatprep.subr.bf16.mxu1 %v11680_v56  ;;  %v12113_v20 = vld [vmem:[%s13068_s2 + $0x250] ss:$24 sps:$4 sm:$0xff]   ;;  %v12119_v56 = vld [vmem:[%s13068_s2 + $0x284] ss:$24 sps:$4 sm:$0xff]  }
 0x5b2   :  { %4961 = vmatpush1.bf16.msra.mxu0 %v11558_v55  ;;  %v12063_v55 = vld [vmem:[%s13068_s2 + $0x1c4] ss:$24 sps:$4 sm:$0xff]  }
 0x5b3   :  { %4962 = vmatprep.subr.bf16.mxu0 %v12007_v53  ;;  %5630 = vmatpush1.bf16.msra.mxu1 %v11692_v15  ;;  %v12127_v15 = vld [vmem:[%s13068_s2 + $0x280] ss:$24 sps:$4 sm:$0xff]  }
 0x5b4   :  { %5631 = vmatprep.subr.bf16.mxu1 %v11704_v59  ;;  %v12133_v59 = vld [vmem:[%s13068_s2 + $0x2b4] ss:$24 sps:$4 sm:$0xff]  }
 0x5b6   :  { %4963 = vmatpush1.bf16.msra.mxu0 %v12015_v37 }
 0x5b7   :  { %4964 = vmatprep.subr.bf16.mxu0 %v12021_v22  ;;  %5632 = vmatpush1.bf16.msra.mxu1 %v11716_v11  ;;  %v12147_v11 = vld [vmem:[%s13068_s2 + $0x2e4] ss:$24 sps:$4 sm:$0xff]  }
 0x5b8   :  { %5633 = vmatprep.subr.bf16.mxu1 %v11728_v42  ;;  %v13328_v42 = vld [vmem:[#allocation44_spill] sm:$0xff] }
 0x5ba   :  { %4965 = vmatpush1.bf16.msra.mxu0 %v12029_v39 }
 0x5bb   :  { %4966 = vmatprep.subr.bf16.mxu0 %v12035_v7  ;;  %5634 = vmatpush1.bf16.msra.mxu1 %v11740_v52  ;;  %v13329_v52 = vld [vmem:[#allocation45_spill] sm:$0xff] }
 0x5bc   :  { %5635 = vmatprep.subr.bf16.mxu1 %v11755_v58  ;;  %v13330_v58 = vld [vmem:[#allocation46_spill] sm:$0xff] }
 0x5be   :  { %4967 = vmatpush1.bf16.msra.mxu0 %v12043_v33 }
 0x5bf   :  { %4968 = vmatprep.subr.bf16.mxu0 %v12049_v62  ;;  %5636 = vmatpush1.bf16.msra.mxu1 %v11760_v12  ;;  %v13331_v12 = vld [vmem:[#allocation47_spill] sm:$0xff] }
 0x5c0   :  { %5637 = vmatprep.subr.bf16.mxu1 %v11779_v34  ;;  %v13333_v34 = vld [vmem:[#allocation49_spill] sm:$0xff] }
 0x5c2   :  { %4969 = vmatpush1.bf16.msra.mxu0 %v12057_v47 }
 0x5c3   :  { %4970 = vmatprep.subr.bf16.mxu0 %v12063_v55  ;;  %5638 = vmatpush1.bf16.msra.mxu1 %v11784_v50  ;;  %v13334_v50 = vld [vmem:[#allocation50_spill] sm:$0xff] }
 0x5c4   :  { %5639 = vmatprep.subr.bf16.mxu1 %v11803_v45  ;;  %v13336_v45 = vld [vmem:[#allocation52_spill] sm:$0xff] }
 0x5c6   :  { %4971 = vmatpush1.bf16.msra.mxu0 %v12071_v6 }
 0x5c7   :  { %4972 = vmatprep.subr.bf16.mxu0 %v12077_v49  ;;  %5640 = vmatpush1.bf16.msra.mxu1 %v11808_v1  ;;  %v13337_v1 = vld [vmem:[#allocation53_spill] sm:$0xff] }
 0x5c8   :  { %5641 = vmatprep.subr.bf16.mxu1 %v11827_v16  ;;  %v13339_v16 = vld [vmem:[#allocation55_spill] sm:$0xff] }
 0x5ca   :  { %4973 = vmatpush1.bf16.msra.mxu0 %v12085_v28 }
 0x5cb   :  { %4974 = vmatprep.subr.bf16.mxu0 %v12091_v35  ;;  %5642 = vmatpush1.bf16.msra.mxu1 %v11832_v24  ;;  %v13340_v24 = vld [vmem:[#allocation56_spill] sm:$0xff] }
 0x5cc   :  { %5643 = vmatprep.subr.bf16.mxu1 %v11851_v31  ;;  %v13343_v31 = vld [vmem:[#allocation59_spill] sm:$0xff] }
 0x5ce   :  { %4975 = vmatpush1.bf16.msra.mxu0 %v12099_v4 }
 0x5cf   :  { %4976 = vmatprep.subr.bf16.mxu0 %v12105_v13  ;;  %5644 = vmatpush1.bf16.msra.mxu1 %v11856_v36  ;;  %v13344_v36 = vld [vmem:[#allocation60_spill] sm:$0xff] }
 0x5d0   :  { %5645 = vmatprep.subr.bf16.mxu1 %v11879_v8  ;;  %v12141_v8 = vld [vmem:[%s13068_s2 + $0x2b0] ss:$24 sps:$4 sm:$0xff]  }
 0x5d2   :  { %4977 = vmatpush1.bf16.msra.mxu0 %v12113_v20 }
 0x5d3   :  { %4978 = vmatprep.subr.bf16.mxu0 %v12119_v56  ;;  %5646 = vmatpush1.bf16.msra.mxu1 %v11874_v51  ;;  %v12155_v51 = vld [vmem:[%s13068_s2 + $0x2e0] ss:$24 sps:$4 sm:$0xff]  }
 0x5d4   :  { %5647 = vmatprep.subr.bf16.mxu1 %v11895_v9  ;;  %v13345_v9 = vld [vmem:[#allocation61_spill] sm:$0xff] }
 0x5d6   :  { %4979 = vmatpush1.bf16.msra.mxu0 %v12127_v15 }
 0x5d7   :  { %4980 = vmatprep.subr.bf16.mxu0 %v12133_v59  ;;  %5648 = vmatpush1.bf16.msra.mxu1 %v11908_v0  ;;  %v13342_v0 = vld [vmem:[#allocation58_spill] sm:$0xff] }
 0x5d8   :  { %5649 = vmatprep.subr.bf16.mxu1 %v11920_v54  ;;  %v13327_v54 = vld [vmem:[#allocation42_spill] sm:$0xff] }
 0x5da   :  { %4981 = vmatpush1.bf16.msra.mxu0 %v12141_v8 }
 0x5db   :  { %4982 = vmatprep.subr.bf16.mxu0 %v12147_v11  ;;  %5650 = vmatpush1.bf16.msra.mxu1 %v11932_v30  ;;  %v13332_v30 = vld [vmem:[#allocation48_spill] sm:$0xff] }
 0x5dc   :  { %5651 = vmatprep.subr.bf16.mxu1 %v11944_v3  ;;  %v13338_v3 = vld [vmem:[#allocation54_spill] sm:$0xff] }
 0x5de   :  { %4983 = vmatpush1.bf16.msra.mxu0 %v12155_v51 }
 0x5df   :  { %5662 = vmatprep.subr.bf16.mxu0 %v11602_v19  ;;  %5652 = vmatpush1.bf16.msra.mxu1 %v11956_v26  ;;  %v13335_v19 = vld [vmem:[#allocation51_spill] sm:$0xff]  ;;  %v13341_v26 = vld [vmem:[#allocation57_spill] sm:$0xff] }
 0x5e0   :  { %5703 = vmatprep.subr.bf16.mxu1 %v12198_v21  ;;  %13388 = vst [vmem:[#allocation57_spill] sm:$0xff] %v12599_v27 }
 0x5e1   :  { %4985 = vmatmul.mubr.bf16.vlgmr.msra.gmra.mrb[56].mxu0 %v11986_v25 }
 0x5e2   :  { %5663 = vmatpush1.bf16.msra.mxu0 %v13327_v54  ;;  %v13359_v54 = vld [vmem:[#allocation9_spill] sm:$0xff] }
 0x5e3   :  { %5664 = vmatprep.subr.bf16.mxu0 %v13328_v42 }
 0x5e6   :  { %5665 = vmatpush1.bf16.msra.mxu0 %v13329_v52  ;;  %v13360_v52 = vld [vmem:[#allocation21_spill] sm:$0xff] }
 0x5e7   :  { %5666 = vmatprep.subr.bf16.mxu0 %v13330_v58 }
 0x5ea   :  { %5667 = vmatpush1.bf16.msra.mxu0 %v13331_v12 }
 0x5eb   :  { %5668 = vmatprep.subr.bf16.mxu0 %v13332_v30 }
 0x5ee   :  { %5669 = vmatpush1.bf16.msra.mxu0 %v13333_v34 }
 0x5ef   :  { %5670 = vmatprep.subr.bf16.mxu0 %v13334_v50 }
 0x5f2   :  { %5671 = vmatpush1.bf16.msra.mxu0 %v13335_v19 }
 0x5f3   :  { %5672 = vmatprep.subr.bf16.mxu0 %v13336_v45 }
 0x5f6   :  { %5673 = vmatpush1.bf16.msra.mxu0 %v13337_v1 }
 0x5f7   :  { %5674 = vmatprep.subr.bf16.mxu0 %v13338_v3 }
 0x5fa   :  { %5675 = vmatpush1.bf16.msra.mxu0 %v13339_v16 }
 0x5fb   :  { %5676 = vmatprep.subr.bf16.mxu0 %v13340_v24 }
 0x5fe   :  { %5677 = vmatpush1.bf16.msra.mxu0 %v13341_v26 }
 0x5ff   :  { %5678 = vmatprep.subr.bf16.mxu0 %v13342_v0 }
 0x602   :  { %5679 = vmatpush1.bf16.msra.mxu0 %v13343_v31  ;;  %v13361_v31 = vld [vmem:[#allocation22_spill] sm:$0xff] }
 0x603   :  { %5680 = vmatprep.subr.bf16.mxu0 %v13344_v36 }
 0x606   :  { %5681 = vmatpush1.bf16.msra.mxu0 %v13345_v9 }
 0x607   :  { %5682 = vmatprep.subr.bf16.mxu0 %v13346_v10 }
 0x60a   :  { %5683 = vmatpush1.bf16.msra.mxu0 %v13347_v43 }
 0x60b   :  { %5684 = vmatprep.subr.bf16.mxu0 %v13348_v32 }
 0x60e   :  { %5685 = vmatpush1.bf16.msra.mxu0 %v13349_v18 }
 0x60f   :  { %5686 = vmatprep.subr.bf16.mxu0 %v13350_v46 }
 0x612   :  { %5687 = vmatpush1.bf16.msra.mxu0 %v13351_v23 }
 0x613   :  { %5688 = vmatprep.subr.bf16.mxu0 %v13352_v63 }
 0x616   :  { %5689 = vmatpush1.bf16.msra.mxu0 %v13353_v5 }
 0x617   :  { %5690 = vmatprep.subr.bf16.mxu0 %v13354_v40 }
 0x61a   :  { %5691 = vmatpush1.bf16.msra.mxu0 %v13355_v38 }
 0x61b   :  { %5692 = vmatprep.subr.bf16.mxu0 %v13356_v57  ;;  %v13362_v57 = vld [vmem:[#allocation34_spill] sm:$0xff] }
 0x61e   :  { %5693 = vmatpush1.bf16.msra.mxu0 %v13357_v41 }
 0x674   :  { %v4904_v60 = vpop.f32.mrb[52].mxu0  ;;  %v4945_v14 = vpop.f32.mrb[60].mxu1 }
 0x675   :  { %v4999_v61 = vadd.f32 %v4904_v60, %v13358_v2  ;;  %v4906_v48 = vpop.f32.mrb[53].mxu0  ;;  %v4947_v25 = vpop.f32.mrb[61].mxu1 }
 0x676   :  { %v5006_v42 = vadd.f32 %v4906_v48, %v13359_v54  ;;  %v5020_v58 = vadd.f32 %v4947_v25, %v13360_v52  ;;  %v4908_v12 = vpop.f32.mrb[54].mxu0  ;;  %v4949_v30 = vpop.f32.mrb[62].mxu1  ;;  %v13363_v25 = vld [vmem:[#allocation35_spill] sm:$0xff] }
 0x677   :  { %v8162_v34 = vmul.f32 -1.442695, %v4999_v61  ;;  %v4909_v50 = vpop.f32.mrb[55].mxu0  ;;  %v4950_v19 = vpop.f32.mrb[63].mxu1 }
 0x678   :  { %v8163_v45 = vmul.f32 -1.442695, %v5006_v42  ;;  %v8164_v9 = vmul.f32 -1.442695, %v5020_v58 }
 0x679   :  { %9445 = vpow2.f32 %v8162_v34 }
 0x67a   :  { %9447 = vpow2.f32 %v8163_v45 }
 0x683   :  { %v9446_v1 = vpop.eup %9445 }
 0x684   :  { %v5003_v3 = vadd.f32 1.0, %v9446_v1  ;;  %v9448_v16 = vpop.eup %9447  ;;  %v12218_v1 = vld [vmem:[%s13068_s2 + $0x10] ss:$24 sps:$4 sm:$0xff]  }
 0x685   :  { %v5010_v24 = vadd.f32 1.0, %v9448_v16  ;;  %v12225_v16 = vld [vmem:[%s13068_s2 + $0x44] ss:$24 sps:$4 sm:$0xff]  }
 0x686   :  { %9449 = vrcp.f32 %v5003_v3 }
 0x687   :  { %9451 = vrcp.f32 %v5010_v24  ;;  %v12231_v24 = vld [vmem:[%s13068_s2 + $0x40] ss:$24 sps:$4 sm:$0xff]  }
 0x690   :  { %v9450_v26 = vpop.eup %9449 }
 0x691   :  { %v5013_v0 = vmul.f32 %v9450_v26, %v4945_v14  ;;  %v9452_v10 = vpop.eup %9451  ;;  %v12237_v26 = vld [vmem:[%s13068_s2 + $0x74] ss:$24 sps:$4 sm:$0xff]  }
 0x692   :  { %v5016_v43 = vsub.f32 1.0, %v9452_v10  ;;  %v5018_v46 = vmul.f32 %v9452_v10, %v11975_v17  ;;  %v12267_v10 = vld [vmem:[%s13068_s2 + $0xd0] ss:$24 sps:$4 sm:$0xff]  }
 0x693   :  { %v5014_v36 = vadd.f32 %v5013_v0, %v13361_v31  ;;  %v12243_v0 = vld [vmem:[%s13068_s2 + $0x70] ss:$24 sps:$4 sm:$0xff]   ;;  %v12249_v31 = vld [vmem:[%s13068_s2 + $0xa4] ss:$24 sps:$4 sm:$0xff]  }
 0x694   :  { %v12594_v17 = vld [vmem:[%s13068_s2 + $0x248] ss:$24 sps:$4 sm:$0xff]  }
 0x695   :  { %9453 = vtanh.f32 %v5014_v36  ;;  %v12255_v36 = vld [vmem:[%s13068_s2 + $0xa0] ss:$24 sps:$4 sm:$0xff]   ;;  %13387 = vst [vmem:[#allocation56_spill] sm:$0xff] %v12594_v17 }
 0x696   :  { %9455 = vpow2.f32 %v8164_v9  ;;  %v12261_v9 = vld [vmem:[%s13068_s2 + $0xd4] ss:$24 sps:$4 sm:$0xff]  }
 0x69f   :  { %v9454_v32 = vpop.eup %9453 }
 0x6a0   :  { %v5017_v18 = vmul.f32 %v9454_v32, %v5016_v43  ;;  %v9456_v63 = vpop.eup %9455  ;;  %v12425_v43 = vld [vmem:[%s13068_s2 + $0xf0] ss:$24 sps:$4 sm:$0xff]  }
 0x6a1   :  { %v5024_v5 = vadd.f32 1.0, %v9456_v63  ;;  %v12432_v32 = vld [vmem:[%s13068_s2 + $0xf8] ss:$24 sps:$4 sm:$0xff]  }
 0x6a2   :  { %v12206_v23 = vadd.f32 %v5018_v46, %v5017_v18  ;;  %13374 = vst [vmem:[#allocation42_spill] sm:$0xff] %v12432_v32  ;;  %v12437_v18 = vld [vmem:[%s13068_s2 + $0x124] ss:$24 sps:$4 sm:$0xff]   ;;  %v12449_v63 = vld [vmem:[%s13068_s2 + $0x120] ss:$24 sps:$4 sm:$0xff]  }
 0x6a3   :  { %9457 = vrcp.f32 %v5024_v5  ;;  %v12443_v46 = vld [vmem:[%s13068_s2 + $0x12c] ss:$24 sps:$4 sm:$0xff]   ;;  %v12456_v5 = vld [vmem:[%s13068_s2 + $0x128] ss:$24 sps:$4 sm:$0xff]  }
 0x6a4   :  { %v5043_v3 = vpack.c.bf16 %v12206_v23, %v12206_v23  ;;  %13375 = vst [vmem:[#allocation44_spill] sm:$0xff] %v12443_v46  ;;  %13376 = vst [vmem:[#allocation45_spill] sm:$0xff] %v12456_v5 }
 0x6ad   :  { %v9458_v38 = vpop.eup %9457 }
 0x6b4   :  { %v4986_v40 = vpop.f32.mrb[56].mxu0 }
 0x6b5   :  { %v5027_v41 = vadd.f32 %v4986_v40, %v13362_v57  ;;  %v4988_v60 = vpop.f32.mrb[57].mxu0  ;;  %v12464_v40 = vld [vmem:[%s13068_s2 + $0x154] ss:$24 sps:$4 sm:$0xff]  }
 0x6b6   :  { %v5034_v14 = vmul.f32 %v9458_v38, %v4988_v60  ;;  %v4990_v2 = vpop.f32.mrb[58].mxu0  ;;  %v12469_v38 = vld [vmem:[%s13068_s2 + $0x150] ss:$24 sps:$4 sm:$0xff]   ;;  %v12474_v57 = vld [vmem:[%s13068_s2 + $0x15c] ss:$24 sps:$4 sm:$0xff]  }
 0x6b7   :  { %v8165_v61 = vmul.f32 -1.442695, %v5027_v41  ;;  %v4991_v48 = vpop.f32.mrb[59].mxu0  ;;  %13377 = vst [vmem:[#allocation46_spill] sm:$0xff] %v12474_v57  ;;  %v12480_v41 = vld [vmem:[%s13068_s2 + $0x158] ss:$24 sps:$4 sm:$0xff]  }
 0x6b8   :  { %v5035_v54 = vadd.f32 %v5034_v14, %v13363_v25  ;;  %13378 = vst [vmem:[#allocation47_spill] sm:$0xff] %v12480_v41  ;;  %v12488_v60 = vld [vmem:[%s13068_s2 + $0x184] ss:$24 sps:$4 sm:$0xff]   ;;  %v12493_v14 = vld [vmem:[%s13068_s2 + $0x180] ss:$24 sps:$4 sm:$0xff]  }
 0x6b9   :  { %9459 = vpow2.f32 %v8165_v61  ;;  %v12498_v2 = vld [vmem:[%s13068_s2 + $0x18c] ss:$24 sps:$4 sm:$0xff]   ;;  %v12504_v61 = vld [vmem:[%s13068_s2 + $0x188] ss:$24 sps:$4 sm:$0xff]  }
 0x6ba   :  { %13379 = vst [vmem:[#allocation48_spill] sm:$0xff] %v12498_v2  ;;  %13380 = vst [vmem:[#allocation49_spill] sm:$0xff] %v12504_v61  ;;  %v12512_v48 = vld [vmem:[%s13068_s2 + $0x1b4] ss:$24 sps:$4 sm:$0xff]   ;;  %v12517_v25 = vld [vmem:[%s13068_s2 + $0x1b0] ss:$24 sps:$4 sm:$0xff]  }
 0x6c3   :  { %v9460_v42 = vpop.eup %9459 }
 0x6c4   :  { %v5031_v52 = vadd.f32 1.0, %v9460_v42  ;;  %v12528_v42 = vld [vmem:[%s13068_s2 + $0x1b8] ss:$24 sps:$4 sm:$0xff]  }
 0x6c5   :  { %13382 = vst [vmem:[#allocation51_spill] sm:$0xff] %v12528_v42 }
 0x6c6   :  { %9461 = vrcp.f32 %v5031_v52  ;;  %v12536_v52 = vld [vmem:[%s13068_s2 + $0x1e4] ss:$24 sps:$4 sm:$0xff]  }
 0x6c7   :  { %9463 = vtanh.f32 %v5035_v54  ;;  %v12522_v54 = vld [vmem:[%s13068_s2 + $0x1bc] ss:$24 sps:$4 sm:$0xff]  }
 0x6c8   :  { %13381 = vst [vmem:[#allocation50_spill] sm:$0xff] %v12522_v54 }
 0x6d0   :  { %v9462_v58 = vpop.eup %9461 }
 0x6d1   :  { %v5037_v12 = vsub.f32 1.0, %v9462_v58  ;;  %v9464_v30 = vpop.eup %9463  ;;  %v5039_v50 = vmul.f32 %v9462_v58, %v11980_v44  ;;  %v12541_v58 = vld [vmem:[%s13068_s2 + $0x1e0] ss:$24 sps:$4 sm:$0xff]   ;;  %v12588_v44 = vld [vmem:[%s13068_s2 + $0x244] ss:$24 sps:$4 sm:$0xff]  }
 0x6d3   :  { %v5038_v34 = vmul.f32 %v9464_v30, %v5037_v12  ;;  %v12546_v12 = vld [vmem:[%s13068_s2 + $0x1ec] ss:$24 sps:$4 sm:$0xff]   ;;  %v12552_v30 = vld [vmem:[%s13068_s2 + $0x1e8] ss:$24 sps:$4 sm:$0xff]  }
 0x6d4   :  { %13383 = vst [vmem:[#allocation52_spill] sm:$0xff] %v12546_v12  ;;  %13384 = vst [vmem:[#allocation53_spill] sm:$0xff] %v12552_v30 }
 0x6d5   :  { %v12211_v19 = vadd.f32 %v5039_v50, %v5038_v34  ;;  %v12560_v34 = vld [vmem:[%s13068_s2 + $0x214] ss:$24 sps:$4 sm:$0xff]   ;;  %v12565_v50 = vld [vmem:[%s13068_s2 + $0x210] ss:$24 sps:$4 sm:$0xff]  }
 0x6d7   :  { %v5044_v45 = vpack.c.bf16 %v12211_v19, %v12211_v19 }
 0x6d9   :  { %5653 = vmatprep.mubr.bf16.mxu1 %v5044_v45  ;;  %5694 = vmatprep.mubr.bf16.mxu0 %v5044_v45 }
 0x6da   :  { %5654 = vmatmul.mubr.bf16.vlgmr.msra.gmra.mrb[64].mxu1 %v5043_v3  ;;  %5695 = vmatmul.mubr.bf16.vlgmr.msra.gmra.mrb[60].mxu0 %v5043_v3 }
 0x6db   :  { %5704 = vmatpush1.bf16.msra.mxu1 %v12218_v1  ;;  %5735 = vmatprep.mubr.bf16.mxu1 %v5044_v45  ;;  %v12570_v45 = vld [vmem:[%s13068_s2 + $0x21c] ss:$24 sps:$4 sm:$0xff]  }
 0x6dc   :  { %5705 = vmatprep.subr.bf16.mxu1 %v12225_v16  ;;  %13385 = vst [vmem:[#allocation54_spill] sm:$0xff] %v12570_v45 }
 0x6df   :  { %5706 = vmatpush1.bf16.msra.mxu1 %v12231_v24 }
 0x6e0   :  { %5707 = vmatprep.subr.bf16.mxu1 %v12237_v26 }
 0x6e3   :  { %5708 = vmatpush1.bf16.msra.mxu1 %v12243_v0 }
 0x6e4   :  { %5709 = vmatprep.subr.bf16.mxu1 %v12249_v31 }
 0x6e7   :  { %5710 = vmatpush1.bf16.msra.mxu1 %v12255_v36 }
 0x6e8   :  { %5711 = vmatprep.subr.bf16.mxu1 %v12261_v9 }
 0x6eb   :  { %5712 = vmatpush1.bf16.msra.mxu1 %v12267_v10 }
 0x6ec   :  { %5713 = vmatprep.subr.bf16.mxu1 %v12007_v53  ;;  %v12296_v53 = vld [vmem:[%s13068_s2] ss:$24 sps:$4 sm:$0xff]  }
 0x6ef   :  { %5714 = vmatpush1.bf16.msra.mxu1 %v12015_v37  ;;  %v12301_v37 = vld [vmem:[%s13068_s2 + $0x4] ss:$24 sps:$4 sm:$0xff]  }
 0x6f0   :  { %5715 = vmatprep.subr.bf16.mxu1 %v12021_v22  ;;  %v12306_v22 = vld [vmem:[%s13068_s2 + $0x8] ss:$24 sps:$4 sm:$0xff]   ;;  %6372 = vmatprep.subr.bf16.mxu0 %v12301_v37 }
 0x6f1   :  { %13364 = vst [vmem:[#allocation25_spill] sm:$0xff] %v12306_v22  ;;  %6373 = vmatpush1.bf16.msra.mxu0 %v12296_v53 }
 0x6f3   :  { %5716 = vmatpush1.bf16.msra.mxu1 %v12029_v39  ;;  %v12311_v39 = vld [vmem:[%s13068_s2 + $0xc] ss:$24 sps:$4 sm:$0xff]  }
 0x6f4   :  { %5717 = vmatprep.subr.bf16.mxu1 %v12035_v7  ;;  %v12316_v7 = vld [vmem:[%s13068_s2 + $0x34] ss:$24 sps:$4 sm:$0xff]  }
 0x6f5   :  { %6374 = vmatprep.subr.bf16.mxu0 %v12316_v7 }
 0x6f7   :  { %5718 = vmatpush1.bf16.msra.mxu1 %v12043_v33  ;;  %v12322_v33 = vld [vmem:[%s13068_s2 + $0x3c] ss:$24 sps:$4 sm:$0xff]  }
 0x6f8   :  { %5719 = vmatprep.subr.bf16.mxu1 %v12049_v62  ;;  %13365 = vst [vmem:[#allocation18_spill] sm:$0xff] %v12322_v33  ;;  %v12329_v62 = vld [vmem:[%s13068_s2 + $0x30] ss:$24 sps:$4 sm:$0xff]  }
 0x6f9   :  { %6375 = vmatpush1.bf16.msra.mxu0 %v12329_v62 }
 0x6fb   :  { %5720 = vmatpush1.bf16.msra.mxu1 %v12057_v47  ;;  %v12336_v47 = vld [vmem:[%s13068_s2 + $0x38] ss:$24 sps:$4 sm:$0xff]  }
 0x6fc   :  { %5721 = vmatprep.subr.bf16.mxu1 %v12063_v55  ;;  %13366 = vst [vmem:[#allocation38_spill] sm:$0xff] %v12336_v47  ;;  %v12341_v55 = vld [vmem:[%s13068_s2 + $0x64] ss:$24 sps:$4 sm:$0xff]  }
 0x6fd   :  { %6376 = vmatprep.subr.bf16.mxu0 %v12341_v55 }
 0x6ff   :  { %5722 = vmatpush1.bf16.msra.mxu1 %v12071_v6  ;;  %v12347_v6 = vld [vmem:[%s13068_s2 + $0x6c] ss:$24 sps:$4 sm:$0xff]  }
 0x700   :  { %5723 = vmatprep.subr.bf16.mxu1 %v12077_v49  ;;  %13367 = vst [vmem:[#allocation39_spill] sm:$0xff] %v12347_v6  ;;  %v12353_v49 = vld [vmem:[%s13068_s2 + $0x60] ss:$24 sps:$4 sm:$0xff]  }
 0x701   :  { %6377 = vmatpush1.bf16.msra.mxu0 %v12353_v49 }
 0x703   :  { %5724 = vmatpush1.bf16.msra.mxu1 %v12085_v28  ;;  %v12360_v28 = vld [vmem:[%s13068_s2 + $0x68] ss:$24 sps:$4 sm:$0xff]  }
 0x704   :  { %5725 = vmatprep.subr.bf16.mxu1 %v12091_v35  ;;  %13368 = vst [vmem:[#allocation6_spill] sm:$0xff] %v12360_v28  ;;  %v12365_v35 = vld [vmem:[%s13068_s2 + $0x94] ss:$24 sps:$4 sm:$0xff]  }
 0x705   :  { %6378 = vmatprep.subr.bf16.mxu0 %v12365_v35 }
 0x707   :  { %5726 = vmatpush1.bf16.msra.mxu1 %v12099_v4  ;;  %v12371_v4 = vld [vmem:[%s13068_s2 + $0x9c] ss:$24 sps:$4 sm:$0xff]  }
 0x708   :  { %5727 = vmatprep.subr.bf16.mxu1 %v12105_v13  ;;  %13369 = vst [vmem:[#allocation7_spill] sm:$0xff] %v12371_v4  ;;  %v12377_v13 = vld [vmem:[%s13068_s2 + $0x90] ss:$24 sps:$4 sm:$0xff]  }
 0x709   :  { %6379 = vmatpush1.bf16.msra.mxu0 %v12377_v13 }
 0x70b   :  { %5728 = vmatpush1.bf16.msra.mxu1 %v12113_v20  ;;  %v12384_v20 = vld [vmem:[%s13068_s2 + $0x98] ss:$24 sps:$4 sm:$0xff]  }
 0x70c   :  { %5729 = vmatprep.subr.bf16.mxu1 %v12119_v56  ;;  %13370 = vst [vmem:[#allocation23_spill] sm:$0xff] %v12384_v20  ;;  %v12389_v56 = vld [vmem:[%s13068_s2 + $0xc4] ss:$24 sps:$4 sm:$0xff]  }
 0x70d   :  { %6380 = vmatprep.subr.bf16.mxu0 %v12389_v56 }
 0x70f   :  { %5730 = vmatpush1.bf16.msra.mxu1 %v12127_v15  ;;  %v12395_v15 = vld [vmem:[%s13068_s2 + $0xcc] ss:$24 sps:$4 sm:$0xff]  }
 0x710   :  { %5731 = vmatprep.subr.bf16.mxu1 %v12133_v59  ;;  %13371 = vst [vmem:[#allocation20_spill] sm:$0xff] %v12395_v15  ;;  %v12401_v59 = vld [vmem:[%s13068_s2 + $0xc0] ss:$24 sps:$4 sm:$0xff]  }
 0x711   :  { %6381 = vmatpush1.bf16.msra.mxu0 %v12401_v59 }
 0x713   :  { %5732 = vmatpush1.bf16.msra.mxu1 %v12141_v8  ;;  %v12408_v8 = vld [vmem:[%s13068_s2 + $0xc8] ss:$24 sps:$4 sm:$0xff]  }
 0x714   :  { %5733 = vmatprep.subr.bf16.mxu1 %v12147_v11  ;;  %13372 = vst [vmem:[#allocation36_spill] sm:$0xff] %v12408_v8  ;;  %v12413_v11 = vld [vmem:[%s13068_s2 + $0xf4] ss:$24 sps:$4 sm:$0xff]  }
 0x715   :  { %6382 = vmatprep.subr.bf16.mxu0 %v12413_v11 }
 0x716   :  { %6383 = vmatpush1.bf16.msra.mxu0 %v12425_v43 }
 0x717   :  { %5734 = vmatpush1.bf16.msra.mxu1 %v12155_v51  ;;  %v12419_v51 = vld [vmem:[%s13068_s2 + $0xfc] ss:$24 sps:$4 sm:$0xff]   ;;  %6384 = vmatprep.subr.bf16.mxu0 %v12437_v18 }
 0x718   :  { %6413 = vmatprep.subr.bf16.mxu1 %v12311_v39  ;;  %13373 = vst [vmem:[#allocation37_spill] sm:$0xff] %v12419_v51 }
 0x71a   :  { %5736 = vmatmul.mubr.bf16.vlgmr.msra.gmra.mrb[68].mxu1 %v5043_v3  ;;  %6385 = vmatpush1.bf16.msra.mxu0 %v12449_v63  ;;  %v12576_v3 = vld [vmem:[%s13068_s2 + $0x218] ss:$24 sps:$4 sm:$0xff]  }
 0x71b   :  { %6414 = vmatpush1.bf16.msra.mxu1 %v12306_v22  ;;  %6386 = vmatprep.subr.bf16.mxu0 %v12464_v40  ;;  %13386 = vst [vmem:[#allocation55_spill] sm:$0xff] %v12576_v3  ;;  %v13398_v22 = vld [vmem:[#allocation24_spill] sm:$0xff] }
 0x71c   :  { %6415 = vmatprep.subr.bf16.mxu1 %v12322_v33 }
 0x71e   :  { %6387 = vmatpush1.bf16.msra.mxu0 %v12469_v38 }
 0x71f   :  { %6416 = vmatpush1.bf16.msra.mxu1 %v12336_v47  ;;  %6388 = vmatprep.subr.bf16.mxu0 %v12488_v60 }
 0x720   :  { %6417 = vmatprep.subr.bf16.mxu1 %v12347_v6 }
 0x722   :  { %6389 = vmatpush1.bf16.msra.mxu0 %v12493_v14 }
 0x723   :  { %6418 = vmatpush1.bf16.msra.mxu1 %v12360_v28  ;;  %6390 = vmatprep.subr.bf16.mxu0 %v12512_v48 }
 0x724   :  { %6419 = vmatprep.subr.bf16.mxu1 %v12371_v4 }
 0x726   :  { %6391 = vmatpush1.bf16.msra.mxu0 %v12517_v25 }
 0x727   :  { %6420 = vmatpush1.bf16.msra.mxu1 %v12384_v20  ;;  %6392 = vmatprep.subr.bf16.mxu0 %v12536_v52 }
 0x728   :  { %6421 = vmatprep.subr.bf16.mxu1 %v12395_v15 }
 0x72a   :  { %6393 = vmatpush1.bf16.msra.mxu0 %v12541_v58 }
 0x72b   :  { %6422 = vmatpush1.bf16.msra.mxu1 %v12408_v8  ;;  %6394 = vmatprep.subr.bf16.mxu0 %v12560_v34  ;;  %v13397_v8 = vld [vmem:[#allocation19_spill] sm:$0xff] }
 0x72c   :  { %6423 = vmatprep.subr.bf16.mxu1 %v12419_v51 }
 0x72e   :  { %6395 = vmatpush1.bf16.msra.mxu0 %v12565_v50 }
 0x72f   :  { %6424 = vmatpush1.bf16.msra.mxu1 %v12432_v32  ;;  %6396 = vmatprep.subr.bf16.mxu0 %v12588_v44  ;;  %v13396_v32 = vld [vmem:[#allocation11_spill] sm:$0xff] }
 0x730   :  { %6425 = vmatprep.subr.bf16.mxu1 %v12443_v46 }
 0x732   :  { %6397 = vmatpush1.bf16.msra.mxu0 %v12583_v29 }
 0x733   :  { %6426 = vmatpush1.bf16.msra.mxu1 %v12456_v5 }
 0x734   :  { %6427 = vmatprep.subr.bf16.mxu1 %v12474_v57 }
 0x737   :  { %6428 = vmatpush1.bf16.msra.mxu1 %v12480_v41 }
 0x738   :  { %6429 = vmatprep.subr.bf16.mxu1 %v12498_v2 }
 0x73b   :  { %6430 = vmatpush1.bf16.msra.mxu1 %v12504_v61  ;;  %v12659_v61 = vld [vmem:[%s13068_s2 + $0x2dc] ss:$24 sps:$4 sm:$0xff]  }
 0x73c   :  { %6431 = vmatprep.subr.bf16.mxu1 %v12522_v54  ;;  %v12653_v54 = vld [vmem:[%s13068_s2 + $0x2d4] ss:$24 sps:$4 sm:$0xff]   ;;  %13393 = vst [vmem:[#allocation62_spill] sm:$0xff] %v12659_v61 }
 0x73f   :  { %6432 = vmatpush1.bf16.msra.mxu1 %v12528_v42  ;;  %v12635_v42 = vld [vmem:[%s13068_s2 + $0x2ac] ss:$24 sps:$4 sm:$0xff]  }
 0x740   :  { %6433 = vmatprep.subr.bf16.mxu1 %v12546_v12  ;;  %v12624_v12 = vld [vmem:[%s13068_s2 + $0x278] ss:$24 sps:$4 sm:$0xff]   ;;  %13391 = vst [vmem:[#allocation60_spill] sm:$0xff] %v12635_v42 }
 0x741   :  { %13390 = vst [vmem:[#allocation59_spill] sm:$0xff] %v12624_v12 }
 0x743   :  { %6434 = vmatpush1.bf16.msra.mxu1 %v12552_v30  ;;  %v12617_v30 = vld [vmem:[%s13068_s2 + $0x270] ss:$24 sps:$4 sm:$0xff]  }
 0x744   :  { %6435 = vmatprep.subr.bf16.mxu1 %v12570_v45  ;;  %v12604_v45 = vld [vmem:[%s13068_s2 + $0x274] ss:$24 sps:$4 sm:$0xff]  }
 0x745   :  { %6398 = vmatprep.subr.bf16.mxu0 %v12604_v45 }
 0x746   :  { %6399 = vmatpush1.bf16.msra.mxu0 %v12617_v30 }
 0x747   :  { %6436 = vmatpush1.bf16.msra.mxu1 %v12576_v3  ;;  %v12610_v3 = vld [vmem:[%s13068_s2 + $0x27c] ss:$24 sps:$4 sm:$0xff]  }
 0x748   :  { %13389 = vst [vmem:[#allocation58_spill] sm:$0xff] %v12610_v3  ;;  %6437 = vmatprep.subr.bf16.mxu1 %v12599_v27  ;;  %v12629_v27 = vld [vmem:[%s13068_s2 + $0x2a4] ss:$24 sps:$4 sm:$0xff]  }
 0x749   :  { %6400 = vmatprep.subr.bf16.mxu0 %v12629_v27 }
 0x74b   :  { %6438 = vmatpush1.bf16.msra.mxu1 %v12594_v17  ;;  %v12641_v17 = vld [vmem:[%s13068_s2 + $0x2a0] ss:$24 sps:$4 sm:$0xff]  }
 0x74c   :  { %6439 = vmatprep.subr.bf16.mxu1 %v12610_v3  ;;  %v12648_v3 = vld [vmem:[%s13068_s2 + $0x2a8] ss:$24 sps:$4 sm:$0xff]   ;;  %6401 = vmatpush1.bf16.msra.mxu0 %v12641_v17 }
 0x74d   :  { %13392 = vst [vmem:[#allocation61_spill] sm:$0xff] %v12648_v3  ;;  %6402 = vmatprep.subr.bf16.mxu0 %v12653_v54 }
 0x74f   :  { %6440 = vmatpush1.bf16.msra.mxu1 %v12624_v12  ;;  %v12665_v12 = vld [vmem:[%s13068_s2 + $0x2d0] ss:$24 sps:$4 sm:$0xff]  }
 0x750   :  { %6441 = vmatprep.subr.bf16.mxu1 %v12635_v42  ;;  %v12672_v42 = vld [vmem:[%s13068_s2 + $0x2d8] ss:$24 sps:$4 sm:$0xff]   ;;  %6403 = vmatpush1.bf16.msra.mxu0 %v12665_v12 }
 0x751   :  { %13394 = vst [vmem:[#allocation63_spill] sm:$0xff] %v12672_v42  ;;  %6454 = vmatprep.subr.bf16.mxu0 %v12198_v21 }
 0x753   :  { %6442 = vmatpush1.bf16.msra.mxu1 %v12648_v3  ;;  %v13395_v3 = vld [vmem:[#allocation10_spill] sm:$0xff] }
 0x754   :  { %6443 = vmatprep.subr.bf16.mxu1 %v12659_v61 }
 0x757   :  { %6444 = vmatpush1.bf16.msra.mxu1 %v12672_v42 }
 0x758   :  { %7123 = vmatprep.subr.bf16.mxu1 %v12301_v37 }
 0x7ad   :  { %v5655_v2 = vpop.f32.mrb[64].mxu1  ;;  %v5696_v41 = vpop.f32.mrb[60].mxu0 }
 0x7ae   :  { %v5750_v57 = vadd.f32 %v5655_v2, %v13395_v3  ;;  %v5657_v5 = vpop.f32.mrb[65].mxu1  ;;  %v5698_v46 = vpop.f32.mrb[61].mxu0 }
 0x7af   :  { %v5757_v51 = vadd.f32 %v5657_v5, %v13396_v32  ;;  %v5771_v15 = vadd.f32 %v5698_v46, %v13397_v8  ;;  %v5659_v20 = vpop.f32.mrb[66].mxu1  ;;  %v5700_v61 = vpop.f32.mrb[62].mxu0 }
 0x7b0   :  { %v8262_v4 = vmul.f32 -1.442695, %v5750_v57  ;;  %v5660_v28 = vpop.f32.mrb[67].mxu1  ;;  %v5701_v6 = vpop.f32.mrb[63].mxu0 }
 0x7b1   :  { %v8263_v42 = vmul.f32 -1.442695, %v5757_v51  ;;  %v8264_v8 = vmul.f32 -1.442695, %v5771_v15 }
 0x7b2   :  { %9465 = vpow2.f32 %v8262_v4 }
 0x7b3   :  { %9467 = vpow2.f32 %v8263_v42 }
 0x7bc   :  { %v9466_v21 = vpop.eup %9465 }
 0x7bd   :  { %v5754_v37 = vadd.f32 1.0, %v9466_v21  ;;  %v9468_v47 = vpop.eup %9467 }
 0x7be   :  { %v5761_v33 = vadd.f32 1.0, %v9468_v47 }
 0x7bf   :  { %9469 = vrcp.f32 %v5754_v37 }
 0x7c0   :  { %9471 = vrcp.f32 %v5761_v33 }
 0x7c9   :  { %v9470_v2 = vpop.eup %9469 }
 0x7ca   :  { %v5764_v3 = vmul.f32 %v9470_v2, %v5696_v41  ;;  %v9472_v20 = vpop.eup %9471  ;;  %v13399_v41 = vld [vmem:[#allocation32_spill] sm:$0xff]  ;;  %v13400_v2 = vld [vmem:[#allocation33_spill] sm:$0xff] }
 0x7cb   :  { %v5767_v46 = vsub.f32 1.0, %v9472_v20  ;;  %v5769_v4 = vmul.f32 %v9472_v20, %v12206_v23 }
 0x7cc   :  { %v5765_v32 = vadd.f32 %v5764_v3, %v13398_v22 }
 0x7ce   :  { %9473 = vtanh.f32 %v5765_v32 }
 0x7cf   :  { %9475 = vpow2.f32 %v8264_v8 }
 0x7d8   :  { %v9474_v28 = vpop.eup %9473 }
 0x7d9   :  { %v5768_v6 = vmul.f32 %v9474_v28, %v5767_v46  ;;  %v9476_v5 = vpop.eup %9475 }
 0x7da   :  { %v5775_v57 = vadd.f32 1.0, %v9476_v5 }
 0x7db   :  { %v12684_v51 = vadd.f32 %v5769_v4, %v5768_v6 }
 0x7dc   :  { %9477 = vrcp.f32 %v5775_v57 }
 0x7e6   :  { %v9478_v61 = vpop.eup %9477 }
 0x7ed   :  { %v5737_v47 = vpop.f32.mrb[68].mxu1 }
 0x7ee   :  { %v5778_v33 = vadd.f32 %v5737_v47, %v13399_v41  ;;  %v5739_v42 = vpop.f32.mrb[69].mxu1  ;;  %v12695_v47 = vpack.c.bf16 %v12684_v51, %v12684_v51  ;;  %v13421_v41 = vld [vmem:[#allocation53_spill] sm:$0xff] }
 0x7ef   :  { %v5785_v22 = vmul.f32 %v9478_v61, %v5739_v42  ;;  %v5741_v21 = vpop.f32.mrb[70].mxu1  ;;  %v13420_v61 = vld [vmem:[#allocation52_spill] sm:$0xff]  ;;  %v13423_v42 = vld [vmem:[#allocation55_spill] sm:$0xff] }
 0x7f0   :  { %v8265_v15 = vmul.f32 -1.442695, %v5778_v33  ;;  %v5742_v37 = vpop.f32.mrb[71].mxu1  ;;  %v13422_v33 = vld [vmem:[#allocation54_spill] sm:$0xff]  ;;  %v13425_v21 = vld [vmem:[#allocation56_spill] sm:$0xff] }
 0x7f1   :  { %v5786_v3 = vadd.f32 %v5785_v22, %v13400_v2  ;;  %v13424_v22 = vld [vmem:[#allocation57_spill] sm:$0xff]  ;;  %v13427_v37 = vld [vmem:[#allocation59_spill] sm:$0xff]  ;;  %v13428_v2 = vld [vmem:[#allocation60_spill] sm:$0xff] }
 0x7f2   :  { %9479 = vpow2.f32 %v8265_v15  ;;  %v13426_v15 = vld [vmem:[#allocation58_spill] sm:$0xff] }
 0x7fc   :  { %v9480_v32 = vpop.eup %9479 }
 0x7fd   :  { %v5782_v8 = vadd.f32 1.0, %v9480_v32  ;;  %v13430_v32 = vld [vmem:[#allocation62_spill] sm:$0xff] }
 0x7ff   :  { %9481 = vrcp.f32 %v5782_v8  ;;  %v13431_v8 = vld [vmem:[#allocation63_spill] sm:$0xff] }
 0x800   :  { %9483 = vtanh.f32 %v5786_v3  ;;  %v13429_v3 = vld [vmem:[#allocation61_spill] sm:$0xff] }
 0x809   :  { %v9482_v20 = vpop.eup %9481 }
 0x80a   :  { %v5788_v46 = vsub.f32 1.0, %v9482_v20  ;;  %v9484_v28 = vpop.eup %9483  ;;  %v5790_v4 = vmul.f32 %v9482_v20, %v12211_v19  ;;  %v9336_v20 = vld [vmem:[%s13068_s2 + $0x14] ss:$24 sps:$4 sm:$0xff]  }
 0x80c   :  { %v5789_v6 = vmul.f32 %v9484_v28, %v5788_v46 }
 0x80e   :  { %v12689_v5 = vadd.f32 %v5790_v4, %v5789_v6  ;;  %v13432_v6 = vld [vmem:[#allocation12_spill] sm:$0xff] }
 0x810   :  { %v5795_v57 = vpack.c.bf16 %v12689_v5, %v12689_v5 }
 0x812   :  { %6404 = vmatprep.mubr.bf16.mxu0 %v5795_v57  ;;  %6445 = vmatprep.mubr.bf16.mxu1 %v5795_v57 }
 0x813   :  { %6405 = vmatmul.mubr.bf16.vlgmr.msra.gmra.mrb[64].mxu0 %v12695_v47  ;;  %6446 = vmatmul.mubr.bf16.vlgmr.msra.gmra.mrb[72].mxu1 %v12695_v47 }
 0x814   :  { %6455 = vmatpush1.bf16.msra.mxu0 %v12218_v1  ;;  %6486 = vmatprep.mubr.bf16.mxu0 %v5795_v57  ;;  %v12716_v1 = vld [vmem:[%s13068_s2 + $0x104] ss:$24 sps:$4 sm:$0xff]  }
 0x815   :  { %6456 = vmatprep.subr.bf16.mxu0 %v12225_v16  ;;  %7124 = vmatpush1.bf16.msra.mxu1 %v12296_v53  ;;  %v12724_v16 = vld [vmem:[%s13068_s2 + $0x100] ss:$24 sps:$4 sm:$0xff]  }
 0x816   :  { %7125 = vmatprep.subr.bf16.mxu1 %v12316_v7  ;;  %v12780_v53 = vld [vmem:[%s13068_s2 + $0x1c0] ss:$24 sps:$4 sm:$0xff]   ;;  %v12786_v7 = vld [vmem:[%s13068_s2 + $0x1f4] ss:$24 sps:$4 sm:$0xff]  }
 0x818   :  { %6457 = vmatpush1.bf16.msra.mxu0 %v12231_v24  ;;  %v12730_v24 = vld [vmem:[%s13068_s2 + $0x134] ss:$24 sps:$4 sm:$0xff]  }
 0x819   :  { %6458 = vmatprep.subr.bf16.mxu0 %v12237_v26  ;;  %7126 = vmatpush1.bf16.msra.mxu1 %v12329_v62  ;;  %v12738_v26 = vld [vmem:[%s13068_s2 + $0x130] ss:$24 sps:$4 sm:$0xff]  }
 0x81a   :  { %7127 = vmatprep.subr.bf16.mxu1 %v12341_v55  ;;  %v12794_v62 = vld [vmem:[%s13068_s2 + $0x1f0] ss:$24 sps:$4 sm:$0xff]   ;;  %v12800_v55 = vld [vmem:[%s13068_s2 + $0x224] ss:$24 sps:$4 sm:$0xff]  }
 0x81c   :  { %6459 = vmatpush1.bf16.msra.mxu0 %v12243_v0  ;;  %v12744_v0 = vld [vmem:[%s13068_s2 + $0x164] ss:$24 sps:$4 sm:$0xff]  }
 0x81d   :  { %6460 = vmatprep.subr.bf16.mxu0 %v12249_v31  ;;  %7128 = vmatpush1.bf16.msra.mxu1 %v12353_v49  ;;  %v12752_v31 = vld [vmem:[%s13068_s2 + $0x160] ss:$24 sps:$4 sm:$0xff]  }
 0x81e   :  { %7129 = vmatprep.subr.bf16.mxu1 %v12365_v35  ;;  %v12808_v49 = vld [vmem:[%s13068_s2 + $0x220] ss:$24 sps:$4 sm:$0xff]   ;;  %v12814_v35 = vld [vmem:[%s13068_s2 + $0x254] ss:$24 sps:$4 sm:$0xff]  }
 0x820   :  { %6461 = vmatpush1.bf16.msra.mxu0 %v12255_v36  ;;  %v12758_v36 = vld [vmem:[%s13068_s2 + $0x194] ss:$24 sps:$4 sm:$0xff]  }
 0x821   :  { %6462 = vmatprep.subr.bf16.mxu0 %v12261_v9  ;;  %7130 = vmatpush1.bf16.msra.mxu1 %v12377_v13  ;;  %v12766_v9 = vld [vmem:[%s13068_s2 + $0x190] ss:$24 sps:$4 sm:$0xff]  }
 0x822   :  { %7131 = vmatprep.subr.bf16.mxu1 %v12389_v56  ;;  %v12822_v13 = vld [vmem:[%s13068_s2 + $0x250] ss:$24 sps:$4 sm:$0xff]   ;;  %v12828_v56 = vld [vmem:[%s13068_s2 + $0x284] ss:$24 sps:$4 sm:$0xff]  }
 0x824   :  { %6463 = vmatpush1.bf16.msra.mxu0 %v12267_v10  ;;  %v12772_v10 = vld [vmem:[%s13068_s2 + $0x1c4] ss:$24 sps:$4 sm:$0xff]  }
 0x825   :  { %6464 = vmatprep.subr.bf16.mxu0 %v12716_v1  ;;  %7132 = vmatpush1.bf16.msra.mxu1 %v12401_v59  ;;  %v12836_v59 = vld [vmem:[%s13068_s2 + $0x280] ss:$24 sps:$4 sm:$0xff]  }
 0x826   :  { %7133 = vmatprep.subr.bf16.mxu1 %v12413_v11  ;;  %v12842_v11 = vld [vmem:[%s13068_s2 + $0x2b4] ss:$24 sps:$4 sm:$0xff]  }
 0x828   :  { %6465 = vmatpush1.bf16.msra.mxu0 %v12724_v16 }
 0x829   :  { %6466 = vmatprep.subr.bf16.mxu0 %v12730_v24  ;;  %7134 = vmatpush1.bf16.msra.mxu1 %v12425_v43  ;;  %v12856_v43 = vld [vmem:[%s13068_s2 + $0x2e4] ss:$24 sps:$4 sm:$0xff]  }
 0x82a   :  { %7135 = vmatprep.subr.bf16.mxu1 %v12437_v18  ;;  %v13402_v18 = vld [vmem:[#allocation18_spill] sm:$0xff] }
 0x82c   :  { %6467 = vmatpush1.bf16.msra.mxu0 %v12738_v26 }
 0x82d   :  { %6468 = vmatprep.subr.bf16.mxu0 %v12744_v0  ;;  %7136 = vmatpush1.bf16.msra.mxu1 %v12449_v63  ;;  %v13403_v63 = vld [vmem:[#allocation38_spill] sm:$0xff] }
 0x82e   :  { %7137 = vmatprep.subr.bf16.mxu1 %v12464_v40  ;;  %v13404_v40 = vld [vmem:[#allocation39_spill] sm:$0xff] }
 0x830   :  { %6469 = vmatpush1.bf16.msra.mxu0 %v12752_v31 }
 0x831   :  { %6470 = vmatprep.subr.bf16.mxu0 %v12758_v36  ;;  %7138 = vmatpush1.bf16.msra.mxu1 %v12469_v38  ;;  %v13405_v38 = vld [vmem:[#allocation6_spill] sm:$0xff] }
 0x832   :  { %7139 = vmatprep.subr.bf16.mxu1 %v12488_v60  ;;  %v13407_v60 = vld [vmem:[#allocation23_spill] sm:$0xff] }
 0x834   :  { %6471 = vmatpush1.bf16.msra.mxu0 %v12766_v9 }
 0x835   :  { %6472 = vmatprep.subr.bf16.mxu0 %v12772_v10  ;;  %7140 = vmatpush1.bf16.msra.mxu1 %v12493_v14  ;;  %v13408_v14 = vld [vmem:[#allocation20_spill] sm:$0xff] }
 0x836   :  { %7141 = vmatprep.subr.bf16.mxu1 %v12512_v48  ;;  %v13410_v48 = vld [vmem:[#allocation37_spill] sm:$0xff] }
 0x838   :  { %6473 = vmatpush1.bf16.msra.mxu0 %v12780_v53 }
 0x839   :  { %6474 = vmatprep.subr.bf16.mxu0 %v12786_v7  ;;  %7142 = vmatpush1.bf16.msra.mxu1 %v12517_v25  ;;  %v13411_v25 = vld [vmem:[#allocation42_spill] sm:$0xff] }
 0x83a   :  { %7143 = vmatprep.subr.bf16.mxu1 %v12536_v52  ;;  %v13413_v52 = vld [vmem:[#allocation45_spill] sm:$0xff] }
 0x83c   :  { %6475 = vmatpush1.bf16.msra.mxu0 %v12794_v62 }
 0x83d   :  { %6476 = vmatprep.subr.bf16.mxu0 %v12800_v55  ;;  %7144 = vmatpush1.bf16.msra.mxu1 %v12541_v58  ;;  %v13414_v58 = vld [vmem:[#allocation46_spill] sm:$0xff] }
 0x83e   :  { %7145 = vmatprep.subr.bf16.mxu1 %v12560_v34  ;;  %v13417_v34 = vld [vmem:[#allocation49_spill] sm:$0xff] }
 0x840   :  { %6477 = vmatpush1.bf16.msra.mxu0 %v12808_v49 }
 0x841   :  { %6478 = vmatprep.subr.bf16.mxu0 %v12814_v35  ;;  %7146 = vmatpush1.bf16.msra.mxu1 %v12565_v50  ;;  %v13418_v50 = vld [vmem:[#allocation50_spill] sm:$0xff] }
 0x842   :  { %7147 = vmatprep.subr.bf16.mxu1 %v12588_v44  ;;  %v12850_v44 = vld [vmem:[%s13068_s2 + $0x2b0] ss:$24 sps:$4 sm:$0xff]  }
 0x844   :  { %6479 = vmatpush1.bf16.msra.mxu0 %v12822_v13 }
 0x845   :  { %6480 = vmatprep.subr.bf16.mxu0 %v12828_v56  ;;  %7148 = vmatpush1.bf16.msra.mxu1 %v12583_v29  ;;  %v12864_v29 = vld [vmem:[%s13068_s2 + $0x2e0] ss:$24 sps:$4 sm:$0xff]  }
 0x846   :  { %7149 = vmatprep.subr.bf16.mxu1 %v12604_v45  ;;  %v13419_v45 = vld [vmem:[#allocation51_spill] sm:$0xff] }
 0x848   :  { %6481 = vmatpush1.bf16.msra.mxu0 %v12836_v59 }
 0x849   :  { %6482 = vmatprep.subr.bf16.mxu0 %v12842_v11  ;;  %7150 = vmatpush1.bf16.msra.mxu1 %v12617_v30  ;;  %v13416_v30 = vld [vmem:[#allocation48_spill] sm:$0xff] }
 0x84a   :  { %7151 = vmatprep.subr.bf16.mxu1 %v12629_v27  ;;  %v13401_v27 = vld [vmem:[#allocation25_spill] sm:$0xff] }
 0x84c   :  { %6483 = vmatpush1.bf16.msra.mxu0 %v12850_v44 }
 0x84d   :  { %6484 = vmatprep.subr.bf16.mxu0 %v12856_v43  ;;  %7152 = vmatpush1.bf16.msra.mxu1 %v12641_v17  ;;  %v13406_v17 = vld [vmem:[#allocation7_spill] sm:$0xff] }
 0x84e   :  { %7153 = vmatprep.subr.bf16.mxu1 %v12653_v54  ;;  %v13412_v54 = vld [vmem:[#allocation44_spill] sm:$0xff] }
 0x850   :  { %6485 = vmatpush1.bf16.msra.mxu0 %v12864_v29 }
 0x851   :  { %7164 = vmatprep.subr.bf16.mxu0 %v12311_v39  ;;  %7154 = vmatpush1.bf16.msra.mxu1 %v12665_v12  ;;  %v13409_v39 = vld [vmem:[#allocation36_spill] sm:$0xff]  ;;  %v13415_v12 = vld [vmem:[#allocation47_spill] sm:$0xff] }
 0x852   :  { %7205 = vmatprep.subr.bf16.mxu1 %v9336_v20 }
 0x853   :  { %6487 = vmatmul.mubr.bf16.vlgmr.msra.gmra.mrb[68].mxu0 %v12695_v47 }
 0x854   :  { %7165 = vmatpush1.bf16.msra.mxu0 %v13401_v27  ;;  %v13433_v27 = vld [vmem:[#allocation13_spill] sm:$0xff] }
 0x855   :  { %7166 = vmatprep.subr.bf16.mxu0 %v13402_v18 }
 0x858   :  { %7167 = vmatpush1.bf16.msra.mxu0 %v13403_v63  ;;  %v13434_v63 = vld [vmem:[#allocation17_spill] sm:$0xff] }
 0x859   :  { %7168 = vmatprep.subr.bf16.mxu0 %v13404_v40 }
 0x85c   :  { %7169 = vmatpush1.bf16.msra.mxu0 %v13405_v38 }
 0x85d   :  { %7170 = vmatprep.subr.bf16.mxu0 %v13406_v17 }
 0x860   :  { %7171 = vmatpush1.bf16.msra.mxu0 %v13407_v60 }
 0x861   :  { %7172 = vmatprep.subr.bf16.mxu0 %v13408_v14 }
 0x864   :  { %7173 = vmatpush1.bf16.msra.mxu0 %v13409_v39 }
 0x865   :  { %7174 = vmatprep.subr.bf16.mxu0 %v13410_v48 }
 0x868   :  { %7175 = vmatpush1.bf16.msra.mxu0 %v13411_v25 }
 0x869   :  { %7176 = vmatprep.subr.bf16.mxu0 %v13412_v54 }
 0x86c   :  { %7177 = vmatpush1.bf16.msra.mxu0 %v13413_v52 }
 0x86d   :  { %7178 = vmatprep.subr.bf16.mxu0 %v13414_v58 }
 0x870   :  { %7179 = vmatpush1.bf16.msra.mxu0 %v13415_v12 }
 0x871   :  { %7180 = vmatprep.subr.bf16.mxu0 %v13416_v30 }
 0x874   :  { %7181 = vmatpush1.bf16.msra.mxu0 %v13417_v34  ;;  %v13435_v34 = vld [vmem:[#allocation26_spill] sm:$0xff] }
 0x875   :  { %7182 = vmatprep.subr.bf16.mxu0 %v13418_v50 }
 0x878   :  { %7183 = vmatpush1.bf16.msra.mxu0 %v13419_v45 }
 0x879   :  { %7184 = vmatprep.subr.bf16.mxu0 %v13420_v61 }
 0x87c   :  { %7185 = vmatpush1.bf16.msra.mxu0 %v13421_v41 }
 0x87d   :  { %7186 = vmatprep.subr.bf16.mxu0 %v13422_v33 }
 0x880   :  { %7187 = vmatpush1.bf16.msra.mxu0 %v13423_v42 }
 0x881   :  { %7188 = vmatprep.subr.bf16.mxu0 %v13424_v22 }
 0x884   :  { %7189 = vmatpush1.bf16.msra.mxu0 %v13425_v21 }
 0x885   :  { %7190 = vmatprep.subr.bf16.mxu0 %v13426_v15 }
 0x888   :  { %7191 = vmatpush1.bf16.msra.mxu0 %v13427_v37 }
 0x889   :  { %7192 = vmatprep.subr.bf16.mxu0 %v13428_v2 }
 0x88c   :  { %7193 = vmatpush1.bf16.msra.mxu0 %v13429_v3 }
 0x88d   :  { %7194 = vmatprep.subr.bf16.mxu0 %v13430_v32  ;;  %v13436_v32 = vld [vmem:[#allocation30_spill] sm:$0xff] }
 0x890   :  { %7195 = vmatpush1.bf16.msra.mxu0 %v13431_v8 }
 0x8e6   :  { %v6406_v46 = vpop.f32.mrb[64].mxu0  ;;  %v6447_v28 = vpop.f32.mrb[72].mxu1 }
 0x8e7   :  { %v6501_v4 = vadd.f32 %v6406_v46, %v13432_v6  ;;  %v6408_v57 = vpop.f32.mrb[65].mxu0  ;;  %v6449_v47 = vpop.f32.mrb[73].mxu1 }
 0x8e8   :  { %v6508_v18 = vadd.f32 %v6408_v57, %v13433_v27  ;;  %v6522_v40 = vadd.f32 %v6449_v47, %v13434_v63  ;;  %v6410_v38 = vpop.f32.mrb[66].mxu0  ;;  %v6451_v17 = vpop.f32.mrb[74].mxu1  ;;  %v13437_v57 = vld [vmem:[#allocation31_spill] sm:$0xff] }
 0x8e9   :  { %v8362_v60 = vmul.f32 -1.442695, %v6501_v4  ;;  %v6411_v14 = vpop.f32.mrb[67].mxu0  ;;  %v6452_v39 = vpop.f32.mrb[75].mxu1 }
 0x8ea   :  { %v8363_v48 = vmul.f32 -1.442695, %v6508_v18  ;;  %v8364_v45 = vmul.f32 -1.442695, %v6522_v40 }
 0x8eb   :  { %9485 = vpow2.f32 %v8362_v60 }
 0x8ec   :  { %9487 = vpow2.f32 %v8363_v48  ;;  %v9334_v48 = vld [vmem:[%s13068_s2 + $0x10] ss:$24 sps:$4 sm:$0xff]  }
 0x8f5   :  { %v9486_v25 = vpop.eup %9485 }
 0x8f6   :  { %v6505_v54 = vadd.f32 1.0, %v9486_v25  ;;  %v9488_v52 = vpop.eup %9487 }
 0x8f7   :  { %v6512_v58 = vadd.f32 1.0, %v9488_v52  ;;  %v9337_v52 = vld [vmem:[%s13068_s2 + $0x40] ss:$24 sps:$4 sm:$0xff]  }
 0x8f8   :  { %9489 = vrcp.f32 %v6505_v54  ;;  %v9339_v54 = vld [vmem:[%s13068_s2 + $0x44] ss:$24 sps:$4 sm:$0xff]  }
 0x8f9   :  { %9491 = vrcp.f32 %v6512_v58  ;;  %v9342_v58 = vld [vmem:[%s13068_s2 + $0x74] ss:$24 sps:$4 sm:$0xff]  }
 0x902   :  { %v9490_v12 = vpop.eup %9489 }
 0x903   :  { %v6515_v30 = vmul.f32 %v9490_v12, %v6447_v28  ;;  %v9492_v61 = vpop.eup %9491  ;;  %v9340_v12 = vld [vmem:[%s13068_s2 + $0x70] ss:$24 sps:$4 sm:$0xff]  }
 0x904   :  { %v6518_v41 = vsub.f32 1.0, %v9492_v61  ;;  %v6520_v22 = vmul.f32 %v9492_v61, %v12684_v51  ;;  %v13439_v61 = vld [vmem:[#allocation15_spill] sm:$0xff] }
 0x905   :  { %v6516_v50 = vadd.f32 %v6515_v30, %v13435_v34  ;;  %v9345_v30 = vld [vmem:[%s13068_s2 + $0xa4] ss:$24 sps:$4 sm:$0xff]   ;;  %v9343_v34 = vld [vmem:[%s13068_s2 + $0xa0] ss:$24 sps:$4 sm:$0xff]  }
 0x907   :  { %9493 = vtanh.f32 %v6516_v50  ;;  %v9348_v50 = vld [vmem:[%s13068_s2 + $0xd4] ss:$24 sps:$4 sm:$0xff]  }
 0x908   :  { %9495 = vpow2.f32 %v8364_v45  ;;  %v9346_v45 = vld [vmem:[%s13068_s2 + $0xd0] ss:$24 sps:$4 sm:$0xff]  }
 0x911   :  { %v9494_v33 = vpop.eup %9493 }
 0x912   :  { %v6519_v42 = vmul.f32 %v9494_v33, %v6518_v41  ;;  %v9496_v15 = vpop.eup %9495  ;;  %v13440_v33 = vld [vmem:[#allocation16_spill] sm:$0xff] }
 0x913   :  { %v6526_v37 = vadd.f32 1.0, %v9496_v15 }
 0x914   :  { %v12912_v21 = vadd.f32 %v6520_v22, %v6519_v42 }
 0x915   :  { %9497 = vrcp.f32 %v6526_v37 }
 0x916   :  { %v6545_v25 = vpack.c.bf16 %v12912_v21, %v12912_v21 }
 0x91f   :  { %v9498_v3 = vpop.eup %9497 }
 0x926   :  { %v6488_v2 = vpop.f32.mrb[68].mxu0 }
 0x927   :  { %v6529_v8 = vadd.f32 %v6488_v2, %v13436_v32  ;;  %v6490_v20 = vpop.f32.mrb[69].mxu0 }
 0x928   :  { %v6536_v46 = vmul.f32 %v9498_v3, %v6490_v20  ;;  %v6492_v28 = vpop.f32.mrb[70].mxu0 }
 0x929   :  { %v8365_v6 = vmul.f32 -1.442695, %v6529_v8  ;;  %v6493_v4 = vpop.f32.mrb[71].mxu0 }
 0x92a   :  { %v6537_v47 = vadd.f32 %v6536_v46, %v13437_v57  ;;  %v13441_v57 = vld [vmem:[#allocation27_spill] sm:$0xff] }
 0x92b   :  { %9499 = vpow2.f32 %v8365_v6 }
 0x935   :  { %v9500_v27 = vpop.eup %9499 }
 0x936   :  { %v6533_v18 = vadd.f32 1.0, %v9500_v27 }
 0x938   :  { %9501 = vrcp.f32 %v6533_v18 }
 0x939   :  { %9503 = vtanh.f32 %v6537_v47 }
 0x942   :  { %v9502_v63 = vpop.eup %9501 }
 0x943   :  { %v6539_v40 = vsub.f32 1.0, %v9502_v63  ;;  %v9504_v38 = vpop.eup %9503  ;;  %v6541_v60 = vmul.f32 %v9502_v63, %v12689_v5 }
 0x945   :  { %v6540_v17 = vmul.f32 %v9504_v38, %v6539_v40 }
 0x947   :  { %v12917_v14 = vadd.f32 %v6541_v60, %v6540_v17 }
 0x949   :  { %v6546_v39 = vpack.c.bf16 %v12917_v14, %v12917_v14 }
 0x94b   :  { %7155 = vmatprep.mubr.bf16.mxu1 %v6546_v39  ;;  %7196 = vmatprep.mubr.bf16.mxu0 %v6546_v39 }
 0x94c   :  { %7156 = vmatmul.mubr.bf16.vlgmr.msra.gmra.mrb[76].mxu1 %v6545_v25  ;;  %7197 = vmatmul.mubr.bf16.vlgmr.msra.gmra.mrb[72].mxu0 %v6545_v25 }
 0x94d   :  { %7206 = vmatpush1.bf16.msra.mxu1 %v9334_v48  ;;  %7237 = vmatprep.mubr.bf16.mxu1 %v6546_v39 }
 0x94e   :  { %7207 = vmatprep.subr.bf16.mxu1 %v9339_v54 }
 0x951   :  { %7208 = vmatpush1.bf16.msra.mxu1 %v9337_v52  ;;  %v13442_v52 = vld [vmem:[#allocation28_spill] sm:$0xff] }
 0x952   :  { %7209 = vmatprep.subr.bf16.mxu1 %v9342_v58 }
 0x955   :  { %7210 = vmatpush1.bf16.msra.mxu1 %v9340_v12 }
 0x956   :  { %7211 = vmatprep.subr.bf16.mxu1 %v9345_v30 }
 0x959   :  { %7212 = vmatpush1.bf16.msra.mxu1 %v9343_v34 }
 0x95a   :  { %7213 = vmatprep.subr.bf16.mxu1 %v9348_v50 }
 0x95d   :  { %7214 = vmatpush1.bf16.msra.mxu1 %v9346_v45 }
 0x95e   :  { %7215 = vmatprep.subr.bf16.mxu1 %v12716_v1  ;;  %v9349_v1 = vld [vmem:[%s13069_s3 + $0x40] sm:$0xff]  }
 0x95f   :  { %8482 = vmatprep.subr.bf16.mxu0 %v9349_v1  ;;  %v13443_v1 = vld [vmem:[#allocation29_spill] sm:$0xff] }
 0x961   :  { %7216 = vmatpush1.bf16.msra.mxu1 %v12724_v16  ;;  %v9350_v16 = vld [vmem:[%s13069_s3] sm:$0xff]  }
 0x962   :  { %7217 = vmatprep.subr.bf16.mxu1 %v12730_v24  ;;  %8483 = vmatpush3.bf16.msra.mxu0 %v9350_v16  ;;  %v9351_v24 = vld [vmem:[%s13069_s3 + $0x48] sm:$0xff]  }
 0x963   :  { %8484 = vmatprep.subr.bf16.mxu0 %v9351_v24 }
 0x965   :  { %7218 = vmatpush1.bf16.msra.mxu1 %v12738_v26  ;;  %v9352_v26 = vld [vmem:[%s13069_s3 + $0x8] sm:$0xff]  }
 0x966   :  { %7219 = vmatprep.subr.bf16.mxu1 %v12744_v0  ;;  %8485 = vmatpush3.bf16.msra.mxu0 %v9352_v26  ;;  %v9353_v0 = vld [vmem:[%s13069_s3 + $0x50] sm:$0xff]  }
 0x967   :  { %8486 = vmatprep.subr.bf16.mxu0 %v9353_v0 }
 0x969   :  { %7220 = vmatpush1.bf16.msra.mxu1 %v12752_v31  ;;  %v9354_v31 = vld [vmem:[%s13069_s3 + $0x10] sm:$0xff]  }
 0x96a   :  { %7221 = vmatprep.subr.bf16.mxu1 %v12758_v36  ;;  %8487 = vmatpush3.bf16.msra.mxu0 %v9354_v31  ;;  %v9355_v36 = vld [vmem:[%s13069_s3 + $0x58] sm:$0xff]  }
 0x96b   :  { %8488 = vmatprep.subr.bf16.mxu0 %v9355_v36 }
 0x96d   :  { %7222 = vmatpush1.bf16.msra.mxu1 %v12766_v9  ;;  %v9356_v9 = vld [vmem:[%s13069_s3 + $0x18] sm:$0xff]  }
 0x96e   :  { %7223 = vmatprep.subr.bf16.mxu1 %v12772_v10  ;;  %v9357_v10 = vld [vmem:[%s13069_s3 + $0x60] sm:$0xff]   ;;  %8489 = vmatpush3.bf16.msra.mxu0 %v9356_v9 }
 0x96f   :  { %8490 = vmatprep.subr.bf16.mxu0 %v9357_v10 }
 0x971   :  { %7224 = vmatpush1.bf16.msra.mxu1 %v12780_v53  ;;  %v9358_v53 = vld [vmem:[%s13069_s3 + $0x20] sm:$0xff]  }
 0x972   :  { %7225 = vmatprep.subr.bf16.mxu1 %v12786_v7  ;;  %v9359_v7 = vld [vmem:[%s13069_s3 + $0x68] sm:$0xff]   ;;  %8491 = vmatpush3.bf16.msra.mxu0 %v9358_v53 }
 0x973   :  { %8492 = vmatprep.subr.bf16.mxu0 %v9359_v7 }
 0x975   :  { %7226 = vmatpush1.bf16.msra.mxu1 %v12794_v62  ;;  %v9360_v62 = vld [vmem:[%s13069_s3 + $0x28] sm:$0xff]  }
 0x976   :  { %7227 = vmatprep.subr.bf16.mxu1 %v12800_v55  ;;  %v9361_v55 = vld [vmem:[%s13069_s3 + $0x70] sm:$0xff]   ;;  %8493 = vmatpush3.bf16.msra.mxu0 %v9360_v62  ;;  %v13444_v62 = vld [vmem:[#allocation40_spill] sm:$0xff] }
 0x977   :  { %8494 = vmatprep.subr.bf16.mxu0 %v9361_v55  ;;  %v13445_v55 = vld [vmem:[#allocation75_spill] sm:$0xff] }
 0x979   :  { %7228 = vmatpush1.bf16.msra.mxu1 %v12808_v49  ;;  %v9362_v49 = vld [vmem:[%s13069_s3 + $0x30] sm:$0xff]  }
 0x97a   :  { %7229 = vmatprep.subr.bf16.mxu1 %v12814_v35  ;;  %v9363_v35 = vld [vmem:[%s13069_s3 + $0x78] sm:$0xff]   ;;  %8495 = vmatpush3.bf16.msra.mxu0 %v9362_v49  ;;  %v7312_v49 = vpack.c.bf16 %v13445_v55, %v13444_v62 }
 0x97b   :  { %8496 = vmatprep.subr.bf16.mxu0 %v9363_v35  ;;  %v7315_v35 = vpack.c.bf16 %v12211_v19, %v12689_v5 }
 0x97d   :  { %7230 = vmatpush1.bf16.msra.mxu1 %v12822_v13  ;;  %v9364_v13 = vld [vmem:[%s13069_s3 + $0x38] sm:$0xff]  }
 0x97e   :  { %7231 = vmatprep.subr.bf16.mxu1 %v12828_v56  ;;  %8497 = vmatpush3.bf16.msra.mxu0 %v9364_v13  ;;  %v13446_v13 = vld [vmem:[#allocation43_spill] sm:$0xff] }
 0x981   :  { %7232 = vmatpush1.bf16.msra.mxu1 %v12836_v59 }
 0x982   :  { %7233 = vmatprep.subr.bf16.mxu1 %v12842_v11  ;;  %v13438_v11 = vld [vmem:[#allocation14_spill] sm:$0xff] }
 0x985   :  { %7234 = vmatpush1.bf16.msra.mxu1 %v12850_v44 }
 0x986   :  { %7235 = vmatprep.subr.bf16.mxu1 %v12856_v43 }
 0x989   :  { %7236 = vmatpush1.bf16.msra.mxu1 %v12864_v29 }
 0x98c   :  { %7238 = vmatmul.mubr.bf16.vlgmr.msra.gmra.mrb[80].mxu1 %v6545_v25 }
 0xa1f   :  { %v7157_v56 = vpop.f32.mrb[76].mxu1  ;;  %v7198_v59 = vpop.f32.mrb[72].mxu0 }
 0xa20   :  { %v7252_v44 = vadd.f32 %v7157_v56, %v13438_v11  ;;  %v7159_v43 = vpop.f32.mrb[77].mxu1  ;;  %v7200_v29 = vpop.f32.mrb[73].mxu0  ;;  %v13447_v56 = vld [vmem:[#allocation4_spill] sm:$0xff]  ;;  %v13448_v11 = vld [vmem:[#allocation5_spill] sm:$0xff] }
 0xa21   :  { %v7259_v41 = vadd.f32 %v7159_v43, %v13439_v61  ;;  %v7273_v42 = vadd.f32 %v7200_v29, %v13440_v33  ;;  %v7161_v22 = vpop.f32.mrb[78].mxu1  ;;  %v7202_v15 = vpop.f32.mrb[74].mxu0  ;;  %v13450_v29 = vld [vmem:[#allocation76_spill] sm:$0xff]  ;;  %v13451_v61 = vld [vmem:[#allocation41_spill] sm:$0xff] }
 0xa22   :  { %v8462_v37 = vmul.f32 -1.442695, %v7252_v44  ;;  %v7162_v2 = vpop.f32.mrb[79].mxu1  ;;  %v7203_v3 = vpop.f32.mrb[75].mxu0  ;;  %v13449_v44 = vld [vmem:[#allocation73_spill] sm:$0xff] }
 0xa23   :  { %v8463_v32 = vmul.f32 -1.442695, %v7259_v41  ;;  %v8464_v27 = vmul.f32 -1.442695, %v7273_v42  ;;  %v7317_v43 = vpack.c.bf16 %v13449_v44, %v13448_v11  ;;  %v7319_v41 = vpack.c.bf16 %v13451_v61, %v13450_v29 }
 0xa24   :  { %9505 = vpow2.f32 %v8462_v37 }
 0xa25   :  { %9507 = vpow2.f32 %v8463_v32 }
 0xa2e   :  { %v9506_v8 = vpop.eup %9505 }
 0xa2f   :  { %v7256_v20 = vadd.f32 1.0, %v9506_v8  ;;  %v9508_v46 = vpop.eup %9507 }
 0xa30   :  { %v7263_v28 = vadd.f32 1.0, %v9508_v46 }
 0xa31   :  { %9509 = vrcp.f32 %v7256_v20 }
 0xa32   :  { %9511 = vrcp.f32 %v7263_v28 }
 0xa3b   :  { %v9510_v6 = vpop.eup %9509 }
 0xa3c   :  { %v7266_v4 = vmul.f32 %v9510_v6, %v7198_v59  ;;  %v9512_v18 = vpop.eup %9511  ;;  %v7314_v59 = vpack.c.bf16 %v13447_v56, %v13446_v13 }
 0xa3d   :  { %v7269_v63 = vsub.f32 1.0, %v9512_v18  ;;  %v7271_v17 = vmul.f32 %v9512_v18, %v12912_v21 }
 0xa3e   :  { %v7267_v47 = vadd.f32 %v7266_v4, %v13441_v57 }
 0xa40   :  { %9513 = vtanh.f32 %v7267_v47 }
 0xa41   :  { %9515 = vpow2.f32 %v8464_v27 }
 0xa4a   :  { %v9514_v40 = vpop.eup %9513 }
 0xa4b   :  { %v7270_v38 = vmul.f32 %v9514_v40, %v7269_v63  ;;  %v9516_v39 = vpop.eup %9515 }
 0xa4c   :  { %v7277_v48 = vadd.f32 1.0, %v9516_v39 }
 0xa4d   :  { %v7272_v60 = vadd.f32 %v7271_v17, %v7270_v38 }
 0xa4e   :  { %9517 = vrcp.f32 %v7277_v48 }
 0xa4f   :  { %v7318_v19 = vpack.c.bf16 %v7272_v60, %v12912_v21 }
 0xa58   :  { %v9518_v54 = vpop.eup %9517 }
 0xa5f   :  { %v7239_v25 = vpop.f32.mrb[80].mxu1 }
 0xa60   :  { %v7280_v58 = vadd.f32 %v7239_v25, %v13442_v52  ;;  %v7241_v12 = vpop.f32.mrb[81].mxu1 }
 0xa61   :  { %v7287_v30 = vmul.f32 %v9518_v54, %v7241_v12  ;;  %v7243_v34 = vpop.f32.mrb[82].mxu1 }
 0xa62   :  { %v8465_v50 = vmul.f32 -1.442695, %v7280_v58  ;;  %v7244_v45 = vpop.f32.mrb[83].mxu1 }
 0xa63   :  { %v7288_v16 = vadd.f32 %v7287_v30, %v13443_v1 }
 0xa64   :  { %9519 = vpow2.f32 %v8465_v50 }
 0xa6e   :  { %v9520_v24 = vpop.eup %9519 }
 0xa6f   :  { %v7284_v26 = vadd.f32 1.0, %v9520_v24 }
 0xa71   :  { %9521 = vrcp.f32 %v7284_v26 }
 0xa72   :  { %9523 = vtanh.f32 %v7288_v16 }
 0xa7b   :  { %v9522_v0 = vpop.eup %9521 }
 0xa7c   :  { %v7290_v31 = vsub.f32 1.0, %v9522_v0  ;;  %v9524_v36 = vpop.eup %9523  ;;  %v7292_v10 = vmul.f32 %v9522_v0, %v12917_v14 }
 0xa7e   :  { %v7291_v9 = vmul.f32 %v9524_v36, %v7290_v31 }
 0xa80   :  { %v7293_v53 = vadd.f32 %v7292_v10, %v7291_v9 }
 0xa82   :  { %v7313_v7 = vpack.c.bf16 %v12917_v14, %v7293_v53  ;;  %v7316_v14 = vpack.c.bf16 %v12684_v51, %v12206_v23 }
 0xa84   :  { %7480 = vmatprep.mubr.bf16.mxu0 %v7313_v7 }
 0xa85   :  { %7481 = vmatmul.mubr.bf16.vlgmr.msra.gmra.mrb[76].mxu0 %v7312_v49 }
 0xa86   :  { %7488 = vmatprep.mubr.bf16.mxu0 %v7315_v35 }
 0xa8d   :  { %7489 = vmatmul.mubr.bf16.gmra.mrb[80].mxu0 %v7314_v59 }
 0xa8e   :  { %7496 = vmatprep.mubr.bf16.mxu0 %v7317_v43 }
 0xa95   :  { %7497 = vmatmul.mubr.bf16.gmra.mrb[84].mxu0 %v7316_v14 }
 0xa96   :  { %7504 = vmatprep.mubr.bf16.mxu0 %v7319_v41 }
 0xa9d   :  { %7505 = vmatmul.mubr.bf16.gmra.mrb[88].mxu0 %v7318_v19 }
 0xb58   :  { %v8498_v5 = vpop.f32.mrb[76].mxu0 }
 0xb59   :  { %v8499_v33 = vpop.f32.mrb[77].mxu0 }
 0xb5a   :  { %v8500_v42 = vadd.f32 %v8499_v33, %v8498_v5  ;;  %v8501_v22 = vpop.f32.mrb[78].mxu0 }
 0xb5b   :  { %v8502_v15 = vpop.f32.mrb[79].mxu0 }
 0xb5c   :  { %7513 = vst [vmem:[%s13070_s4] sm:$0xff] %v8500_v42  ;;  %v8503_v37 = vadd.f32 %v8502_v15, %v8501_v22 }
 0xb5e   :  { %7514 = vst [vmem:[%s13070_s4 + $0x8] sm:$0xff] %v8503_v37 }
 0xb60   :  { %v8504_v23 = vpop.f32.mrb[80].mxu0 }
 0xb61   :  { %v8505_v51 = vpop.f32.mrb[81].mxu0 }
 0xb62   :  { %v8506_v2 = vadd.f32 %v8505_v51, %v8504_v23  ;;  %v8507_v3 = vpop.f32.mrb[82].mxu0 }
 0xb63   :  { %v8508_v21 = vpop.f32.mrb[83].mxu0 }
 0xb64   :  { %7515 = vst [vmem:[%s13070_s4 + $0x10] sm:$0xff] %v8506_v2  ;;  %v8509_v32 = vadd.f32 %v8508_v21, %v8507_v3 }
 0xb66   :  { %7516 = vst [vmem:[%s13070_s4 + $0x18] sm:$0xff] %v8509_v32 }
 0xb68   :  { %v8510_v8 = vpop.f32.mrb[84].mxu0 }
 0xb69   :  { %v8511_v20 = vpop.f32.mrb[85].mxu0 }
 0xb6a   :  { %v8512_v46 = vadd.f32 %v8511_v20, %v8510_v8  ;;  %v8513_v28 = vpop.f32.mrb[86].mxu0 }
 0xb6b   :  { %v8514_v6 = vpop.f32.mrb[87].mxu0 }
 0xb6c   :  { %7517 = vst [vmem:[%s13070_s4 + $0x20] sm:$0xff] %v8512_v46  ;;  %v8515_v4 = vadd.f32 %v8514_v6, %v8513_v28 }
 0xb6e   :  { %7518 = vst [vmem:[%s13070_s4 + $0x28] sm:$0xff] %v8515_v4 }
 0xb70   :  { %v8516_v57 = vpop.f32.mrb[88].mxu0 }
 0xb71   :  { %v8517_v47 = vpop.f32.mrb[89].mxu0 }
 0xb72   :  { %v8518_v27 = vadd.f32 %v8517_v47, %v8516_v57  ;;  %v8519_v18 = vpop.f32.mrb[90].mxu0 }
 0xb73   :  { %v8520_v63 = vpop.f32.mrb[91].mxu0 }
 0xb74   :  { %7519 = vst [vmem:[%s13070_s4 + $0x30] sm:$0xff] %v8518_v27  ;;  %v8521_v40 = vadd.f32 %v8520_v63, %v8519_v18 }
 0xb76   :  { %7520 = vst [vmem:[%s13070_s4 + $0x38] sm:$0xff] %v8521_v40 }

</bundles_post_ra>
